<compile_context>
chip_gen: v7x
topology: tpu7x:2x2x1
jax: 0.10.0
libtpu: 0.0.40
codegen_flags: <defaults>
</compile_context>

<pallas_src>
import jax
import jax.numpy as jnp
from jax.experimental import pallas as pl
from jax.experimental.pallas import tpu as pltpu

INPUT_SIZE = 2048
HIDDEN_SIZE = 768
OUTPUT_SIZE = 768


def fp_mlp_kernel(x_ref, w1_ref, b1_ref, w2_ref, b2_ref, out_ref):
    """Fused 2-layer MLP for one batch tile.  Weights are VMEM-resident."""
    x = x_ref[...].astype(jnp.bfloat16)
    # fc1 on the MXU: bf16 x bf16 -> f32 accumulate.
    h = jnp.dot(x, w1_ref[...], preferred_element_type=jnp.float32)
    h = jnp.maximum(h + b1_ref[...], 0.0)
    # fc2 on the MXU: bf16 x bf16 -> f32 accumulate.
    y = jnp.dot(h.astype(jnp.bfloat16), w2_ref[...],
                preferred_element_type=jnp.float32)
    out_ref[...] = (y + b2_ref[...]).astype(out_ref.dtype)


def _round_up(n, m):
    return ((n + m - 1) // m) * m


def _default_batch_tile():
    # v6e/v7x MXUs are 2x256x256 -> 256 rows per tile; earlier chips are
    # 128-wide -> 128 rows.  Fall back to 128 if the device kind is unknown.
    try:
        kind = jax.devices()[0].device_kind.lower()
    except Exception:
        return 128
    return 256 if ("v6" in kind or "v7" in kind) else 128


def fp_encoder_forward(x, w1, b1, w2, b2, *, batch_tile=None, out_dtype=None):
    """fc2(relu(fc1(x))) with bf16-streamed weights and f32 accumulation.

    x : (B, 2048) float32 or bfloat16 (pass bf16 fingerprints to halve
        activation HBM traffic; do not astype right before the call).
    w1: (2048, 768), b1: (768,), w2: (768, 768), b2: (768,)
    Weights may be passed in any float dtype; they are streamed as bf16
    (pass bf16 params to avoid the one-time wrapper cast).
    """
    B, K = x.shape
    H = w1.shape[1]
    O = w2.shape[1]
    out_dtype = x.dtype if out_dtype is None else out_dtype

    # Sublane packing: bf16 packs 16 rows per vreg, f32 packs 8.
    sub = 16 if x.dtype == jnp.bfloat16 else 8
    if batch_tile is None:
        batch_tile = _default_batch_tile()
    tb = _round_up(min(batch_tile, _round_up(B, sub)), sub)
    num_tiles = pl.cdiv(B, tb)            # ragged last tile is masked by Pallas

    # Stream weights as bf16 (no-op if params are already kept in bf16).
    w1b = w1 if w1.dtype == jnp.bfloat16 else w1.astype(jnp.bfloat16)
    w2b = w2 if w2.dtype == jnp.bfloat16 else w2.astype(jnp.bfloat16)
    b1f = b1.astype(jnp.float32).reshape(1, H)
    b2f = b2.astype(jnp.float32).reshape(1, O)

    # Megacore sharding only pays off when each core gets >= 2 tiles; otherwise
    # (v7x) it just duplicates the resident-weight DMA into each core's VMEM.
    semantics = ("parallel",) if num_tiles >= 4 else ("arbitrary",)

    itemsize_x = jnp.dtype(x.dtype).itemsize
    itemsize_o = jnp.dtype(out_dtype).itemsize
    cost = pl.CostEstimate(
        flops=2 * B * (K * H + H * O),
        transcendentals=0,
        bytes_accessed=(B * K * itemsize_x + B * O * itemsize_o
                        + w1b.size * 2 + w2b.size * 2
                        + (b1f.size + b2f.size) * 4),
    )

    grid_spec = pltpu.PrefetchScalarGridSpec(
        num_scalar_prefetch=0,
        grid=(num_tiles,),                                 # batch is the grid axis
        in_specs=[
            pl.BlockSpec((tb, K), lambda i: (i, 0)),       # x tile streams per batch block
            pl.BlockSpec((K, H), lambda i: (0, 0)),        # W1 resident (bf16)
            pl.BlockSpec((1, H), lambda i: (0, 0)),        # b1 resident
            pl.BlockSpec((H, O), lambda i: (0, 0)),        # W2 resident (bf16)
            pl.BlockSpec((1, O), lambda i: (0, 0)),        # b2 resident
        ],
        out_specs=pl.BlockSpec((tb, O), lambda i: (i, 0)), # lane-dense (768) output
    )

    return pl.pallas_call(
        fp_mlp_kernel,
        out_shape=jax.ShapeDtypeStruct((B, O), out_dtype),
        grid_spec=grid_spec,
        compiler_params=pltpu.CompilerParams(
            dimension_semantics=semantics,
            vmem_limit_bytes=32 << 20,    # ~14 MiB actual footprint at tb=256
        ),
        cost_estimate=cost,
    )(x, w1b, b1f, w2b, b2f)


def init_params(key):
    """Deterministic synthetic parameters (nn.Linear-like scale)."""
    k1, k2, k3, k4 = jax.random.split(key, 4)
    s1 = 1.0 / jnp.sqrt(INPUT_SIZE)
    s2 = 1.0 / jnp.sqrt(HIDDEN_SIZE)
    w1 = jax.random.uniform(k1, (INPUT_SIZE, HIDDEN_SIZE), jnp.float32, -s1, s1)
    b1 = jax.random.uniform(k2, (HIDDEN_SIZE,), jnp.float32, -s1, s1)
    w2 = jax.random.uniform(k3, (HIDDEN_SIZE, OUTPUT_SIZE), jnp.float32, -s2, s2)
    b2 = jax.random.uniform(k4, (OUTPUT_SIZE,), jnp.float32, -s2, s2)
    return w1, b1, w2, b2


def reference_forward(x, w1b, b1, w2b, b2):
    """Pure-JAX reference with the same bf16-weight numerics (f32 accumulate)."""
    h = jnp.maximum(
        jnp.dot(x.astype(jnp.bfloat16), w1b, preferred_element_type=jnp.float32) + b1,
        0.0,
    )
    return jnp.dot(h.astype(jnp.bfloat16), w2b,
                   preferred_element_type=jnp.float32) + b2


if __name__ == "__main__":
    key = jax.random.PRNGKey(0)
    k_in, k_par = jax.random.split(key)
    w1, b1, w2, b2 = init_params(k_par)

    # Params stored in bf16 (this is where the HBM-byte savings come from).
    w1b = w1.astype(jnp.bfloat16)
    w2b = w2.astype(jnp.bfloat16)

    # Small batch of molecule fingerprints (feature sizes fixed by the module):
    # collapses to a single grid step, "arbitrary" semantics, no padding copy.
    B = 16
    x = jax.random.normal(k_in, (B, INPUT_SIZE), jnp.float32)
    out = jax.block_until_ready(fp_encoder_forward(x, w1b, b1, w2b, b2))
    assert out.shape == (B, OUTPUT_SIZE)

    ref_bf16 = reference_forward(x, w1b, b1, w2b, b2)
    assert jnp.allclose(out, ref_bf16, atol=2e-2, rtol=2e-2)

    # Loose check against the full-f32 PyTorch-equivalent forward.
    ref_f32 = jnp.maximum(x @ w1 + b1, 0.0) @ w2 + b2
    assert jnp.allclose(out, ref_f32, atol=1e-1, rtol=1e-1)

    # Ragged batch: exercises the pl.cdiv grid + masked partial last tile
    # (replaces the old wrapper-side jnp.pad copy of x).
    B2 = 20
    x2 = jax.random.normal(k_in, (B2, INPUT_SIZE), jnp.float32)
    out2 = jax.block_until_ready(
        fp_encoder_forward(x2, w1b, b1, w2b, b2, batch_tile=16))
    assert out2.shape == (B2, OUTPUT_SIZE)
    ref2 = reference_forward(x2, w1b, b1, w2b, b2)
    assert jnp.allclose(out2, ref2, atol=2e-2, rtol=2e-2)

    print("KERNEL_OK")
</pallas_src>

<mosaic_0001>
module attributes {stable_mosaic.version = 11 : i64} {
  func.func @fp_mlp_kernel(%arg0: i32, %arg1: memref<16x2048xf32, #tpu.memory_space<vmem>>, %arg2: memref<2048x768xbf16, #tpu.memory_space<vmem>>, %arg3: memref<1x768xf32, #tpu.memory_space<vmem>>, %arg4: memref<768x768xbf16, #tpu.memory_space<vmem>>, %arg5: memref<1x768xf32, #tpu.memory_space<vmem>>, %arg6: memref<16x768xf32, #tpu.memory_space<vmem>>) attributes {dimension_semantics = [#tpu.dimension_semantics<arbitrary>], iteration_bounds = array<i64: 1>, scalar_prefetch = 0 : i64, scratch_operands = 0 : i64, tpu.core_type = #tpu.core_type<tc>, window_params = [{transform_indices = @transform_0, window_bounds = array<i64: 16, 2048>}, {pipeline_mode = #tpu.pipeline_mode<synchronous>, transform_indices = @transform_1, window_bounds = array<i64: 2048, 768>}, {pipeline_mode = #tpu.pipeline_mode<synchronous>, transform_indices = @transform_2, window_bounds = array<i64: 1, 768>}, {pipeline_mode = #tpu.pipeline_mode<synchronous>, transform_indices = @transform_3, window_bounds = array<i64: 768, 768>}, {pipeline_mode = #tpu.pipeline_mode<synchronous>, transform_indices = @transform_4, window_bounds = array<i64: 1, 768>}, {transform_indices = @transform_5, window_bounds = array<i64: 16, 768>}]} {
    %c0 = arith.constant 0 : index
    %c0_0 = arith.constant 0 : index
    %0 = vector.load %arg1[%c0, %c0_0] : memref<16x2048xf32, #tpu.memory_space<vmem>>, vector<16x2048xf32>
    %1 = arith.truncf %0 : vector<16x2048xf32> to vector<16x2048xbf16>
    %c0_1 = arith.constant 0 : index
    %c0_2 = arith.constant 0 : index
    %2 = vector.load %arg2[%c0_1, %c0_2] : memref<2048x768xbf16, #tpu.memory_space<vmem>>, vector<2048x768xbf16>
    %cst = arith.constant dense<0.000000e+00> : vector<16x768xf32>
    %3 = tpu.matmul %1, %2, %cst {dimension_numbers = #tpu.dot_dimension_numbers<[1], [0], [0], [1], [0, 0, 1, 1], [], []>} : vector<16x2048xbf16>, vector<2048x768xbf16>, vector<16x768xf32> -> vector<16x768xf32>
    %c0_3 = arith.constant 0 : index
    %c0_4 = arith.constant 0 : index
    %4 = vector.load %arg3[%c0_3, %c0_4] : memref<1x768xf32, #tpu.memory_space<vmem>>, vector<1x768xf32>
    %5 = vector.broadcast %4 : vector<1x768xf32> to vector<16x768xf32>
    %6 = arith.addf %3, %5 : vector<16x768xf32>
    %cst_5 = arith.constant 0.000000e+00 : f32
    %7 = vector.broadcast %cst_5 : f32 to vector<16x768xf32>
    %8 = arith.maximumf %6, %7 : vector<16x768xf32>
    %9 = arith.truncf %8 : vector<16x768xf32> to vector<16x768xbf16>
    %c0_6 = arith.constant 0 : index
    %c0_7 = arith.constant 0 : index
    %10 = vector.load %arg4[%c0_6, %c0_7] : memref<768x768xbf16, #tpu.memory_space<vmem>>, vector<768x768xbf16>
    %cst_8 = arith.constant dense<0.000000e+00> : vector<16x768xf32>
    %11 = tpu.matmul %9, %10, %cst_8 {dimension_numbers = #tpu.dot_dimension_numbers<[1], [0], [0], [1], [0, 0, 1, 1], [], []>} : vector<16x768xbf16>, vector<768x768xbf16>, vector<16x768xf32> -> vector<16x768xf32>
    %c0_9 = arith.constant 0 : index
    %c0_10 = arith.constant 0 : index
    %12 = vector.load %arg5[%c0_9, %c0_10] : memref<1x768xf32, #tpu.memory_space<vmem>>, vector<1x768xf32>
    %13 = vector.broadcast %12 : vector<1x768xf32> to vector<16x768xf32>
    %14 = arith.addf %11, %13 : vector<16x768xf32>
    %c0_11 = arith.constant 0 : index
    %c0_12 = arith.constant 0 : index
    %15 = vector.load %arg6[%c0_11, %c0_12] : memref<16x768xf32, #tpu.memory_space<vmem>>, vector<16x768xf32>
    tpu.vector_store %arg6[%c0_11, %c0_12], %14 {strides = array<i32>} : memref<16x768xf32, #tpu.memory_space<vmem>>, vector<16x768xf32>,
    return
  }
  func.func @transform_0(%arg0: i32) -> (i32, i32) {
    %c0_i32 = arith.constant 0 : i32
    %c0_i32_0 = arith.constant 0 : i32
    return %arg0, %c0_i32 : i32, i32
  }
  func.func @transform_1(%arg0: i32) -> (i32, i32) {
    %c0_i32 = arith.constant 0 : i32
    %c0_i32_0 = arith.constant 0 : i32
    %c0_i32_1 = arith.constant 0 : i32
    return %c0_i32, %c0_i32_0 : i32, i32
  }
  func.func @transform_2(%arg0: i32) -> (i32, i32) {
    %c0_i32 = arith.constant 0 : i32
    %c0_i32_0 = arith.constant 0 : i32
    %c0_i32_1 = arith.constant 0 : i32
    return %c0_i32, %c0_i32_0 : i32, i32
  }
  func.func @transform_3(%arg0: i32) -> (i32, i32) {
    %c0_i32 = arith.constant 0 : i32
    %c0_i32_0 = arith.constant 0 : i32
    %c0_i32_1 = arith.constant 0 : i32
    return %c0_i32, %c0_i32_0 : i32, i32
  }
  func.func @transform_4(%arg0: i32) -> (i32, i32) {
    %c0_i32 = arith.constant 0 : i32
    %c0_i32_0 = arith.constant 0 : i32
    %c0_i32_1 = arith.constant 0 : i32
    return %c0_i32, %c0_i32_0 : i32, i32
  }
  func.func @transform_5(%arg0: i32) -> (i32, i32) {
    %c0_i32 = arith.constant 0 : i32
    %c0_i32_0 = arith.constant 0 : i32
    return %arg0, %c0_i32 : i32, i32
  }
}

</mosaic_0001>

<bundles_post_ra>
// kernel: tpu_custom_call.1
= control target key start
LH: loop header
LB: loop body
LE: loop exit
PB: predicated region body
PF: predicated region fallthrough
CT: control target
= control target key end

     0   :  { %10 = vsyncpa [#allocation3], 0  ;;  %s11197_s0 = inlined_call_operand.hbm [shape: f32[16,2048], index: 0, kind: input, shape index: {}]   ;;  %s11198_s1 = inlined_call_operand.hbm [shape: bf16[2048,768], index: 1, kind: input, shape index: {}]   ;;  %s11199_s2 = inlined_call_operand.hbm [shape: f32[1,768], index: 2, kind: input, shape index: {}]   ;;  %s11200_s3 = inlined_call_operand.hbm [shape: bf16[768,768], index: 3, kind: input, shape index: {}]   ;;  %s11201_s4 = inlined_call_operand.hbm [shape: f32[1,768], index: 4, kind: input, shape index: {}]   ;;  %s11202_s5 = inlined_call_operand.hbm [shape: f32[16,768], index: 5, kind: output, shape index: {}]  }
   0x1   :  { %11 = vsyncpa [#allocation6], 0 }
   0x2   :  { %12 = vsyncpa [#allocation9], 0 }
   0x3   :  { %13 = vsyncpa [#allocation4], 0  ;;  %s10925_s18 = smov [#allocation5]   ;;  %s10785_s22 = scalar_lea.hbm %s11198_s1, 98304 }
   0x4   :  { %s31_s19 = sshll.u32 %s10925_s18, 4  ;;  %p10786_p0 = scmp.ne.s32.totalorder %s11198_s1, %s10785_s22  ;;  %s32_s19 = int_to_ptr.vmem [resolvable:$true] %s31_s19 }
   0x5   :  { %p10789_p1 = scmp.lt.u32.totalorder %s10785_s22, %s11198_s1 }
   0x7   :  { %p10791_p2 = pnand %p10789_p1, %p10786_p0 }
   0x9   :  { %10794 = shalt.err (!%p10791_p2)
}
   0xa   :  { %s10795_s27 = scalar_lea.vmem %s32_s19, 98304  ;;  %p10800_p4 = scmp.lt.s32.totalorder %s32_s19, %s32_s19 }
   0xb   :  { %p10796_p3 = scmp.ne.s32.totalorder %s32_s19, %s10795_s27  ;;  %p10801_p5 = scmp.lt.s32.totalorder %s10795_s27, %s10795_s27 }
   0xd   :  { %p10802_p6 = por %p10801_p5, %p10800_p4 }
   0xf   :  { %p10803_p7 = pnand %p10802_p6, %p10796_p3 }
  0x11   :  { %10806 = shalt.err (!%p10803_p7)
}
  0x12   :  { %s10926_s28 = smov 384   ;;  %s10927_s29 = smov 24  }
  0x13   :  { %37 = dma.hbm_to_vmem [thread:$0]  %s11198_s1, 98304, %s32_s19, [#allocation6], %s10926_s28, %s10926_s28, %s10927_s29  }
  0x14   :  { %s10928_s7 = smov [#allocation8]   ;;  %s10929_s9 = smov [#allocation2]  }
  0x15   :  { %s53_s8 = sshll.u32 %s10928_s7, 4  ;;  %s19_s10 = sshll.u32 %s10929_s9, 4  ;;  %s54_s8 = int_to_ptr.vmem [resolvable:$true] %s53_s8  ;;  %s20_s10 = int_to_ptr.vmem [resolvable:$true] %s19_s10 }
  0x16   :  { %s10807_s13 = scalar_lea.hbm %s11200_s3, 36864 }
  0x17   :  { %p10808_p8 = scmp.ne.s32.totalorder %s11200_s3, %s10807_s13  ;;  %p10811_p9 = scmp.lt.u32.totalorder %s10807_s13, %s11200_s3 }
  0x19   :  { %p10813_p10 = pnand %p10811_p9, %p10808_p8 }
  0x1b   :  { %10816 = shalt.err (!%p10813_p10)
}
  0x1c   :  { %s10817_s1 = scalar_lea.vmem %s54_s8, 36864  ;;  %p10822_p12 = scmp.lt.s32.totalorder %s54_s8, %s54_s8 }
  0x1d   :  { %p10818_p11 = scmp.ne.s32.totalorder %s54_s8, %s10817_s1  ;;  %p10823_p13 = scmp.lt.s32.totalorder %s10817_s1, %s10817_s1 }
  0x1f   :  { %p10824_p0 = por %p10823_p13, %p10822_p12 }
  0x21   :  { %p10825_p1 = pnand %p10824_p0, %p10818_p11 }
  0x23   :  { %10828 = shalt.err (!%p10825_p1)
}
  0x24   :  { %59 = dma.hbm_to_vmem [thread:$0]  %s11200_s3, 36864, %s54_s8, [#allocation9], %s10926_s28, %s10926_s28, %s10927_s29  }
  0x25   :  { %s10829_s22 = scalar_lea.hbm %s11197_s0, 4096 }
  0x26   :  { %p10830_p2 = scmp.ne.s32.totalorder %s11197_s0, %s10829_s22  ;;  %p10833_p3 = scmp.lt.u32.totalorder %s10829_s22, %s11197_s0 }
  0x28   :  { %p10835_p4 = pnand %p10833_p3, %p10830_p2 }
  0x2a   :  { %10838 = shalt.err (!%p10835_p4)
}
  0x2b   :  { %s10839_s27 = scalar_lea.vmem %s20_s10, 4096  ;;  %p10844_p6 = scmp.lt.s32.totalorder %s20_s10, %s20_s10 }
  0x2c   :  { %p10840_p5 = scmp.ne.s32.totalorder %s20_s10, %s10839_s27  ;;  %p10845_p7 = scmp.lt.s32.totalorder %s10839_s27, %s10839_s27 }
  0x2e   :  { %p10846_p8 = por %p10845_p7, %p10844_p6 }
  0x30   :  { %p10847_p9 = pnand %p10846_p8, %p10840_p5 }
  0x32   :  { %10850 = shalt.err (!%p10847_p9)
}
  0x33   :  { %s10930_s3 = smov 2048   ;;  %s10931_s28 = smov 128  }
  0x34   :  { %25 = dma.hbm_to_vmem [thread:$0]  %s11197_s0, 4096, %s20_s10, [#allocation3], %s10930_s3, %s10930_s3, %s10931_s28  }
  0x35   :  { %s10932_s6 = smov [#allocation7]   ;;  %s10933_s8 = smov [#allocation10]  }
  0x36   :  { %s44_s7 = sshll.u32 %s10932_s6, 4  ;;  %s66_s9 = sshll.u32 %s10933_s8, 4  ;;  %s45_s7 = int_to_ptr.vmem [resolvable:$true] %s44_s7  ;;  %s67_s9 = int_to_ptr.vmem [resolvable:$true] %s66_s9 }
  0x37   :  { %s10851_s13 = scalar_lea.hbm %s11199_s2, 96 }
  0x38   :  { %p10852_p10 = scmp.ne.s32.totalorder %s11199_s2, %s10851_s13  ;;  %p10855_p11 = scmp.lt.u32.totalorder %s10851_s13, %s11199_s2 }
  0x3a   :  { %p10857_p12 = pnand %p10855_p11, %p10852_p10 }
  0x3c   :  { %10860 = shalt.err (!%p10857_p12)
}
  0x3d   :  { %s10861_s0 = scalar_lea.vmem %s45_s7, 96  ;;  %p10866_p0 = scmp.lt.s32.totalorder %s45_s7, %s45_s7 }
  0x3e   :  { %p10862_p13 = scmp.ne.s32.totalorder %s45_s7, %s10861_s0  ;;  %p10867_p1 = scmp.lt.s32.totalorder %s10861_s0, %s10861_s0 }
  0x40   :  { %p10868_p2 = por %p10867_p1, %p10866_p0 }
  0x42   :  { %p10869_p3 = pnand %p10868_p2, %p10862_p13 }
  0x44   :  { %10872 = shalt.err (!%p10869_p3)
}
  0x45   :  { %47 = dma.hbm_to_vmem [thread:$0]  %s11199_s2, 96, %s45_s7, [#allocation6]  }
  0x46   :  { %s10873_s20 = scalar_lea.hbm %s11201_s4, 96 }
  0x47   :  { %p10874_p4 = scmp.ne.s32.totalorder %s11201_s4, %s10873_s20  ;;  %p10877_p5 = scmp.lt.u32.totalorder %s10873_s20, %s11201_s4 }
  0x49   :  { %p10879_p6 = pnand %p10877_p5, %p10874_p4 }
  0x4b   :  { %10882 = shalt.err (!%p10879_p6)
}
  0x4c   :  { %s10883_s25 = scalar_lea.vmem %s67_s9, 96  ;;  %p10888_p8 = scmp.lt.s32.totalorder %s67_s9, %s67_s9 }
  0x4d   :  { %p10884_p7 = scmp.ne.s32.totalorder %s67_s9, %s10883_s25  ;;  %p10889_p9 = scmp.lt.s32.totalorder %s10883_s25, %s10883_s25 }
  0x4f   :  { %p10890_p10 = por %p10889_p9, %p10888_p8 }
  0x51   :  { %p10891_p11 = pnand %p10890_p10, %p10884_p7 }
  0x53   :  { %10894 = shalt.err (!%p10891_p11)
}
  0x54   :  { %69 = dma.hbm_to_vmem [thread:$0]  %s11201_s4, 96, %s67_s9, [#allocation9]  }
  0x55   :  { %10917 = dma.done.wait [#allocation3], 4096  }
  0x56   :  { %10918 = vsyncadd [#allocation3], 4294963200 }
  0x57   :  { %10919 = dma.done.wait [#allocation6], 98400  }
  0x58   :  { %10920 = vsyncadd [#allocation6], 4294868896 }
  0x59   :  { %10921 = dma.done.wait [#allocation9], 36960  }
  0x5a   :  { %10922 = vsyncadd [#allocation9], 4294930336  ;;  %v9201_v0 = vld [vmem:[#allocation5 + $0x4] ss:$24 sps:$4 sm:$0xff]   ;;  %v9205_v2 = vld [vmem:[#allocation5] ss:$24 sps:$4 sm:$0xff]  }
  0x5b   :  { %v9203_v1 = vld [vmem:[#allocation5 + $0xc] ss:$24 sps:$4 sm:$0xff]   ;;  %4773 = vmatprep.subr.bf16.mxu0 %v9201_v0  ;;  %v9206_v3 = vld [vmem:[#allocation5 + $0x8] ss:$24 sps:$4 sm:$0xff]   ;;  %v9209_v5 = vld [vmem:[#allocation5 + $0x3c] ss:$24 sps:$4 sm:$0xff]  }
  0x5c   :  { %5117 = vmatprep.subr.bf16.mxu1 %v9203_v1  ;;  %v9207_v4 = vld [vmem:[#allocation5 + $0x34] ss:$24 sps:$4 sm:$0xff]   ;;  %4774 = vmatpush1.bf16.msra.mxu0 %v9205_v2  ;;  %v9211_v6 = vld [vmem:[#allocation5 + $0x30] ss:$24 sps:$4 sm:$0xff]   ;;  %v9213_v8 = vld [vmem:[#allocation5 + $0x64] ss:$24 sps:$4 sm:$0xff]  }
  0x5d   :  { %5118 = vmatpush1.bf16.msra.mxu1 %v9206_v3  ;;  %4775 = vmatprep.subr.bf16.mxu0 %v9207_v4  ;;  %v9212_v7 = vld [vmem:[#allocation5 + $0x38] ss:$24 sps:$4 sm:$0xff]   ;;  %v9215_v9 = vld [vmem:[#allocation5 + $0x6c] ss:$24 sps:$4 sm:$0xff]   ;;  %v9218_v11 = vld [vmem:[#allocation5 + $0x68] ss:$24 sps:$4 sm:$0xff]  }
  0x5e   :  { %5119 = vmatprep.subr.bf16.mxu1 %v9209_v5  ;;  %v9217_v10 = vld [vmem:[#allocation5 + $0x60] ss:$24 sps:$4 sm:$0xff]   ;;  %v9219_v12 = vld [vmem:[#allocation5 + $0x94] ss:$24 sps:$4 sm:$0xff]   ;;  %v9223_v14 = vld [vmem:[#allocation5 + $0x90] ss:$24 sps:$4 sm:$0xff]  }
  0x5f   :  { %v9221_v13 = vld [vmem:[#allocation5 + $0x9c] ss:$24 sps:$4 sm:$0xff]   ;;  %v9224_v15 = vld [vmem:[#allocation5 + $0x98] ss:$24 sps:$4 sm:$0xff]   ;;  %v9227_v17 = vld [vmem:[#allocation5 + $0xcc] ss:$24 sps:$4 sm:$0xff]  }
  0x60   :  { %4776 = vmatpush1.bf16.msra.mxu0 %v9211_v6  ;;  %v9225_v16 = vld [vmem:[#allocation5 + $0xc4] ss:$24 sps:$4 sm:$0xff]   ;;  %v9229_v18 = vld [vmem:[#allocation5 + $0xc0] ss:$24 sps:$4 sm:$0xff]   ;;  %v9231_v20 = vld [vmem:[#allocation5 + $0xf4] ss:$24 sps:$4 sm:$0xff]  }
  0x61   :  { %5120 = vmatpush1.bf16.msra.mxu1 %v9212_v7  ;;  %4777 = vmatprep.subr.bf16.mxu0 %v9213_v8  ;;  %v9230_v19 = vld [vmem:[#allocation5 + $0xc8] ss:$24 sps:$4 sm:$0xff]   ;;  %v9233_v21 = vld [vmem:[#allocation5 + $0xfc] ss:$24 sps:$4 sm:$0xff]   ;;  %v9236_v23 = vld [vmem:[#allocation5 + $0xf8] ss:$24 sps:$4 sm:$0xff]  }
  0x62   :  { %5121 = vmatprep.subr.bf16.mxu1 %v9215_v9  ;;  %v9235_v22 = vld [vmem:[#allocation5 + $0xf0] ss:$24 sps:$4 sm:$0xff]   ;;  %v9237_v24 = vld [vmem:[#allocation5 + $0x124] ss:$24 sps:$4 sm:$0xff]   ;;  %v9241_v26 = vld [vmem:[#allocation5 + $0x120] ss:$24 sps:$4 sm:$0xff]  }
  0x63   :  { %v9239_v25 = vld [vmem:[#allocation5 + $0x12c] ss:$24 sps:$4 sm:$0xff]   ;;  %v9242_v27 = vld [vmem:[#allocation5 + $0x128] ss:$24 sps:$4 sm:$0xff]   ;;  %v9245_v29 = vld [vmem:[#allocation5 + $0x15c] ss:$24 sps:$4 sm:$0xff]  }
  0x64   :  { %4778 = vmatpush1.bf16.msra.mxu0 %v9217_v10  ;;  %v9243_v28 = vld [vmem:[#allocation5 + $0x154] ss:$24 sps:$4 sm:$0xff]   ;;  %v9247_v30 = vld [vmem:[#allocation5 + $0x150] ss:$24 sps:$4 sm:$0xff]   ;;  %v9249_v32 = vld [vmem:[#allocation5 + $0x184] ss:$24 sps:$4 sm:$0xff]  }
  0x65   :  { %5122 = vmatpush1.bf16.msra.mxu1 %v9218_v11  ;;  %4779 = vmatprep.subr.bf16.mxu0 %v9219_v12  ;;  %v9248_v31 = vld [vmem:[#allocation5 + $0x158] ss:$24 sps:$4 sm:$0xff]   ;;  %v9251_v33 = vld [vmem:[#allocation5 + $0x18c] ss:$24 sps:$4 sm:$0xff]   ;;  %v9254_v35 = vld [vmem:[#allocation5 + $0x188] ss:$24 sps:$4 sm:$0xff]  }
  0x66   :  { %5123 = vmatprep.subr.bf16.mxu1 %v9221_v13  ;;  %v9253_v34 = vld [vmem:[#allocation5 + $0x180] ss:$24 sps:$4 sm:$0xff]   ;;  %v9255_v36 = vld [vmem:[#allocation5 + $0x1b4] ss:$24 sps:$4 sm:$0xff]   ;;  %v9259_v38 = vld [vmem:[#allocation5 + $0x1b0] ss:$24 sps:$4 sm:$0xff]  }
  0x67   :  { %v9257_v37 = vld [vmem:[#allocation5 + $0x1bc] ss:$24 sps:$4 sm:$0xff]   ;;  %v9260_v39 = vld [vmem:[#allocation5 + $0x1b8] ss:$24 sps:$4 sm:$0xff]   ;;  %v9263_v41 = vld [vmem:[#allocation5 + $0x1ec] ss:$24 sps:$4 sm:$0xff]  }
  0x68   :  { %4780 = vmatpush1.bf16.msra.mxu0 %v9223_v14  ;;  %v9261_v40 = vld [vmem:[#allocation5 + $0x1e4] ss:$24 sps:$4 sm:$0xff]   ;;  %v9265_v42 = vld [vmem:[#allocation5 + $0x1e0] ss:$24 sps:$4 sm:$0xff]   ;;  %v9267_v44 = vld [vmem:[#allocation5 + $0x214] ss:$24 sps:$4 sm:$0xff]  }
  0x69   :  { %5124 = vmatpush1.bf16.msra.mxu1 %v9224_v15  ;;  %4781 = vmatprep.subr.bf16.mxu0 %v9225_v16  ;;  %v9266_v43 = vld [vmem:[#allocation5 + $0x1e8] ss:$24 sps:$4 sm:$0xff]   ;;  %v9269_v45 = vld [vmem:[#allocation5 + $0x21c] ss:$24 sps:$4 sm:$0xff]   ;;  %v9272_v49 = vld [vmem:[#allocation5 + $0x218] ss:$24 sps:$4 sm:$0xff]  }
  0x6a   :  { %5125 = vmatprep.subr.bf16.mxu1 %v9227_v17  ;;  %v86_v46 = vld [vmem:[#allocation2 + $0x8] sm:$0xff]  ;;  %v9273_v51 = vld [vmem:[#allocation5 + $0x244] ss:$24 sps:$4 sm:$0xff]   ;;  %v9277_v53 = vld [vmem:[#allocation5 + $0x240] ss:$24 sps:$4 sm:$0xff]   ;;  %s10934_s4 = smov [#allocation11]  }
  0x6b   :  { %v102_v47 = vld [vmem:[#allocation2 + $0x88] sm:$0xff]  ;;  %v9281_v56 = vld [vmem:[#allocation5 + $0x27c] ss:$24 sps:$4 sm:$0xff]   ;;  %v9284_v58 = vld [vmem:[#allocation5 + $0x278] ss:$24 sps:$4 sm:$0xff]   ;;  %s7987_s27 = sshll.u32 %s10934_s4, 4  ;;  %s7988_s27 = int_to_ptr.vmem [resolvable:$true] %s7987_s27 }
  0x6c   :  { %4782 = vmatpush1.bf16.msra.mxu0 %v9229_v18  ;;  %v9271_v48 = vld [vmem:[#allocation5 + $0x210] ss:$24 sps:$4 sm:$0xff]   ;;  %v11027_v50 = vpack.c.bf16 %v102_v47, %v86_v46  ;;  %v9275_v52 = vld [vmem:[#allocation5 + $0x24c] ss:$24 sps:$4 sm:$0xff]   ;;  %v9289_v61 = vld [vmem:[#allocation5 + $0x2a0] ss:$24 sps:$4 sm:$0xff]   ;;  %p10900_p13 = scmp.lt.s32.totalorder %s7988_s27, %s7988_s27 }
  0x6d   :  { %5126 = vmatpush1.bf16.msra.mxu1 %v9230_v19  ;;  %4783 = vmatprep.subr.bf16.mxu0 %v9231_v20  ;;  %v9278_v54 = vld [vmem:[#allocation5 + $0x248] ss:$24 sps:$4 sm:$0xff]   ;;  %v9279_v55 = vld [vmem:[#allocation5 + $0x274] ss:$24 sps:$4 sm:$0xff]   ;;  %v9285_v59 = vld [vmem:[#allocation5 + $0x2a4] ss:$24 sps:$4 sm:$0xff]  }
  0x6e   :  { %5127 = vmatprep.subr.bf16.mxu1 %v9233_v21  ;;  %4805 = vmatprep.mubr.bf16.mxu0 %v11027_v50  ;;  %v9283_v57 = vld [vmem:[#allocation5 + $0x270] ss:$24 sps:$4 sm:$0xff]   ;;  %v9287_v60 = vld [vmem:[#allocation5 + $0x2ac] ss:$24 sps:$4 sm:$0xff]   ;;  %v9293_v0 = vld [vmem:[#allocation5 + $0x2dc] ss:$24 sps:$4 sm:$0xff]  }
  0x6f   :  { %5149 = vmatprep.mubr.bf16.mxu1 %v11027_v50  ;;  %v9290_v62 = vld [vmem:[#allocation5 + $0x2a8] ss:$24 sps:$4 sm:$0xff]   ;;  %v9291_v63 = vld [vmem:[#allocation5 + $0x2d4] ss:$24 sps:$4 sm:$0xff]   ;;  %v9296_v2 = vld [vmem:[#allocation5 + $0x2d8] ss:$24 sps:$4 sm:$0xff]  }
  0x70   :  { %4784 = vmatpush1.bf16.msra.mxu0 %v9235_v22  ;;  %v9295_v1 = vld [vmem:[#allocation5 + $0x2d0] ss:$24 sps:$4 sm:$0xff]   ;;  %v9299_v3 = vld [vmem:[#allocation5 + $0x304] ss:$24 sps:$4 sm:$0xff]   ;;  %v9297_v7 = vld [vmem:[#allocation5 + $0x300] ss:$24 sps:$4 sm:$0xff]  }
  0x71   :  { %5128 = vmatpush1.bf16.msra.mxu1 %v9236_v23  ;;  %4785 = vmatprep.subr.bf16.mxu0 %v9237_v24  ;;  %v85_v4 = vld [vmem:[#allocation2] sm:$0xff]  ;;  %v9305_v10 = vld [vmem:[#allocation5 + $0x334] ss:$24 sps:$4 sm:$0xff]   ;;  %v9303_v12 = vld [vmem:[#allocation5 + $0x330] ss:$24 sps:$4 sm:$0xff]   ;;  %s10895_s3 = scalar_lea.vmem %s7988_s27, 1536 }
  0x72   :  { %5129 = vmatprep.subr.bf16.mxu1 %v9239_v25  ;;  %v101_v5 = vld [vmem:[#allocation2 + $0x80] sm:$0xff]  ;;  %v9308_v11 = vld [vmem:[#allocation5 + $0x33c] ss:$24 sps:$4 sm:$0xff]   ;;  %v9306_v13 = vld [vmem:[#allocation5 + $0x338] ss:$24 sps:$4 sm:$0xff]   ;;  %p10896_p12 = scmp.ne.s32.totalorder %s7988_s27, %s10895_s3  ;;  %p10901_p0 = scmp.lt.s32.totalorder %s10895_s3, %s10895_s3 }
  0x73   :  { %v9302_v6 = vld [vmem:[#allocation5 + $0x30c] ss:$24 sps:$4 sm:$0xff]   ;;  %v9300_v8 = vld [vmem:[#allocation5 + $0x308] ss:$24 sps:$4 sm:$0xff]   ;;  %v11031_v9 = vpack.c.bf16 %v101_v5, %v85_v4  ;;  %v9320_v19 = vld [vmem:[#allocation5 + $0x39c] ss:$24 sps:$4 sm:$0xff]  }
  0x74   :  { %4786 = vmatpush1.bf16.msra.mxu0 %v9241_v26  ;;  %v9311_v14 = vld [vmem:[#allocation5 + $0x364] ss:$24 sps:$4 sm:$0xff]   ;;  %v9309_v16 = vld [vmem:[#allocation5 + $0x360] ss:$24 sps:$4 sm:$0xff]   ;;  %v9317_v18 = vld [vmem:[#allocation5 + $0x394] ss:$24 sps:$4 sm:$0xff]   ;;  %p10902_p1 = por %p10901_p0, %p10900_p13 }
  0x75   :  { %5130 = vmatpush1.bf16.msra.mxu1 %v9242_v27  ;;  %4787 = vmatprep.subr.bf16.mxu0 %v9243_v28  ;;  %v9314_v15 = vld [vmem:[#allocation5 + $0x36c] ss:$24 sps:$4 sm:$0xff]   ;;  %v9312_v17 = vld [vmem:[#allocation5 + $0x368] ss:$24 sps:$4 sm:$0xff]   ;;  %v9318_v21 = vld [vmem:[#allocation5 + $0x398] ss:$24 sps:$4 sm:$0xff]  }
  0x76   :  { %5131 = vmatprep.subr.bf16.mxu1 %v9245_v29  ;;  %v9315_v20 = vld [vmem:[#allocation5 + $0x390] ss:$24 sps:$4 sm:$0xff]   ;;  %v9323_v22 = vld [vmem:[#allocation5 + $0x3c4] ss:$24 sps:$4 sm:$0xff]   ;;  %v9321_v24 = vld [vmem:[#allocation5 + $0x3c0] ss:$24 sps:$4 sm:$0xff]   ;;  %p10903_p2 = pnand %p10902_p1, %p10896_p12 }
  0x77   :  { %v9326_v23 = vld [vmem:[#allocation5 + $0x3cc] ss:$24 sps:$4 sm:$0xff]   ;;  %v9324_v25 = vld [vmem:[#allocation5 + $0x3c8] ss:$24 sps:$4 sm:$0xff]   ;;  %v9332_v27 = vld [vmem:[#allocation5 + $0x3fc] ss:$24 sps:$4 sm:$0xff]  }
  0x78   :  { %4788 = vmatpush1.bf16.msra.mxu0 %v9247_v30  ;;  %v9329_v26 = vld [vmem:[#allocation5 + $0x3f4] ss:$24 sps:$4 sm:$0xff]   ;;  %v9327_v28 = vld [vmem:[#allocation5 + $0x3f0] ss:$24 sps:$4 sm:$0xff]   ;;  %v9335_v30 = vld [vmem:[#allocation5 + $0x424] ss:$24 sps:$4 sm:$0xff]  }
  0x79   :  { %5132 = vmatpush1.bf16.msra.mxu1 %v9248_v31  ;;  %4789 = vmatprep.subr.bf16.mxu0 %v9249_v32  ;;  %v9330_v29 = vld [vmem:[#allocation5 + $0x3f8] ss:$24 sps:$4 sm:$0xff]   ;;  %v9338_v31 = vld [vmem:[#allocation5 + $0x42c] ss:$24 sps:$4 sm:$0xff]   ;;  %v9356_v46 = vld [vmem:[#allocation5 + $0x4bc] ss:$24 sps:$4 sm:$0xff]  }
  0x7a   :  { %5133 = vmatprep.subr.bf16.mxu1 %v9251_v33  ;;  %v88_v32 = vld [vmem:[#allocation2 + $0x18] sm:$0xff]  ;;  %v9351_v47 = vld [vmem:[#allocation5 + $0x4b0] ss:$24 sps:$4 sm:$0xff]  }
  0x7b   :  { %v104_v33 = vld [vmem:[#allocation2 + $0x98] sm:$0xff]  ;;  %v9384_v5 = vld [vmem:[#allocation5 + $0x5a8] ss:$24 sps:$4 sm:$0xff]  }
  0x7c   :  { %4790 = vmatpush1.bf16.msra.mxu0 %v9253_v34  ;;  %v9333_v34 = vld [vmem:[#allocation5 + $0x420] ss:$24 sps:$4 sm:$0xff]  }
  0x7d   :  { %5134 = vmatpush1.bf16.msra.mxu1 %v9254_v35  ;;  %4791 = vmatprep.subr.bf16.mxu0 %v9255_v36  ;;  %v9336_v35 = vld [vmem:[#allocation5 + $0x428] ss:$24 sps:$4 sm:$0xff]   ;;  %v11035_v36 = vpack.c.bf16 %v104_v33, %v88_v32  ;;  %v9414_v32 = vld [vmem:[#allocation5 + $0x698] ss:$24 sps:$4 sm:$0xff]   ;;  %v9419_v33 = vld [vmem:[#allocation5 + $0x6c4] ss:$24 sps:$4 sm:$0xff]  }
  0x7e   :  { %5135 = vmatprep.subr.bf16.mxu1 %v9257_v37  ;;  %v9341_v37 = vld [vmem:[#allocation5 + $0x454] ss:$24 sps:$4 sm:$0xff]   ;;  %v9381_v4 = vld [vmem:[#allocation5 + $0x5a0] ss:$24 sps:$4 sm:$0xff]  }
  0x80   :  { %4792 = vmatpush1.bf16.msra.mxu0 %v9259_v38  ;;  %v9344_v38 = vld [vmem:[#allocation5 + $0x45c] ss:$24 sps:$4 sm:$0xff]  }
  0x81   :  { %5136 = vmatpush1.bf16.msra.mxu1 %v9260_v39  ;;  %4793 = vmatprep.subr.bf16.mxu0 %v9261_v40  ;;  %v9339_v39 = vld [vmem:[#allocation5 + $0x450] ss:$24 sps:$4 sm:$0xff]  }
  0x82   :  { %5137 = vmatprep.subr.bf16.mxu1 %v9263_v41  ;;  %v9342_v40 = vld [vmem:[#allocation5 + $0x458] ss:$24 sps:$4 sm:$0xff]   ;;  %v9347_v41 = vld [vmem:[#allocation5 + $0x484] ss:$24 sps:$4 sm:$0xff]  }
  0x84   :  { %4794 = vmatpush1.bf16.msra.mxu0 %v9265_v42  ;;  %v9350_v42 = vld [vmem:[#allocation5 + $0x48c] ss:$24 sps:$4 sm:$0xff]  }
  0x85   :  { %5138 = vmatpush1.bf16.msra.mxu1 %v9266_v43  ;;  %4795 = vmatprep.subr.bf16.mxu0 %v9267_v44  ;;  %v9345_v43 = vld [vmem:[#allocation5 + $0x480] ss:$24 sps:$4 sm:$0xff]  }
  0x86   :  { %5139 = vmatprep.subr.bf16.mxu1 %v9269_v45  ;;  %v9348_v44 = vld [vmem:[#allocation5 + $0x488] ss:$24 sps:$4 sm:$0xff]   ;;  %v9353_v45 = vld [vmem:[#allocation5 + $0x4b4] ss:$24 sps:$4 sm:$0xff]  }
  0x88   :  { %4796 = vmatpush1.bf16.msra.mxu0 %v9271_v48  ;;  %v9354_v48 = vld [vmem:[#allocation5 + $0x4b8] ss:$24 sps:$4 sm:$0xff]  }
  0x89   :  { %5140 = vmatpush1.bf16.msra.mxu1 %v9272_v49  ;;  %4797 = vmatprep.subr.bf16.mxu0 %v9273_v51  ;;  %v9359_v49 = vld [vmem:[#allocation5 + $0x4e4] ss:$24 sps:$4 sm:$0xff]  }
  0x8a   :  { %5141 = vmatprep.subr.bf16.mxu1 %v9275_v52  ;;  %v9362_v51 = vld [vmem:[#allocation5 + $0x4ec] ss:$24 sps:$4 sm:$0xff]   ;;  %v9357_v52 = vld [vmem:[#allocation5 + $0x4e0] ss:$24 sps:$4 sm:$0xff]  }
  0x8c   :  { %4798 = vmatpush1.bf16.msra.mxu0 %v9277_v53  ;;  %v9360_v53 = vld [vmem:[#allocation5 + $0x4e8] ss:$24 sps:$4 sm:$0xff]  }
  0x8d   :  { %5142 = vmatpush1.bf16.msra.mxu1 %v9278_v54  ;;  %4799 = vmatprep.subr.bf16.mxu0 %v9279_v55  ;;  %v9365_v54 = vld [vmem:[#allocation5 + $0x514] ss:$24 sps:$4 sm:$0xff]  }
  0x8e   :  { %5143 = vmatprep.subr.bf16.mxu1 %v9281_v56  ;;  %v9368_v55 = vld [vmem:[#allocation5 + $0x51c] ss:$24 sps:$4 sm:$0xff]   ;;  %v9363_v56 = vld [vmem:[#allocation5 + $0x510] ss:$24 sps:$4 sm:$0xff]  }
  0x90   :  { %4800 = vmatpush1.bf16.msra.mxu0 %v9283_v57  ;;  %v9366_v57 = vld [vmem:[#allocation5 + $0x518] ss:$24 sps:$4 sm:$0xff]  }
  0x91   :  { %5144 = vmatpush1.bf16.msra.mxu1 %v9284_v58  ;;  %4801 = vmatprep.subr.bf16.mxu0 %v9285_v59  ;;  %v9371_v58 = vld [vmem:[#allocation5 + $0x544] ss:$24 sps:$4 sm:$0xff]  }
  0x92   :  { %5145 = vmatprep.subr.bf16.mxu1 %v9287_v60  ;;  %v9374_v59 = vld [vmem:[#allocation5 + $0x54c] ss:$24 sps:$4 sm:$0xff]   ;;  %v9369_v60 = vld [vmem:[#allocation5 + $0x540] ss:$24 sps:$4 sm:$0xff]  }
  0x94   :  { %4802 = vmatpush1.bf16.msra.mxu0 %v9289_v61  ;;  %v9372_v61 = vld [vmem:[#allocation5 + $0x548] ss:$24 sps:$4 sm:$0xff]  }
  0x95   :  { %5146 = vmatpush1.bf16.msra.mxu1 %v9290_v62  ;;  %4803 = vmatprep.subr.bf16.mxu0 %v9291_v63  ;;  %v9377_v62 = vld [vmem:[#allocation5 + $0x574] ss:$24 sps:$4 sm:$0xff]  }
  0x96   :  { %5147 = vmatprep.subr.bf16.mxu1 %v9293_v0  ;;  %v9380_v63 = vld [vmem:[#allocation5 + $0x57c] ss:$24 sps:$4 sm:$0xff]   ;;  %v9375_v0 = vld [vmem:[#allocation5 + $0x570] ss:$24 sps:$4 sm:$0xff]  }
  0x98   :  { %4804 = vmatpush1.bf16.msra.mxu0 %v9295_v1  ;;  %v9378_v1 = vld [vmem:[#allocation5 + $0x578] ss:$24 sps:$4 sm:$0xff]  }
  0x99   :  { %5148 = vmatpush1.bf16.msra.mxu1 %v9296_v2  ;;  %4816 = vmatprep.subr.bf16.mxu0 %v9299_v3  ;;  %v9383_v2 = vld [vmem:[#allocation5 + $0x5a4] ss:$24 sps:$4 sm:$0xff]  }
  0x9a   :  { %5160 = vmatprep.subr.bf16.mxu1 %v9302_v6  ;;  %v9386_v3 = vld [vmem:[#allocation5 + $0x5ac] ss:$24 sps:$4 sm:$0xff]  }
  0x9b   :  { %4806 = vmatmul.mubr.bf16.vlgmr.msra.gmra.mrb[0].mxu0 %v11031_v9  ;;  %v9389_v6 = vld [vmem:[#allocation5 + $0x5d4] ss:$24 sps:$4 sm:$0xff]  }
  0x9c   :  { %5150 = vmatmul.mubr.bf16.vlgmr.msra.gmra.mrb[0].mxu1 %v11031_v9  ;;  %4817 = vmatpush1.bf16.msra.mxu0 %v9297_v7  ;;  %v9392_v7 = vld [vmem:[#allocation5 + $0x5dc] ss:$24 sps:$4 sm:$0xff]  }
  0x9d   :  { %5161 = vmatpush1.bf16.msra.mxu1 %v9300_v8  ;;  %4818 = vmatprep.subr.bf16.mxu0 %v9305_v10  ;;  %v9387_v8 = vld [vmem:[#allocation5 + $0x5d0] ss:$24 sps:$4 sm:$0xff]  }
  0x9e   :  { %5162 = vmatprep.subr.bf16.mxu1 %v9308_v11  ;;  %4848 = vmatprep.mubr.bf16.mxu0 %v11035_v36  ;;  %v9390_v10 = vld [vmem:[#allocation5 + $0x5d8] ss:$24 sps:$4 sm:$0xff]   ;;  %v9395_v11 = vld [vmem:[#allocation5 + $0x604] ss:$24 sps:$4 sm:$0xff]  }
  0x9f   :  { %5192 = vmatprep.mubr.bf16.mxu1 %v11035_v36 }
  0xa0   :  { %4819 = vmatpush1.bf16.msra.mxu0 %v9303_v12  ;;  %v87_v12 = vld [vmem:[#allocation2 + $0x10] sm:$0xff] }
  0xa1   :  { %5163 = vmatpush1.bf16.msra.mxu1 %v9306_v13  ;;  %4820 = vmatprep.subr.bf16.mxu0 %v9311_v14  ;;  %v103_v13 = vld [vmem:[#allocation2 + $0x90] sm:$0xff]  ;;  %v9398_v14 = vld [vmem:[#allocation5 + $0x60c] ss:$24 sps:$4 sm:$0xff]  }
  0xa2   :  { %5164 = vmatprep.subr.bf16.mxu1 %v9314_v15  ;;  %v9393_v15 = vld [vmem:[#allocation5 + $0x600] ss:$24 sps:$4 sm:$0xff]  }
  0xa4   :  { %4821 = vmatpush1.bf16.msra.mxu0 %v9309_v16  ;;  %v9396_v16 = vld [vmem:[#allocation5 + $0x608] ss:$24 sps:$4 sm:$0xff]  }
  0xa5   :  { %5165 = vmatpush1.bf16.msra.mxu1 %v9312_v17  ;;  %4822 = vmatprep.subr.bf16.mxu0 %v9317_v18  ;;  %v11039_v17 = vpack.c.bf16 %v103_v13, %v87_v12  ;;  %v9401_v18 = vld [vmem:[#allocation5 + $0x634] ss:$24 sps:$4 sm:$0xff]   ;;  %v9479_v12 = vld [vmem:[#allocation5 + $0x8a4] ss:$24 sps:$4 sm:$0xff]  }
  0xa6   :  { %5166 = vmatprep.subr.bf16.mxu1 %v9320_v19  ;;  %v9404_v19 = vld [vmem:[#allocation5 + $0x63c] ss:$24 sps:$4 sm:$0xff]   ;;  %v9482_v13 = vld [vmem:[#allocation5 + $0x8ac] ss:$24 sps:$4 sm:$0xff]  }
  0xa8   :  { %4823 = vmatpush1.bf16.msra.mxu0 %v9315_v20  ;;  %v90_v20 = vld [vmem:[#allocation2 + $0x28] sm:$0xff] }
  0xa9   :  { %5167 = vmatpush1.bf16.msra.mxu1 %v9318_v21  ;;  %4824 = vmatprep.subr.bf16.mxu0 %v9323_v22  ;;  %v106_v21 = vld [vmem:[#allocation2 + $0xa8] sm:$0xff] }
  0xaa   :  { %5168 = vmatprep.subr.bf16.mxu1 %v9326_v23  ;;  %v9399_v22 = vld [vmem:[#allocation5 + $0x630] ss:$24 sps:$4 sm:$0xff]  }
  0xab   :  { %v9402_v23 = vld [vmem:[#allocation5 + $0x638] ss:$24 sps:$4 sm:$0xff]  }
  0xac   :  { %4825 = vmatpush1.bf16.msra.mxu0 %v9321_v24  ;;  %v11043_v24 = vpack.c.bf16 %v106_v21, %v90_v20  ;;  %v9486_v20 = vld [vmem:[#allocation5 + $0x8d8] ss:$24 sps:$4 sm:$0xff]   ;;  %v9491_v21 = vld [vmem:[#allocation5 + $0x904] ss:$24 sps:$4 sm:$0xff]  }
  0xad   :  { %5169 = vmatpush1.bf16.msra.mxu1 %v9324_v25  ;;  %4826 = vmatprep.subr.bf16.mxu0 %v9329_v26  ;;  %v9407_v25 = vld [vmem:[#allocation5 + $0x664] ss:$24 sps:$4 sm:$0xff]  }
  0xae   :  { %5170 = vmatprep.subr.bf16.mxu1 %v9332_v27  ;;  %v9410_v26 = vld [vmem:[#allocation5 + $0x66c] ss:$24 sps:$4 sm:$0xff]   ;;  %v9405_v27 = vld [vmem:[#allocation5 + $0x660] ss:$24 sps:$4 sm:$0xff]  }
  0xb0   :  { %4827 = vmatpush1.bf16.msra.mxu0 %v9327_v28  ;;  %v9408_v28 = vld [vmem:[#allocation5 + $0x668] ss:$24 sps:$4 sm:$0xff]  }
  0xb1   :  { %5171 = vmatpush1.bf16.msra.mxu1 %v9330_v29  ;;  %4828 = vmatprep.subr.bf16.mxu0 %v9335_v30  ;;  %v9413_v29 = vld [vmem:[#allocation5 + $0x694] ss:$24 sps:$4 sm:$0xff]  }
  0xb2   :  { %5172 = vmatprep.subr.bf16.mxu1 %v9338_v31  ;;  %v9416_v30 = vld [vmem:[#allocation5 + $0x69c] ss:$24 sps:$4 sm:$0xff]   ;;  %v9411_v31 = vld [vmem:[#allocation5 + $0x690] ss:$24 sps:$4 sm:$0xff]  }
  0xb4   :  { %4829 = vmatpush1.bf16.msra.mxu0 %v9333_v34  ;;  %v9422_v34 = vld [vmem:[#allocation5 + $0x6cc] ss:$24 sps:$4 sm:$0xff]  }
  0xb5   :  { %5173 = vmatpush1.bf16.msra.mxu1 %v9336_v35  ;;  %4830 = vmatprep.subr.bf16.mxu0 %v9341_v37  ;;  %v9417_v35 = vld [vmem:[#allocation5 + $0x6c0] ss:$24 sps:$4 sm:$0xff]  }
  0xb6   :  { %5174 = vmatprep.subr.bf16.mxu1 %v9344_v38  ;;  %v9420_v37 = vld [vmem:[#allocation5 + $0x6c8] ss:$24 sps:$4 sm:$0xff]   ;;  %v9425_v38 = vld [vmem:[#allocation5 + $0x6f4] ss:$24 sps:$4 sm:$0xff]  }
  0xb8   :  { %4831 = vmatpush1.bf16.msra.mxu0 %v9339_v39  ;;  %v9428_v39 = vld [vmem:[#allocation5 + $0x6fc] ss:$24 sps:$4 sm:$0xff]  }
  0xb9   :  { %5175 = vmatpush1.bf16.msra.mxu1 %v9342_v40  ;;  %4832 = vmatprep.subr.bf16.mxu0 %v9347_v41  ;;  %v9423_v40 = vld [vmem:[#allocation5 + $0x6f0] ss:$24 sps:$4 sm:$0xff]  }
  0xba   :  { %5176 = vmatprep.subr.bf16.mxu1 %v9350_v42  ;;  %v9426_v41 = vld [vmem:[#allocation5 + $0x6f8] ss:$24 sps:$4 sm:$0xff]   ;;  %v9431_v42 = vld [vmem:[#allocation5 + $0x724] ss:$24 sps:$4 sm:$0xff]  }
  0xbc   :  { %4833 = vmatpush1.bf16.msra.mxu0 %v9345_v43  ;;  %v9434_v43 = vld [vmem:[#allocation5 + $0x72c] ss:$24 sps:$4 sm:$0xff]  }
  0xbd   :  { %5177 = vmatpush1.bf16.msra.mxu1 %v9348_v44  ;;  %4834 = vmatprep.subr.bf16.mxu0 %v9353_v45  ;;  %v9429_v44 = vld [vmem:[#allocation5 + $0x720] ss:$24 sps:$4 sm:$0xff]  }
  0xbe   :  { %5178 = vmatprep.subr.bf16.mxu1 %v9356_v46  ;;  %v9432_v45 = vld [vmem:[#allocation5 + $0x728] ss:$24 sps:$4 sm:$0xff]   ;;  %v9437_v46 = vld [vmem:[#allocation5 + $0x754] ss:$24 sps:$4 sm:$0xff]  }
  0xc0   :  { %4835 = vmatpush1.bf16.msra.mxu0 %v9351_v47  ;;  %v9440_v47 = vld [vmem:[#allocation5 + $0x75c] ss:$24 sps:$4 sm:$0xff]  }
  0xc1   :  { %5179 = vmatpush1.bf16.msra.mxu1 %v9354_v48  ;;  %4836 = vmatprep.subr.bf16.mxu0 %v9359_v49  ;;  %v9435_v48 = vld [vmem:[#allocation5 + $0x750] ss:$24 sps:$4 sm:$0xff]  }
  0xc2   :  { %5180 = vmatprep.subr.bf16.mxu1 %v9362_v51  ;;  %v9438_v49 = vld [vmem:[#allocation5 + $0x758] ss:$24 sps:$4 sm:$0xff]   ;;  %v9443_v51 = vld [vmem:[#allocation5 + $0x784] ss:$24 sps:$4 sm:$0xff]  }
  0xc4   :  { %4837 = vmatpush1.bf16.msra.mxu0 %v9357_v52  ;;  %v9446_v52 = vld [vmem:[#allocation5 + $0x78c] ss:$24 sps:$4 sm:$0xff]  }
  0xc5   :  { %5181 = vmatpush1.bf16.msra.mxu1 %v9360_v53  ;;  %4838 = vmatprep.subr.bf16.mxu0 %v9365_v54  ;;  %v9441_v53 = vld [vmem:[#allocation5 + $0x780] ss:$24 sps:$4 sm:$0xff]  }
  0xc6   :  { %5182 = vmatprep.subr.bf16.mxu1 %v9368_v55  ;;  %v9444_v54 = vld [vmem:[#allocation5 + $0x788] ss:$24 sps:$4 sm:$0xff]   ;;  %v9449_v55 = vld [vmem:[#allocation5 + $0x7b4] ss:$24 sps:$4 sm:$0xff]  }
  0xc8   :  { %4839 = vmatpush1.bf16.msra.mxu0 %v9363_v56  ;;  %v9452_v56 = vld [vmem:[#allocation5 + $0x7bc] ss:$24 sps:$4 sm:$0xff]  }
  0xc9   :  { %5183 = vmatpush1.bf16.msra.mxu1 %v9366_v57  ;;  %4840 = vmatprep.subr.bf16.mxu0 %v9371_v58  ;;  %v9447_v57 = vld [vmem:[#allocation5 + $0x7b0] ss:$24 sps:$4 sm:$0xff]  }
  0xca   :  { %5184 = vmatprep.subr.bf16.mxu1 %v9374_v59  ;;  %v9450_v58 = vld [vmem:[#allocation5 + $0x7b8] ss:$24 sps:$4 sm:$0xff]   ;;  %v9455_v59 = vld [vmem:[#allocation5 + $0x7e4] ss:$24 sps:$4 sm:$0xff]  }
  0xcc   :  { %4841 = vmatpush1.bf16.msra.mxu0 %v9369_v60  ;;  %v9458_v60 = vld [vmem:[#allocation5 + $0x7ec] ss:$24 sps:$4 sm:$0xff]  }
  0xcd   :  { %5185 = vmatpush1.bf16.msra.mxu1 %v9372_v61  ;;  %4842 = vmatprep.subr.bf16.mxu0 %v9377_v62  ;;  %v9453_v61 = vld [vmem:[#allocation5 + $0x7e0] ss:$24 sps:$4 sm:$0xff]  }
  0xce   :  { %5186 = vmatprep.subr.bf16.mxu1 %v9380_v63  ;;  %v9456_v62 = vld [vmem:[#allocation5 + $0x7e8] ss:$24 sps:$4 sm:$0xff]   ;;  %v9461_v63 = vld [vmem:[#allocation5 + $0x814] ss:$24 sps:$4 sm:$0xff]  }
  0xd0   :  { %4843 = vmatpush1.bf16.msra.mxu0 %v9375_v0  ;;  %v9464_v0 = vld [vmem:[#allocation5 + $0x81c] ss:$24 sps:$4 sm:$0xff]  }
  0xd1   :  { %5187 = vmatpush1.bf16.msra.mxu1 %v9378_v1  ;;  %4844 = vmatprep.subr.bf16.mxu0 %v9383_v2  ;;  %v9459_v1 = vld [vmem:[#allocation5 + $0x810] ss:$24 sps:$4 sm:$0xff]  }
  0xd2   :  { %5188 = vmatprep.subr.bf16.mxu1 %v9386_v3  ;;  %v9462_v2 = vld [vmem:[#allocation5 + $0x818] ss:$24 sps:$4 sm:$0xff]   ;;  %v9467_v3 = vld [vmem:[#allocation5 + $0x844] ss:$24 sps:$4 sm:$0xff]  }
  0xd4   :  { %4845 = vmatpush1.bf16.msra.mxu0 %v9381_v4  ;;  %v9470_v4 = vld [vmem:[#allocation5 + $0x84c] ss:$24 sps:$4 sm:$0xff]  }
  0xd5   :  { %5189 = vmatpush1.bf16.msra.mxu1 %v9384_v5  ;;  %4846 = vmatprep.subr.bf16.mxu0 %v9389_v6  ;;  %v9465_v5 = vld [vmem:[#allocation5 + $0x840] ss:$24 sps:$4 sm:$0xff]  }
  0xd6   :  { %5190 = vmatprep.subr.bf16.mxu1 %v9392_v7  ;;  %v9468_v6 = vld [vmem:[#allocation5 + $0x848] ss:$24 sps:$4 sm:$0xff]   ;;  %v9473_v7 = vld [vmem:[#allocation5 + $0x874] ss:$24 sps:$4 sm:$0xff]  }
  0xd8   :  { %4847 = vmatpush1.bf16.msra.mxu0 %v9387_v8  ;;  %v9476_v8 = vld [vmem:[#allocation5 + $0x87c] ss:$24 sps:$4 sm:$0xff]  }
  0xd9   :  { %5191 = vmatpush1.bf16.msra.mxu1 %v9390_v10  ;;  %4859 = vmatprep.subr.bf16.mxu0 %v9395_v11  ;;  %v9471_v10 = vld [vmem:[#allocation5 + $0x870] ss:$24 sps:$4 sm:$0xff]  }
  0xda   :  { %5203 = vmatprep.subr.bf16.mxu1 %v9398_v14  ;;  %v9474_v11 = vld [vmem:[#allocation5 + $0x878] ss:$24 sps:$4 sm:$0xff]  }
  0xdb   :  { %4849 = vmatmul.mubr.bf16.vlgmr.msra.gmra.mrb[0].mxu0 %v11039_v17  ;;  %v9477_v14 = vld [vmem:[#allocation5 + $0x8a0] ss:$24 sps:$4 sm:$0xff]  }
  0xdc   :  { %5193 = vmatmul.mubr.bf16.vlgmr.msra.gmra.mrb[0].mxu1 %v11039_v17  ;;  %4860 = vmatpush1.bf16.msra.mxu0 %v9393_v15  ;;  %v9480_v15 = vld [vmem:[#allocation5 + $0x8a8] ss:$24 sps:$4 sm:$0xff]  }
  0xdd   :  { %5204 = vmatpush1.bf16.msra.mxu1 %v9396_v16  ;;  %4861 = vmatprep.subr.bf16.mxu0 %v9401_v18  ;;  %v9485_v16 = vld [vmem:[#allocation5 + $0x8d4] ss:$24 sps:$4 sm:$0xff]  }
  0xde   :  { %5205 = vmatprep.subr.bf16.mxu1 %v9404_v19  ;;  %4891 = vmatprep.mubr.bf16.mxu0 %v11043_v24  ;;  %v9488_v18 = vld [vmem:[#allocation5 + $0x8dc] ss:$24 sps:$4 sm:$0xff]   ;;  %v9483_v19 = vld [vmem:[#allocation5 + $0x8d0] ss:$24 sps:$4 sm:$0xff]  }
  0xdf   :  { %5235 = vmatprep.mubr.bf16.mxu1 %v11043_v24 }
  0xe0   :  { %4862 = vmatpush1.bf16.msra.mxu0 %v9399_v22  ;;  %v89_v22 = vld [vmem:[#allocation2 + $0x20] sm:$0xff] }
  0xe1   :  { %5206 = vmatpush1.bf16.msra.mxu1 %v9402_v23  ;;  %4863 = vmatprep.subr.bf16.mxu0 %v9407_v25  ;;  %v105_v23 = vld [vmem:[#allocation2 + $0xa0] sm:$0xff] }
  0xe2   :  { %5207 = vmatprep.subr.bf16.mxu1 %v9410_v26  ;;  %v9494_v25 = vld [vmem:[#allocation5 + $0x90c] ss:$24 sps:$4 sm:$0xff]   ;;  %v9489_v26 = vld [vmem:[#allocation5 + $0x900] ss:$24 sps:$4 sm:$0xff]  }
  0xe4   :  { %4864 = vmatpush1.bf16.msra.mxu0 %v9405_v27  ;;  %v9492_v27 = vld [vmem:[#allocation5 + $0x908] ss:$24 sps:$4 sm:$0xff]  }
  0xe5   :  { %5208 = vmatpush1.bf16.msra.mxu1 %v9408_v28  ;;  %4865 = vmatprep.subr.bf16.mxu0 %v9413_v29  ;;  %v11047_v28 = vpack.c.bf16 %v105_v23, %v89_v22  ;;  %v92_v29 = vld [vmem:[#allocation2 + $0x38] sm:$0xff]  ;;  %v9567_v22 = vld [vmem:[#allocation5 + $0xb70] ss:$24 sps:$4 sm:$0xff]  }
  0xe6   :  { %5209 = vmatprep.subr.bf16.mxu1 %v9416_v30  ;;  %v108_v30 = vld [vmem:[#allocation2 + $0xb8] sm:$0xff] }
  0xe7   :  { %v9570_v23 = vld [vmem:[#allocation5 + $0xb78] ss:$24 sps:$4 sm:$0xff]  }
  0xe8   :  { %4866 = vmatpush1.bf16.msra.mxu0 %v9411_v31  ;;  %v9497_v31 = vld [vmem:[#allocation5 + $0x934] ss:$24 sps:$4 sm:$0xff]  }
  0xe9   :  { %5210 = vmatpush1.bf16.msra.mxu1 %v9414_v32  ;;  %4867 = vmatprep.subr.bf16.mxu0 %v9419_v33  ;;  %v9500_v32 = vld [vmem:[#allocation5 + $0x93c] ss:$24 sps:$4 sm:$0xff]   ;;  %v11049_v33 = vpack.c.bf16 %v108_v30, %v92_v29  ;;  %v9576_v29 = vld [vmem:[#allocation5 + $0xba8] ss:$24 sps:$4 sm:$0xff]  }
  0xea   :  { %5211 = vmatprep.subr.bf16.mxu1 %v9422_v34  ;;  %v9495_v34 = vld [vmem:[#allocation5 + $0x930] ss:$24 sps:$4 sm:$0xff]   ;;  %v9581_v30 = vld [vmem:[#allocation5 + $0xbd4] ss:$24 sps:$4 sm:$0xff]  }
  0xec   :  { %4868 = vmatpush1.bf16.msra.mxu0 %v9417_v35  ;;  %v9498_v35 = vld [vmem:[#allocation5 + $0x938] ss:$24 sps:$4 sm:$0xff]  }
  0xed   :  { %5212 = vmatpush1.bf16.msra.mxu1 %v9420_v37  ;;  %4869 = vmatprep.subr.bf16.mxu0 %v9425_v38  ;;  %v9503_v37 = vld [vmem:[#allocation5 + $0x964] ss:$24 sps:$4 sm:$0xff]  }
  0xee   :  { %5213 = vmatprep.subr.bf16.mxu1 %v9428_v39  ;;  %v9506_v38 = vld [vmem:[#allocation5 + $0x96c] ss:$24 sps:$4 sm:$0xff]   ;;  %v9501_v39 = vld [vmem:[#allocation5 + $0x960] ss:$24 sps:$4 sm:$0xff]  }
  0xf0   :  { %4870 = vmatpush1.bf16.msra.mxu0 %v9423_v40  ;;  %v9504_v40 = vld [vmem:[#allocation5 + $0x968] ss:$24 sps:$4 sm:$0xff]  }
  0xf1   :  { %5214 = vmatpush1.bf16.msra.mxu1 %v9426_v41  ;;  %4871 = vmatprep.subr.bf16.mxu0 %v9431_v42  ;;  %v9509_v41 = vld [vmem:[#allocation5 + $0x994] ss:$24 sps:$4 sm:$0xff]  }
  0xf2   :  { %5215 = vmatprep.subr.bf16.mxu1 %v9434_v43  ;;  %v9512_v42 = vld [vmem:[#allocation5 + $0x99c] ss:$24 sps:$4 sm:$0xff]   ;;  %v9507_v43 = vld [vmem:[#allocation5 + $0x990] ss:$24 sps:$4 sm:$0xff]  }
  0xf4   :  { %4872 = vmatpush1.bf16.msra.mxu0 %v9429_v44  ;;  %v9510_v44 = vld [vmem:[#allocation5 + $0x998] ss:$24 sps:$4 sm:$0xff]  }
  0xf5   :  { %5216 = vmatpush1.bf16.msra.mxu1 %v9432_v45  ;;  %4873 = vmatprep.subr.bf16.mxu0 %v9437_v46  ;;  %v9515_v45 = vld [vmem:[#allocation5 + $0x9c4] ss:$24 sps:$4 sm:$0xff]  }
  0xf6   :  { %5217 = vmatprep.subr.bf16.mxu1 %v9440_v47  ;;  %v9518_v46 = vld [vmem:[#allocation5 + $0x9cc] ss:$24 sps:$4 sm:$0xff]   ;;  %v9513_v47 = vld [vmem:[#allocation5 + $0x9c0] ss:$24 sps:$4 sm:$0xff]  }
  0xf8   :  { %4874 = vmatpush1.bf16.msra.mxu0 %v9435_v48  ;;  %v9516_v48 = vld [vmem:[#allocation5 + $0x9c8] ss:$24 sps:$4 sm:$0xff]  }
  0xf9   :  { %5218 = vmatpush1.bf16.msra.mxu1 %v9438_v49  ;;  %4875 = vmatprep.subr.bf16.mxu0 %v9443_v51  ;;  %v9521_v49 = vld [vmem:[#allocation5 + $0x9f4] ss:$24 sps:$4 sm:$0xff]  }
  0xfa   :  { %5219 = vmatprep.subr.bf16.mxu1 %v9446_v52  ;;  %v9524_v51 = vld [vmem:[#allocation5 + $0x9fc] ss:$24 sps:$4 sm:$0xff]   ;;  %v9519_v52 = vld [vmem:[#allocation5 + $0x9f0] ss:$24 sps:$4 sm:$0xff]  }
  0xfc   :  { %4876 = vmatpush1.bf16.msra.mxu0 %v9441_v53  ;;  %v9522_v53 = vld [vmem:[#allocation5 + $0x9f8] ss:$24 sps:$4 sm:$0xff]  }
  0xfd   :  { %5220 = vmatpush1.bf16.msra.mxu1 %v9444_v54  ;;  %4877 = vmatprep.subr.bf16.mxu0 %v9449_v55  ;;  %v9527_v54 = vld [vmem:[#allocation5 + $0xa24] ss:$24 sps:$4 sm:$0xff]  }
  0xfe   :  { %5221 = vmatprep.subr.bf16.mxu1 %v9452_v56  ;;  %v9530_v55 = vld [vmem:[#allocation5 + $0xa2c] ss:$24 sps:$4 sm:$0xff]   ;;  %v9525_v56 = vld [vmem:[#allocation5 + $0xa20] ss:$24 sps:$4 sm:$0xff]  }
 0x100   :  { %4878 = vmatpush1.bf16.msra.mxu0 %v9447_v57  ;;  %v9528_v57 = vld [vmem:[#allocation5 + $0xa28] ss:$24 sps:$4 sm:$0xff]  }
 0x101   :  { %5222 = vmatpush1.bf16.msra.mxu1 %v9450_v58  ;;  %4879 = vmatprep.subr.bf16.mxu0 %v9455_v59  ;;  %v9533_v58 = vld [vmem:[#allocation5 + $0xa54] ss:$24 sps:$4 sm:$0xff]  }
 0x102   :  { %5223 = vmatprep.subr.bf16.mxu1 %v9458_v60  ;;  %v9536_v59 = vld [vmem:[#allocation5 + $0xa5c] ss:$24 sps:$4 sm:$0xff]   ;;  %v9531_v60 = vld [vmem:[#allocation5 + $0xa50] ss:$24 sps:$4 sm:$0xff]  }
 0x104   :  { %4880 = vmatpush1.bf16.msra.mxu0 %v9453_v61  ;;  %v9534_v61 = vld [vmem:[#allocation5 + $0xa58] ss:$24 sps:$4 sm:$0xff]  }
 0x105   :  { %5224 = vmatpush1.bf16.msra.mxu1 %v9456_v62  ;;  %4881 = vmatprep.subr.bf16.mxu0 %v9461_v63  ;;  %v9539_v62 = vld [vmem:[#allocation5 + $0xa84] ss:$24 sps:$4 sm:$0xff]  }
 0x106   :  { %5225 = vmatprep.subr.bf16.mxu1 %v9464_v0  ;;  %v9542_v63 = vld [vmem:[#allocation5 + $0xa8c] ss:$24 sps:$4 sm:$0xff]   ;;  %v9537_v0 = vld [vmem:[#allocation5 + $0xa80] ss:$24 sps:$4 sm:$0xff]  }
 0x108   :  { %4882 = vmatpush1.bf16.msra.mxu0 %v9459_v1  ;;  %v9540_v1 = vld [vmem:[#allocation5 + $0xa88] ss:$24 sps:$4 sm:$0xff]  }
 0x109   :  { %5226 = vmatpush1.bf16.msra.mxu1 %v9462_v2  ;;  %4883 = vmatprep.subr.bf16.mxu0 %v9467_v3  ;;  %v9545_v2 = vld [vmem:[#allocation5 + $0xab4] ss:$24 sps:$4 sm:$0xff]  }
 0x10a   :  { %5227 = vmatprep.subr.bf16.mxu1 %v9470_v4  ;;  %v9548_v3 = vld [vmem:[#allocation5 + $0xabc] ss:$24 sps:$4 sm:$0xff]   ;;  %v9543_v4 = vld [vmem:[#allocation5 + $0xab0] ss:$24 sps:$4 sm:$0xff]  }
 0x10c   :  { %4884 = vmatpush1.bf16.msra.mxu0 %v9465_v5  ;;  %v9546_v5 = vld [vmem:[#allocation5 + $0xab8] ss:$24 sps:$4 sm:$0xff]  }
 0x10d   :  { %5228 = vmatpush1.bf16.msra.mxu1 %v9468_v6  ;;  %4885 = vmatprep.subr.bf16.mxu0 %v9473_v7  ;;  %v9551_v6 = vld [vmem:[#allocation5 + $0xae4] ss:$24 sps:$4 sm:$0xff]  }
 0x10e   :  { %5229 = vmatprep.subr.bf16.mxu1 %v9476_v8  ;;  %v9554_v7 = vld [vmem:[#allocation5 + $0xaec] ss:$24 sps:$4 sm:$0xff]   ;;  %v9549_v8 = vld [vmem:[#allocation5 + $0xae0] ss:$24 sps:$4 sm:$0xff]  }
 0x110   :  { %4886 = vmatpush1.bf16.msra.mxu0 %v9471_v10  ;;  %v9552_v10 = vld [vmem:[#allocation5 + $0xae8] ss:$24 sps:$4 sm:$0xff]  }
 0x111   :  { %5230 = vmatpush1.bf16.msra.mxu1 %v9474_v11  ;;  %4887 = vmatprep.subr.bf16.mxu0 %v9479_v12  ;;  %v9557_v11 = vld [vmem:[#allocation5 + $0xb14] ss:$24 sps:$4 sm:$0xff]  }
 0x112   :  { %5231 = vmatprep.subr.bf16.mxu1 %v9482_v13  ;;  %v9560_v12 = vld [vmem:[#allocation5 + $0xb1c] ss:$24 sps:$4 sm:$0xff]   ;;  %v9555_v13 = vld [vmem:[#allocation5 + $0xb10] ss:$24 sps:$4 sm:$0xff]  }
 0x114   :  { %4888 = vmatpush1.bf16.msra.mxu0 %v9477_v14  ;;  %v9558_v14 = vld [vmem:[#allocation5 + $0xb18] ss:$24 sps:$4 sm:$0xff]  }
 0x115   :  { %5232 = vmatpush1.bf16.msra.mxu1 %v9480_v15  ;;  %4889 = vmatprep.subr.bf16.mxu0 %v9485_v16  ;;  %v9563_v15 = vld [vmem:[#allocation5 + $0xb44] ss:$24 sps:$4 sm:$0xff]  }
 0x116   :  { %5233 = vmatprep.subr.bf16.mxu1 %v9488_v18  ;;  %v9566_v16 = vld [vmem:[#allocation5 + $0xb4c] ss:$24 sps:$4 sm:$0xff]   ;;  %v9561_v18 = vld [vmem:[#allocation5 + $0xb40] ss:$24 sps:$4 sm:$0xff]  }
 0x118   :  { %4890 = vmatpush1.bf16.msra.mxu0 %v9483_v19  ;;  %v9564_v19 = vld [vmem:[#allocation5 + $0xb48] ss:$24 sps:$4 sm:$0xff]  }
 0x119   :  { %5234 = vmatpush1.bf16.msra.mxu1 %v9486_v20  ;;  %4902 = vmatprep.subr.bf16.mxu0 %v9491_v21  ;;  %v9569_v20 = vld [vmem:[#allocation5 + $0xb74] ss:$24 sps:$4 sm:$0xff]  }
 0x11a   :  { %5246 = vmatprep.subr.bf16.mxu1 %v9494_v25  ;;  %v9572_v21 = vld [vmem:[#allocation5 + $0xb7c] ss:$24 sps:$4 sm:$0xff]  }
 0x11b   :  { %4892 = vmatmul.mubr.bf16.vlgmr.msra.gmra.mrb[0].mxu0 %v11047_v28  ;;  %v9575_v25 = vld [vmem:[#allocation5 + $0xba4] ss:$24 sps:$4 sm:$0xff]  }
 0x11c   :  { %5236 = vmatmul.mubr.bf16.vlgmr.msra.gmra.mrb[0].mxu1 %v11047_v28  ;;  %4903 = vmatpush1.bf16.msra.mxu0 %v9489_v26  ;;  %v9578_v26 = vld [vmem:[#allocation5 + $0xbac] ss:$24 sps:$4 sm:$0xff]  }
 0x11d   :  { %5247 = vmatpush1.bf16.msra.mxu1 %v9492_v27  ;;  %4904 = vmatprep.subr.bf16.mxu0 %v9497_v31  ;;  %v9573_v27 = vld [vmem:[#allocation5 + $0xba0] ss:$24 sps:$4 sm:$0xff]   ;;  %v9584_v31 = vld [vmem:[#allocation5 + $0xbdc] ss:$24 sps:$4 sm:$0xff]  }
 0x11e   :  { %5248 = vmatprep.subr.bf16.mxu1 %v9500_v32  ;;  %4934 = vmatprep.mubr.bf16.mxu0 %v11049_v33  ;;  %v9579_v32 = vld [vmem:[#allocation5 + $0xbd0] ss:$24 sps:$4 sm:$0xff]  }
 0x11f   :  { %5278 = vmatprep.mubr.bf16.mxu1 %v11049_v33 }
 0x120   :  { %4905 = vmatpush1.bf16.msra.mxu0 %v9495_v34  ;;  %v9582_v34 = vld [vmem:[#allocation5 + $0xbd8] ss:$24 sps:$4 sm:$0xff]  }
 0x121   :  { %5249 = vmatpush1.bf16.msra.mxu1 %v9498_v35  ;;  %4906 = vmatprep.subr.bf16.mxu0 %v9503_v37  ;;  %v9587_v35 = vld [vmem:[#allocation5 + $0xc04] ss:$24 sps:$4 sm:$0xff]   ;;  %v91_v37 = vld [vmem:[#allocation2 + $0x30] sm:$0xff] }
 0x122   :  { %5250 = vmatprep.subr.bf16.mxu1 %v9506_v38  ;;  %v107_v38 = vld [vmem:[#allocation2 + $0xb0] sm:$0xff] }
 0x124   :  { %4907 = vmatpush1.bf16.msra.mxu0 %v9501_v39  ;;  %v9590_v39 = vld [vmem:[#allocation5 + $0xc0c] ss:$24 sps:$4 sm:$0xff]  }
 0x125   :  { %5251 = vmatpush1.bf16.msra.mxu1 %v9504_v40  ;;  %4908 = vmatprep.subr.bf16.mxu0 %v9509_v41  ;;  %v9585_v40 = vld [vmem:[#allocation5 + $0xc00] ss:$24 sps:$4 sm:$0xff]  }
 0x126   :  { %5252 = vmatprep.subr.bf16.mxu1 %v9512_v42  ;;  %v9588_v41 = vld [vmem:[#allocation5 + $0xc08] ss:$24 sps:$4 sm:$0xff]   ;;  %v11055_v42 = vpack.c.bf16 %v107_v38, %v91_v37  ;;  %v9665_v37 = vld [vmem:[#allocation5 + $0xe74] ss:$24 sps:$4 sm:$0xff]  }
 0x127   :  { %v9668_v38 = vld [vmem:[#allocation5 + $0xe7c] ss:$24 sps:$4 sm:$0xff]  }
 0x128   :  { %4909 = vmatpush1.bf16.msra.mxu0 %v9507_v43  ;;  %v94_v43 = vld [vmem:[#allocation2 + $0x48] sm:$0xff] }
 0x129   :  { %5253 = vmatpush1.bf16.msra.mxu1 %v9510_v44  ;;  %4910 = vmatprep.subr.bf16.mxu0 %v9515_v45  ;;  %v110_v44 = vld [vmem:[#allocation2 + $0xc8] sm:$0xff] }
 0x12a   :  { %5254 = vmatprep.subr.bf16.mxu1 %v9518_v46  ;;  %v9593_v45 = vld [vmem:[#allocation5 + $0xc34] ss:$24 sps:$4 sm:$0xff]  }
 0x12b   :  { %v9596_v46 = vld [vmem:[#allocation5 + $0xc3c] ss:$24 sps:$4 sm:$0xff]  }
 0x12c   :  { %4911 = vmatpush1.bf16.msra.mxu0 %v9513_v47  ;;  %v11057_v47 = vpack.c.bf16 %v110_v44, %v94_v43  ;;  %v9674_v43 = vld [vmem:[#allocation5 + $0xeac] ss:$24 sps:$4 sm:$0xff]   ;;  %v9669_v44 = vld [vmem:[#allocation5 + $0xea0] ss:$24 sps:$4 sm:$0xff]  }
 0x12d   :  { %5255 = vmatpush1.bf16.msra.mxu1 %v9516_v48  ;;  %4912 = vmatprep.subr.bf16.mxu0 %v9521_v49  ;;  %v9591_v48 = vld [vmem:[#allocation5 + $0xc30] ss:$24 sps:$4 sm:$0xff]  }
 0x12e   :  { %5256 = vmatprep.subr.bf16.mxu1 %v9524_v51  ;;  %v9594_v49 = vld [vmem:[#allocation5 + $0xc38] ss:$24 sps:$4 sm:$0xff]   ;;  %v9599_v51 = vld [vmem:[#allocation5 + $0xc64] ss:$24 sps:$4 sm:$0xff]  }
 0x130   :  { %4913 = vmatpush1.bf16.msra.mxu0 %v9519_v52  ;;  %v9602_v52 = vld [vmem:[#allocation5 + $0xc6c] ss:$24 sps:$4 sm:$0xff]  }
 0x131   :  { %5257 = vmatpush1.bf16.msra.mxu1 %v9522_v53  ;;  %4914 = vmatprep.subr.bf16.mxu0 %v9527_v54  ;;  %v9597_v53 = vld [vmem:[#allocation5 + $0xc60] ss:$24 sps:$4 sm:$0xff]  }
 0x132   :  { %5258 = vmatprep.subr.bf16.mxu1 %v9530_v55  ;;  %v9600_v54 = vld [vmem:[#allocation5 + $0xc68] ss:$24 sps:$4 sm:$0xff]   ;;  %v9605_v55 = vld [vmem:[#allocation5 + $0xc94] ss:$24 sps:$4 sm:$0xff]  }
 0x134   :  { %4915 = vmatpush1.bf16.msra.mxu0 %v9525_v56  ;;  %v9608_v56 = vld [vmem:[#allocation5 + $0xc9c] ss:$24 sps:$4 sm:$0xff]  }
 0x135   :  { %5259 = vmatpush1.bf16.msra.mxu1 %v9528_v57  ;;  %4916 = vmatprep.subr.bf16.mxu0 %v9533_v58  ;;  %v9603_v57 = vld [vmem:[#allocation5 + $0xc90] ss:$24 sps:$4 sm:$0xff]  }
 0x136   :  { %5260 = vmatprep.subr.bf16.mxu1 %v9536_v59  ;;  %v9606_v58 = vld [vmem:[#allocation5 + $0xc98] ss:$24 sps:$4 sm:$0xff]   ;;  %v9611_v59 = vld [vmem:[#allocation5 + $0xcc4] ss:$24 sps:$4 sm:$0xff]  }
 0x138   :  { %4917 = vmatpush1.bf16.msra.mxu0 %v9531_v60  ;;  %v9614_v60 = vld [vmem:[#allocation5 + $0xccc] ss:$24 sps:$4 sm:$0xff]  }
 0x139   :  { %5261 = vmatpush1.bf16.msra.mxu1 %v9534_v61  ;;  %4918 = vmatprep.subr.bf16.mxu0 %v9539_v62  ;;  %v9609_v61 = vld [vmem:[#allocation5 + $0xcc0] ss:$24 sps:$4 sm:$0xff]  }
 0x13a   :  { %5262 = vmatprep.subr.bf16.mxu1 %v9542_v63  ;;  %v9612_v62 = vld [vmem:[#allocation5 + $0xcc8] ss:$24 sps:$4 sm:$0xff]   ;;  %v9617_v63 = vld [vmem:[#allocation5 + $0xcf4] ss:$24 sps:$4 sm:$0xff]  }
 0x13c   :  { %4919 = vmatpush1.bf16.msra.mxu0 %v9537_v0  ;;  %v9620_v0 = vld [vmem:[#allocation5 + $0xcfc] ss:$24 sps:$4 sm:$0xff]  }
 0x13d   :  { %5263 = vmatpush1.bf16.msra.mxu1 %v9540_v1  ;;  %4920 = vmatprep.subr.bf16.mxu0 %v9545_v2  ;;  %v9615_v1 = vld [vmem:[#allocation5 + $0xcf0] ss:$24 sps:$4 sm:$0xff]  }
 0x13e   :  { %5264 = vmatprep.subr.bf16.mxu1 %v9548_v3  ;;  %v9618_v2 = vld [vmem:[#allocation5 + $0xcf8] ss:$24 sps:$4 sm:$0xff]   ;;  %v9623_v3 = vld [vmem:[#allocation5 + $0xd24] ss:$24 sps:$4 sm:$0xff]  }
 0x140   :  { %4921 = vmatpush1.bf16.msra.mxu0 %v9543_v4  ;;  %v9626_v4 = vld [vmem:[#allocation5 + $0xd2c] ss:$24 sps:$4 sm:$0xff]  }
 0x141   :  { %5265 = vmatpush1.bf16.msra.mxu1 %v9546_v5  ;;  %4922 = vmatprep.subr.bf16.mxu0 %v9551_v6  ;;  %v9621_v5 = vld [vmem:[#allocation5 + $0xd20] ss:$24 sps:$4 sm:$0xff]  }
 0x142   :  { %5266 = vmatprep.subr.bf16.mxu1 %v9554_v7  ;;  %v9624_v6 = vld [vmem:[#allocation5 + $0xd28] ss:$24 sps:$4 sm:$0xff]   ;;  %v9629_v7 = vld [vmem:[#allocation5 + $0xd54] ss:$24 sps:$4 sm:$0xff]  }
 0x144   :  { %4923 = vmatpush1.bf16.msra.mxu0 %v9549_v8  ;;  %v9632_v8 = vld [vmem:[#allocation5 + $0xd5c] ss:$24 sps:$4 sm:$0xff]  }
 0x145   :  { %5267 = vmatpush1.bf16.msra.mxu1 %v9552_v10  ;;  %4924 = vmatprep.subr.bf16.mxu0 %v9557_v11  ;;  %v9627_v10 = vld [vmem:[#allocation5 + $0xd50] ss:$24 sps:$4 sm:$0xff]  }
 0x146   :  { %5268 = vmatprep.subr.bf16.mxu1 %v9560_v12  ;;  %v9630_v11 = vld [vmem:[#allocation5 + $0xd58] ss:$24 sps:$4 sm:$0xff]   ;;  %v9635_v12 = vld [vmem:[#allocation5 + $0xd84] ss:$24 sps:$4 sm:$0xff]  }
 0x148   :  { %4925 = vmatpush1.bf16.msra.mxu0 %v9555_v13  ;;  %v9638_v13 = vld [vmem:[#allocation5 + $0xd8c] ss:$24 sps:$4 sm:$0xff]  }
 0x149   :  { %5269 = vmatpush1.bf16.msra.mxu1 %v9558_v14  ;;  %4926 = vmatprep.subr.bf16.mxu0 %v9563_v15  ;;  %v9633_v14 = vld [vmem:[#allocation5 + $0xd80] ss:$24 sps:$4 sm:$0xff]  }
 0x14a   :  { %5270 = vmatprep.subr.bf16.mxu1 %v9566_v16  ;;  %v9636_v15 = vld [vmem:[#allocation5 + $0xd88] ss:$24 sps:$4 sm:$0xff]   ;;  %v9641_v16 = vld [vmem:[#allocation5 + $0xdb4] ss:$24 sps:$4 sm:$0xff]  }
 0x14c   :  { %4927 = vmatpush1.bf16.msra.mxu0 %v9561_v18  ;;  %v9644_v18 = vld [vmem:[#allocation5 + $0xdbc] ss:$24 sps:$4 sm:$0xff]  }
 0x14d   :  { %5271 = vmatpush1.bf16.msra.mxu1 %v9564_v19  ;;  %4928 = vmatprep.subr.bf16.mxu0 %v9569_v20  ;;  %v9639_v19 = vld [vmem:[#allocation5 + $0xdb0] ss:$24 sps:$4 sm:$0xff]  }
 0x14e   :  { %5272 = vmatprep.subr.bf16.mxu1 %v9572_v21  ;;  %v9642_v20 = vld [vmem:[#allocation5 + $0xdb8] ss:$24 sps:$4 sm:$0xff]   ;;  %v9647_v21 = vld [vmem:[#allocation5 + $0xde4] ss:$24 sps:$4 sm:$0xff]  }
 0x150   :  { %4929 = vmatpush1.bf16.msra.mxu0 %v9567_v22  ;;  %v9650_v22 = vld [vmem:[#allocation5 + $0xdec] ss:$24 sps:$4 sm:$0xff]  }
 0x151   :  { %5273 = vmatpush1.bf16.msra.mxu1 %v9570_v23  ;;  %4930 = vmatprep.subr.bf16.mxu0 %v9575_v25  ;;  %v9645_v23 = vld [vmem:[#allocation5 + $0xde0] ss:$24 sps:$4 sm:$0xff]  }
 0x152   :  { %5274 = vmatprep.subr.bf16.mxu1 %v9578_v26  ;;  %v9648_v25 = vld [vmem:[#allocation5 + $0xde8] ss:$24 sps:$4 sm:$0xff]   ;;  %v9653_v26 = vld [vmem:[#allocation5 + $0xe14] ss:$24 sps:$4 sm:$0xff]  }
 0x154   :  { %4931 = vmatpush1.bf16.msra.mxu0 %v9573_v27  ;;  %v9656_v27 = vld [vmem:[#allocation5 + $0xe1c] ss:$24 sps:$4 sm:$0xff]  }
 0x155   :  { %5275 = vmatpush1.bf16.msra.mxu1 %v9576_v29  ;;  %4932 = vmatprep.subr.bf16.mxu0 %v9581_v30  ;;  %v9651_v29 = vld [vmem:[#allocation5 + $0xe10] ss:$24 sps:$4 sm:$0xff]  }
 0x156   :  { %5276 = vmatprep.subr.bf16.mxu1 %v9584_v31  ;;  %v9654_v30 = vld [vmem:[#allocation5 + $0xe18] ss:$24 sps:$4 sm:$0xff]   ;;  %v9659_v31 = vld [vmem:[#allocation5 + $0xe44] ss:$24 sps:$4 sm:$0xff]  }
 0x158   :  { %4933 = vmatpush1.bf16.msra.mxu0 %v9579_v32  ;;  %v9662_v32 = vld [vmem:[#allocation5 + $0xe4c] ss:$24 sps:$4 sm:$0xff]  }
 0x159   :  { %5277 = vmatpush1.bf16.msra.mxu1 %v9582_v34  ;;  %4945 = vmatprep.subr.bf16.mxu0 %v9587_v35  ;;  %v9657_v34 = vld [vmem:[#allocation5 + $0xe40] ss:$24 sps:$4 sm:$0xff]  }
 0x15a   :  { %5289 = vmatprep.subr.bf16.mxu1 %v9590_v39  ;;  %v9660_v35 = vld [vmem:[#allocation5 + $0xe48] ss:$24 sps:$4 sm:$0xff]  }
 0x15b   :  { %4935 = vmatmul.mubr.bf16.vlgmr.msra.gmra.mrb[0].mxu0 %v11055_v42  ;;  %v9663_v39 = vld [vmem:[#allocation5 + $0xe70] ss:$24 sps:$4 sm:$0xff]  }
 0x15c   :  { %5279 = vmatmul.mubr.bf16.vlgmr.msra.gmra.mrb[0].mxu1 %v11055_v42  ;;  %4946 = vmatpush1.bf16.msra.mxu0 %v9585_v40  ;;  %v9666_v40 = vld [vmem:[#allocation5 + $0xe78] ss:$24 sps:$4 sm:$0xff]  }
 0x15d   :  { %5290 = vmatpush1.bf16.msra.mxu1 %v9588_v41  ;;  %4947 = vmatprep.subr.bf16.mxu0 %v9593_v45  ;;  %v9671_v41 = vld [vmem:[#allocation5 + $0xea4] ss:$24 sps:$4 sm:$0xff]   ;;  %v9672_v45 = vld [vmem:[#allocation5 + $0xea8] ss:$24 sps:$4 sm:$0xff]  }
 0x15e   :  { %5291 = vmatprep.subr.bf16.mxu1 %v9596_v46  ;;  %4977 = vmatprep.mubr.bf16.mxu0 %v11057_v47  ;;  %v9677_v46 = vld [vmem:[#allocation5 + $0xed4] ss:$24 sps:$4 sm:$0xff]  }
 0x15f   :  { %5321 = vmatprep.mubr.bf16.mxu1 %v11057_v47 }
 0x160   :  { %4948 = vmatpush1.bf16.msra.mxu0 %v9591_v48  ;;  %v9680_v48 = vld [vmem:[#allocation5 + $0xedc] ss:$24 sps:$4 sm:$0xff]  }
 0x161   :  { %5292 = vmatpush1.bf16.msra.mxu1 %v9594_v49  ;;  %4949 = vmatprep.subr.bf16.mxu0 %v9599_v51  ;;  %v9675_v49 = vld [vmem:[#allocation5 + $0xed0] ss:$24 sps:$4 sm:$0xff]  }
 0x162   :  { %5293 = vmatprep.subr.bf16.mxu1 %v9602_v52  ;;  %v9678_v51 = vld [vmem:[#allocation5 + $0xed8] ss:$24 sps:$4 sm:$0xff]   ;;  %v9683_v52 = vld [vmem:[#allocation5 + $0xf04] ss:$24 sps:$4 sm:$0xff]  }
 0x164   :  { %4950 = vmatpush1.bf16.msra.mxu0 %v9597_v53  ;;  %v9686_v53 = vld [vmem:[#allocation5 + $0xf0c] ss:$24 sps:$4 sm:$0xff]  }
 0x165   :  { %5294 = vmatpush1.bf16.msra.mxu1 %v9600_v54  ;;  %4951 = vmatprep.subr.bf16.mxu0 %v9605_v55  ;;  %v93_v54 = vld [vmem:[#allocation2 + $0x40] sm:$0xff] }
 0x166   :  { %5295 = vmatprep.subr.bf16.mxu1 %v9608_v56  ;;  %v109_v55 = vld [vmem:[#allocation2 + $0xc0] sm:$0xff]  ;;  %v96_v56 = vld [vmem:[#allocation2 + $0x58] sm:$0xff] }
 0x168   :  { %4952 = vmatpush1.bf16.msra.mxu0 %v9603_v57  ;;  %v112_v57 = vld [vmem:[#allocation2 + $0xd8] sm:$0xff] }
 0x169   :  { %5296 = vmatpush1.bf16.msra.mxu1 %v9606_v58  ;;  %4953 = vmatprep.subr.bf16.mxu0 %v9611_v59  ;;  %v11063_v58 = vpack.c.bf16 %v109_v55, %v93_v54  ;;  %v9681_v59 = vld [vmem:[#allocation5 + $0xf00] ss:$24 sps:$4 sm:$0xff]   ;;  %v9761_v55 = vld [vmem:[#allocation5 + $0x1174] ss:$24 sps:$4 sm:$0xff]  }
 0x16a   :  { %5297 = vmatprep.subr.bf16.mxu1 %v9614_v60  ;;  %v9684_v60 = vld [vmem:[#allocation5 + $0xf08] ss:$24 sps:$4 sm:$0xff]  }
 0x16b   :  { %v9756_v54 = vld [vmem:[#allocation5 + $0x1148] ss:$24 sps:$4 sm:$0xff]  }
 0x16c   :  { %4954 = vmatpush1.bf16.msra.mxu0 %v9609_v61  ;;  %v9689_v61 = vld [vmem:[#allocation5 + $0xf34] ss:$24 sps:$4 sm:$0xff]  }
 0x16d   :  { %5298 = vmatpush1.bf16.msra.mxu1 %v9612_v62  ;;  %4955 = vmatprep.subr.bf16.mxu0 %v9617_v63  ;;  %v9692_v62 = vld [vmem:[#allocation5 + $0xf3c] ss:$24 sps:$4 sm:$0xff]   ;;  %v11065_v63 = vpack.c.bf16 %v112_v57, %v96_v56  ;;  %v9759_v57 = vld [vmem:[#allocation5 + $0x1170] ss:$24 sps:$4 sm:$0xff]  }
 0x16e   :  { %5299 = vmatprep.subr.bf16.mxu1 %v9620_v0  ;;  %v9687_v0 = vld [vmem:[#allocation5 + $0xf30] ss:$24 sps:$4 sm:$0xff]   ;;  %v9764_v56 = vld [vmem:[#allocation5 + $0x117c] ss:$24 sps:$4 sm:$0xff]  }
 0x170   :  { %4956 = vmatpush1.bf16.msra.mxu0 %v9615_v1  ;;  %v9690_v1 = vld [vmem:[#allocation5 + $0xf38] ss:$24 sps:$4 sm:$0xff]  }
 0x171   :  { %5300 = vmatpush1.bf16.msra.mxu1 %v9618_v2  ;;  %4957 = vmatprep.subr.bf16.mxu0 %v9623_v3  ;;  %v9695_v2 = vld [vmem:[#allocation5 + $0xf64] ss:$24 sps:$4 sm:$0xff]  }
 0x172   :  { %5301 = vmatprep.subr.bf16.mxu1 %v9626_v4  ;;  %v9698_v3 = vld [vmem:[#allocation5 + $0xf6c] ss:$24 sps:$4 sm:$0xff]   ;;  %v9693_v4 = vld [vmem:[#allocation5 + $0xf60] ss:$24 sps:$4 sm:$0xff]  }
 0x174   :  { %4958 = vmatpush1.bf16.msra.mxu0 %v9621_v5  ;;  %v9696_v5 = vld [vmem:[#allocation5 + $0xf68] ss:$24 sps:$4 sm:$0xff]  }
 0x175   :  { %5302 = vmatpush1.bf16.msra.mxu1 %v9624_v6  ;;  %4959 = vmatprep.subr.bf16.mxu0 %v9629_v7  ;;  %v9701_v6 = vld [vmem:[#allocation5 + $0xf94] ss:$24 sps:$4 sm:$0xff]  }
 0x176   :  { %5303 = vmatprep.subr.bf16.mxu1 %v9632_v8  ;;  %v9704_v7 = vld [vmem:[#allocation5 + $0xf9c] ss:$24 sps:$4 sm:$0xff]   ;;  %v9699_v8 = vld [vmem:[#allocation5 + $0xf90] ss:$24 sps:$4 sm:$0xff]  }
 0x178   :  { %4960 = vmatpush1.bf16.msra.mxu0 %v9627_v10  ;;  %v9702_v10 = vld [vmem:[#allocation5 + $0xf98] ss:$24 sps:$4 sm:$0xff]  }
 0x179   :  { %5304 = vmatpush1.bf16.msra.mxu1 %v9630_v11  ;;  %4961 = vmatprep.subr.bf16.mxu0 %v9635_v12  ;;  %v9707_v11 = vld [vmem:[#allocation5 + $0xfc4] ss:$24 sps:$4 sm:$0xff]  }
 0x17a   :  { %5305 = vmatprep.subr.bf16.mxu1 %v9638_v13  ;;  %v9710_v12 = vld [vmem:[#allocation5 + $0xfcc] ss:$24 sps:$4 sm:$0xff]   ;;  %v9705_v13 = vld [vmem:[#allocation5 + $0xfc0] ss:$24 sps:$4 sm:$0xff]  }
 0x17c   :  { %4962 = vmatpush1.bf16.msra.mxu0 %v9633_v14  ;;  %v9708_v14 = vld [vmem:[#allocation5 + $0xfc8] ss:$24 sps:$4 sm:$0xff]  }
 0x17d   :  { %5306 = vmatpush1.bf16.msra.mxu1 %v9636_v15  ;;  %4963 = vmatprep.subr.bf16.mxu0 %v9641_v16  ;;  %v9713_v15 = vld [vmem:[#allocation5 + $0xff4] ss:$24 sps:$4 sm:$0xff]  }
 0x17e   :  { %5307 = vmatprep.subr.bf16.mxu1 %v9644_v18  ;;  %v9716_v16 = vld [vmem:[#allocation5 + $0xffc] ss:$24 sps:$4 sm:$0xff]   ;;  %v9711_v18 = vld [vmem:[#allocation5 + $0xff0] ss:$24 sps:$4 sm:$0xff]  }
 0x180   :  { %4964 = vmatpush1.bf16.msra.mxu0 %v9639_v19  ;;  %v9714_v19 = vld [vmem:[#allocation5 + $0xff8] ss:$24 sps:$4 sm:$0xff]  }
 0x181   :  { %5308 = vmatpush1.bf16.msra.mxu1 %v9642_v20  ;;  %4965 = vmatprep.subr.bf16.mxu0 %v9647_v21  ;;  %v9719_v20 = vld [vmem:[#allocation5 + $0x1024] ss:$24 sps:$4 sm:$0xff]  }
 0x182   :  { %5309 = vmatprep.subr.bf16.mxu1 %v9650_v22  ;;  %v9722_v21 = vld [vmem:[#allocation5 + $0x102c] ss:$24 sps:$4 sm:$0xff]   ;;  %v9717_v22 = vld [vmem:[#allocation5 + $0x1020] ss:$24 sps:$4 sm:$0xff]  }
 0x184   :  { %4966 = vmatpush1.bf16.msra.mxu0 %v9645_v23  ;;  %v9720_v23 = vld [vmem:[#allocation5 + $0x1028] ss:$24 sps:$4 sm:$0xff]  }
 0x185   :  { %5310 = vmatpush1.bf16.msra.mxu1 %v9648_v25  ;;  %4967 = vmatprep.subr.bf16.mxu0 %v9653_v26  ;;  %v9725_v25 = vld [vmem:[#allocation5 + $0x1054] ss:$24 sps:$4 sm:$0xff]  }
 0x186   :  { %5311 = vmatprep.subr.bf16.mxu1 %v9656_v27  ;;  %v9728_v26 = vld [vmem:[#allocation5 + $0x105c] ss:$24 sps:$4 sm:$0xff]   ;;  %v9723_v27 = vld [vmem:[#allocation5 + $0x1050] ss:$24 sps:$4 sm:$0xff]  }
 0x188   :  { %4968 = vmatpush1.bf16.msra.mxu0 %v9651_v29  ;;  %v9726_v29 = vld [vmem:[#allocation5 + $0x1058] ss:$24 sps:$4 sm:$0xff]  }
 0x189   :  { %5312 = vmatpush1.bf16.msra.mxu1 %v9654_v30  ;;  %4969 = vmatprep.subr.bf16.mxu0 %v9659_v31  ;;  %v9731_v30 = vld [vmem:[#allocation5 + $0x1084] ss:$24 sps:$4 sm:$0xff]  }
 0x18a   :  { %5313 = vmatprep.subr.bf16.mxu1 %v9662_v32  ;;  %v9734_v31 = vld [vmem:[#allocation5 + $0x108c] ss:$24 sps:$4 sm:$0xff]   ;;  %v9729_v32 = vld [vmem:[#allocation5 + $0x1080] ss:$24 sps:$4 sm:$0xff]  }
 0x18c   :  { %4970 = vmatpush1.bf16.msra.mxu0 %v9657_v34  ;;  %v9732_v34 = vld [vmem:[#allocation5 + $0x1088] ss:$24 sps:$4 sm:$0xff]  }
 0x18d   :  { %5314 = vmatpush1.bf16.msra.mxu1 %v9660_v35  ;;  %4971 = vmatprep.subr.bf16.mxu0 %v9665_v37  ;;  %v9737_v35 = vld [vmem:[#allocation5 + $0x10b4] ss:$24 sps:$4 sm:$0xff]  }
 0x18e   :  { %5315 = vmatprep.subr.bf16.mxu1 %v9668_v38  ;;  %v9740_v37 = vld [vmem:[#allocation5 + $0x10bc] ss:$24 sps:$4 sm:$0xff]   ;;  %v9735_v38 = vld [vmem:[#allocation5 + $0x10b0] ss:$24 sps:$4 sm:$0xff]  }
 0x190   :  { %4972 = vmatpush1.bf16.msra.mxu0 %v9663_v39  ;;  %v9738_v39 = vld [vmem:[#allocation5 + $0x10b8] ss:$24 sps:$4 sm:$0xff]  }
 0x191   :  { %5316 = vmatpush1.bf16.msra.mxu1 %v9666_v40  ;;  %4973 = vmatprep.subr.bf16.mxu0 %v9671_v41  ;;  %v9743_v40 = vld [vmem:[#allocation5 + $0x10e4] ss:$24 sps:$4 sm:$0xff]  }
 0x192   :  { %5317 = vmatprep.subr.bf16.mxu1 %v9674_v43  ;;  %v9746_v41 = vld [vmem:[#allocation5 + $0x10ec] ss:$24 sps:$4 sm:$0xff]   ;;  %v9741_v43 = vld [vmem:[#allocation5 + $0x10e0] ss:$24 sps:$4 sm:$0xff]  }
 0x194   :  { %4974 = vmatpush1.bf16.msra.mxu0 %v9669_v44  ;;  %v9744_v44 = vld [vmem:[#allocation5 + $0x10e8] ss:$24 sps:$4 sm:$0xff]  }
 0x195   :  { %5318 = vmatpush1.bf16.msra.mxu1 %v9672_v45  ;;  %4975 = vmatprep.subr.bf16.mxu0 %v9677_v46  ;;  %v9749_v45 = vld [vmem:[#allocation5 + $0x1114] ss:$24 sps:$4 sm:$0xff]  }
 0x196   :  { %5319 = vmatprep.subr.bf16.mxu1 %v9680_v48  ;;  %v9752_v46 = vld [vmem:[#allocation5 + $0x111c] ss:$24 sps:$4 sm:$0xff]   ;;  %v9747_v48 = vld [vmem:[#allocation5 + $0x1110] ss:$24 sps:$4 sm:$0xff]  }
 0x198   :  { %4976 = vmatpush1.bf16.msra.mxu0 %v9675_v49  ;;  %v9750_v49 = vld [vmem:[#allocation5 + $0x1118] ss:$24 sps:$4 sm:$0xff]  }
 0x199   :  { %5320 = vmatpush1.bf16.msra.mxu1 %v9678_v51  ;;  %4988 = vmatprep.subr.bf16.mxu0 %v9683_v52  ;;  %v9755_v51 = vld [vmem:[#allocation5 + $0x1144] ss:$24 sps:$4 sm:$0xff]  }
 0x19a   :  { %5332 = vmatprep.subr.bf16.mxu1 %v9686_v53  ;;  %v9758_v52 = vld [vmem:[#allocation5 + $0x114c] ss:$24 sps:$4 sm:$0xff]   ;;  %v9753_v53 = vld [vmem:[#allocation5 + $0x1140] ss:$24 sps:$4 sm:$0xff]  }
 0x19b   :  { %4978 = vmatmul.mubr.bf16.vlgmr.msra.gmra.mrb[0].mxu0 %v11063_v58 }
 0x19c   :  { %5322 = vmatmul.mubr.bf16.vlgmr.msra.gmra.mrb[0].mxu1 %v11063_v58  ;;  %4989 = vmatpush1.bf16.msra.mxu0 %v9681_v59  ;;  %v9762_v59 = vld [vmem:[#allocation5 + $0x1178] ss:$24 sps:$4 sm:$0xff]  }
 0x19d   :  { %5333 = vmatpush1.bf16.msra.mxu1 %v9684_v60  ;;  %4990 = vmatprep.subr.bf16.mxu0 %v9689_v61  ;;  %v9767_v60 = vld [vmem:[#allocation5 + $0x11a4] ss:$24 sps:$4 sm:$0xff]  }
 0x19e   :  { %5334 = vmatprep.subr.bf16.mxu1 %v9692_v62  ;;  %5020 = vmatprep.mubr.bf16.mxu0 %v11065_v63  ;;  %v9770_v61 = vld [vmem:[#allocation5 + $0x11ac] ss:$24 sps:$4 sm:$0xff]   ;;  %v9765_v62 = vld [vmem:[#allocation5 + $0x11a0] ss:$24 sps:$4 sm:$0xff]  }
 0x19f   :  { %5364 = vmatprep.mubr.bf16.mxu1 %v11065_v63 }
 0x1a0   :  { %4991 = vmatpush1.bf16.msra.mxu0 %v9687_v0  ;;  %v9768_v0 = vld [vmem:[#allocation5 + $0x11a8] ss:$24 sps:$4 sm:$0xff]  }
 0x1a1   :  { %5335 = vmatpush1.bf16.msra.mxu1 %v9690_v1  ;;  %4992 = vmatprep.subr.bf16.mxu0 %v9695_v2  ;;  %v9773_v1 = vld [vmem:[#allocation5 + $0x11d4] ss:$24 sps:$4 sm:$0xff]  }
 0x1a2   :  { %5336 = vmatprep.subr.bf16.mxu1 %v9698_v3  ;;  %v9776_v2 = vld [vmem:[#allocation5 + $0x11dc] ss:$24 sps:$4 sm:$0xff]   ;;  %v9771_v3 = vld [vmem:[#allocation5 + $0x11d0] ss:$24 sps:$4 sm:$0xff]  }
 0x1a4   :  { %4993 = vmatpush1.bf16.msra.mxu0 %v9693_v4  ;;  %v9774_v4 = vld [vmem:[#allocation5 + $0x11d8] ss:$24 sps:$4 sm:$0xff]  }
 0x1a5   :  { %5337 = vmatpush1.bf16.msra.mxu1 %v9696_v5  ;;  %4994 = vmatprep.subr.bf16.mxu0 %v9701_v6  ;;  %v95_v5 = vld [vmem:[#allocation2 + $0x50] sm:$0xff] }
 0x1a6   :  { %5338 = vmatprep.subr.bf16.mxu1 %v9704_v7  ;;  %v111_v6 = vld [vmem:[#allocation2 + $0xd0] sm:$0xff]  ;;  %v9779_v7 = vld [vmem:[#allocation5 + $0x1204] ss:$24 sps:$4 sm:$0xff]  }
 0x1a8   :  { %4995 = vmatpush1.bf16.msra.mxu0 %v9699_v8  ;;  %v9782_v8 = vld [vmem:[#allocation5 + $0x120c] ss:$24 sps:$4 sm:$0xff]  }
 0x1a9   :  { %5339 = vmatpush1.bf16.msra.mxu1 %v9702_v10  ;;  %4996 = vmatprep.subr.bf16.mxu0 %v9707_v11  ;;  %v9777_v10 = vld [vmem:[#allocation5 + $0x1200] ss:$24 sps:$4 sm:$0xff]   ;;  %v11071_v11 = vpack.c.bf16 %v111_v6, %v95_v5  ;;  %v9851_v6 = vld [vmem:[#allocation5 + $0x1444] ss:$24 sps:$4 sm:$0xff]  }
 0x1aa   :  { %5340 = vmatprep.subr.bf16.mxu1 %v9710_v12  ;;  %v98_v12 = vld [vmem:[#allocation2 + $0x68] sm:$0xff]  ;;  %v9846_v5 = vld [vmem:[#allocation5 + $0x1418] ss:$24 sps:$4 sm:$0xff]  }
 0x1ac   :  { %4997 = vmatpush1.bf16.msra.mxu0 %v9705_v13  ;;  %v114_v13 = vld [vmem:[#allocation2 + $0xe8] sm:$0xff] }
 0x1ad   :  { %5341 = vmatpush1.bf16.msra.mxu1 %v9708_v14  ;;  %4998 = vmatprep.subr.bf16.mxu0 %v9713_v15  ;;  %v9780_v14 = vld [vmem:[#allocation5 + $0x1208] ss:$24 sps:$4 sm:$0xff]   ;;  %v9785_v15 = vld [vmem:[#allocation5 + $0x1234] ss:$24 sps:$4 sm:$0xff]  }
 0x1ae   :  { %5342 = vmatprep.subr.bf16.mxu1 %v9716_v16  ;;  %v9788_v16 = vld [vmem:[#allocation5 + $0x123c] ss:$24 sps:$4 sm:$0xff]  }
 0x1b0   :  { %4999 = vmatpush1.bf16.msra.mxu0 %v9711_v18  ;;  %v9783_v18 = vld [vmem:[#allocation5 + $0x1230] ss:$24 sps:$4 sm:$0xff]  }
 0x1b1   :  { %5343 = vmatpush1.bf16.msra.mxu1 %v9714_v19  ;;  %5000 = vmatprep.subr.bf16.mxu0 %v9719_v20  ;;  %v9786_v19 = vld [vmem:[#allocation5 + $0x1238] ss:$24 sps:$4 sm:$0xff]   ;;  %v11073_v20 = vpack.c.bf16 %v114_v13, %v98_v12  ;;  %v9857_v12 = vld [vmem:[#allocation5 + $0x1474] ss:$24 sps:$4 sm:$0xff]  }
 0x1b2   :  { %5344 = vmatprep.subr.bf16.mxu1 %v9722_v21  ;;  %v9791_v21 = vld [vmem:[#allocation5 + $0x1264] ss:$24 sps:$4 sm:$0xff]  }
 0x1b3   :  { %v9860_v13 = vld [vmem:[#allocation5 + $0x147c] ss:$24 sps:$4 sm:$0xff]  }
 0x1b4   :  { %5001 = vmatpush1.bf16.msra.mxu0 %v9717_v22  ;;  %v9794_v22 = vld [vmem:[#allocation5 + $0x126c] ss:$24 sps:$4 sm:$0xff]  }
 0x1b5   :  { %5345 = vmatpush1.bf16.msra.mxu1 %v9720_v23  ;;  %5002 = vmatprep.subr.bf16.mxu0 %v9725_v25  ;;  %v9789_v23 = vld [vmem:[#allocation5 + $0x1260] ss:$24 sps:$4 sm:$0xff]  }
 0x1b6   :  { %5346 = vmatprep.subr.bf16.mxu1 %v9728_v26  ;;  %v9792_v25 = vld [vmem:[#allocation5 + $0x1268] ss:$24 sps:$4 sm:$0xff]   ;;  %v9797_v26 = vld [vmem:[#allocation5 + $0x1294] ss:$24 sps:$4 sm:$0xff]  }
 0x1b8   :  { %5003 = vmatpush1.bf16.msra.mxu0 %v9723_v27  ;;  %v9800_v27 = vld [vmem:[#allocation5 + $0x129c] ss:$24 sps:$4 sm:$0xff]  }
 0x1b9   :  { %5347 = vmatpush1.bf16.msra.mxu1 %v9726_v29  ;;  %5004 = vmatprep.subr.bf16.mxu0 %v9731_v30  ;;  %v9795_v29 = vld [vmem:[#allocation5 + $0x1290] ss:$24 sps:$4 sm:$0xff]  }
 0x1ba   :  { %5348 = vmatprep.subr.bf16.mxu1 %v9734_v31  ;;  %v9798_v30 = vld [vmem:[#allocation5 + $0x1298] ss:$24 sps:$4 sm:$0xff]   ;;  %v9803_v31 = vld [vmem:[#allocation5 + $0x12c4] ss:$24 sps:$4 sm:$0xff]  }
 0x1bc   :  { %5005 = vmatpush1.bf16.msra.mxu0 %v9729_v32  ;;  %v9806_v32 = vld [vmem:[#allocation5 + $0x12cc] ss:$24 sps:$4 sm:$0xff]  }
 0x1bd   :  { %5349 = vmatpush1.bf16.msra.mxu1 %v9732_v34  ;;  %5006 = vmatprep.subr.bf16.mxu0 %v9737_v35  ;;  %v9801_v34 = vld [vmem:[#allocation5 + $0x12c0] ss:$24 sps:$4 sm:$0xff]  }
 0x1be   :  { %5350 = vmatprep.subr.bf16.mxu1 %v9740_v37  ;;  %v9804_v35 = vld [vmem:[#allocation5 + $0x12c8] ss:$24 sps:$4 sm:$0xff]   ;;  %v9809_v37 = vld [vmem:[#allocation5 + $0x12f4] ss:$24 sps:$4 sm:$0xff]  }
 0x1c0   :  { %5007 = vmatpush1.bf16.msra.mxu0 %v9735_v38  ;;  %v9812_v38 = vld [vmem:[#allocation5 + $0x12fc] ss:$24 sps:$4 sm:$0xff]  }
 0x1c1   :  { %5351 = vmatpush1.bf16.msra.mxu1 %v9738_v39  ;;  %5008 = vmatprep.subr.bf16.mxu0 %v9743_v40  ;;  %v9807_v39 = vld [vmem:[#allocation5 + $0x12f0] ss:$24 sps:$4 sm:$0xff]  }
 0x1c2   :  { %5352 = vmatprep.subr.bf16.mxu1 %v9746_v41  ;;  %v9810_v40 = vld [vmem:[#allocation5 + $0x12f8] ss:$24 sps:$4 sm:$0xff]   ;;  %v9815_v41 = vld [vmem:[#allocation5 + $0x1324] ss:$24 sps:$4 sm:$0xff]  }
 0x1c4   :  { %5009 = vmatpush1.bf16.msra.mxu0 %v9741_v43  ;;  %v9818_v43 = vld [vmem:[#allocation5 + $0x132c] ss:$24 sps:$4 sm:$0xff]  }
 0x1c5   :  { %5353 = vmatpush1.bf16.msra.mxu1 %v9744_v44  ;;  %5010 = vmatprep.subr.bf16.mxu0 %v9749_v45  ;;  %v9813_v44 = vld [vmem:[#allocation5 + $0x1320] ss:$24 sps:$4 sm:$0xff]  }
 0x1c6   :  { %5354 = vmatprep.subr.bf16.mxu1 %v9752_v46  ;;  %v9816_v45 = vld [vmem:[#allocation5 + $0x1328] ss:$24 sps:$4 sm:$0xff]   ;;  %v9821_v46 = vld [vmem:[#allocation5 + $0x1354] ss:$24 sps:$4 sm:$0xff]  }
 0x1c8   :  { %5011 = vmatpush1.bf16.msra.mxu0 %v9747_v48  ;;  %v9824_v48 = vld [vmem:[#allocation5 + $0x135c] ss:$24 sps:$4 sm:$0xff]  }
 0x1c9   :  { %5355 = vmatpush1.bf16.msra.mxu1 %v9750_v49  ;;  %5012 = vmatprep.subr.bf16.mxu0 %v9755_v51  ;;  %v9819_v49 = vld [vmem:[#allocation5 + $0x1350] ss:$24 sps:$4 sm:$0xff]  }
 0x1ca   :  { %5356 = vmatprep.subr.bf16.mxu1 %v9758_v52  ;;  %v9822_v51 = vld [vmem:[#allocation5 + $0x1358] ss:$24 sps:$4 sm:$0xff]   ;;  %v9827_v52 = vld [vmem:[#allocation5 + $0x1384] ss:$24 sps:$4 sm:$0xff]  }
 0x1cc   :  { %5013 = vmatpush1.bf16.msra.mxu0 %v9753_v53  ;;  %v9830_v53 = vld [vmem:[#allocation5 + $0x138c] ss:$24 sps:$4 sm:$0xff]  }
 0x1cd   :  { %5357 = vmatpush1.bf16.msra.mxu1 %v9756_v54  ;;  %5014 = vmatprep.subr.bf16.mxu0 %v9761_v55  ;;  %v9825_v54 = vld [vmem:[#allocation5 + $0x1380] ss:$24 sps:$4 sm:$0xff]  }
 0x1ce   :  { %5358 = vmatprep.subr.bf16.mxu1 %v9764_v56  ;;  %v9828_v55 = vld [vmem:[#allocation5 + $0x1388] ss:$24 sps:$4 sm:$0xff]   ;;  %v9833_v56 = vld [vmem:[#allocation5 + $0x13b4] ss:$24 sps:$4 sm:$0xff]  }
 0x1d0   :  { %5015 = vmatpush1.bf16.msra.mxu0 %v9759_v57  ;;  %v9836_v57 = vld [vmem:[#allocation5 + $0x13bc] ss:$24 sps:$4 sm:$0xff]  }
 0x1d1   :  { %5359 = vmatpush1.bf16.msra.mxu1 %v9762_v59  ;;  %5016 = vmatprep.subr.bf16.mxu0 %v9767_v60  ;;  %v9831_v59 = vld [vmem:[#allocation5 + $0x13b0] ss:$24 sps:$4 sm:$0xff]  }
 0x1d2   :  { %5360 = vmatprep.subr.bf16.mxu1 %v9770_v61  ;;  %v9834_v60 = vld [vmem:[#allocation5 + $0x13b8] ss:$24 sps:$4 sm:$0xff]   ;;  %v9839_v61 = vld [vmem:[#allocation5 + $0x13e4] ss:$24 sps:$4 sm:$0xff]  }
 0x1d4   :  { %5017 = vmatpush1.bf16.msra.mxu0 %v9765_v62  ;;  %v9842_v62 = vld [vmem:[#allocation5 + $0x13ec] ss:$24 sps:$4 sm:$0xff]  }
 0x1d5   :  { %5361 = vmatpush1.bf16.msra.mxu1 %v9768_v0  ;;  %5018 = vmatprep.subr.bf16.mxu0 %v9773_v1  ;;  %v9837_v0 = vld [vmem:[#allocation5 + $0x13e0] ss:$24 sps:$4 sm:$0xff]  }
 0x1d6   :  { %5362 = vmatprep.subr.bf16.mxu1 %v9776_v2  ;;  %v9840_v1 = vld [vmem:[#allocation5 + $0x13e8] ss:$24 sps:$4 sm:$0xff]   ;;  %v9845_v2 = vld [vmem:[#allocation5 + $0x1414] ss:$24 sps:$4 sm:$0xff]  }
 0x1d8   :  { %5019 = vmatpush1.bf16.msra.mxu0 %v9771_v3  ;;  %v9848_v3 = vld [vmem:[#allocation5 + $0x141c] ss:$24 sps:$4 sm:$0xff]  }
 0x1d9   :  { %5363 = vmatpush1.bf16.msra.mxu1 %v9774_v4  ;;  %5031 = vmatprep.subr.bf16.mxu0 %v9779_v7  ;;  %v9843_v4 = vld [vmem:[#allocation5 + $0x1410] ss:$24 sps:$4 sm:$0xff]   ;;  %v9854_v7 = vld [vmem:[#allocation5 + $0x144c] ss:$24 sps:$4 sm:$0xff]  }
 0x1da   :  { %5375 = vmatprep.subr.bf16.mxu1 %v9782_v8  ;;  %v9849_v8 = vld [vmem:[#allocation5 + $0x1440] ss:$24 sps:$4 sm:$0xff]  }
 0x1db   :  { %5021 = vmatmul.mubr.bf16.vlgmr.msra.gmra.mrb[0].mxu0 %v11071_v11 }
 0x1dc   :  { %5365 = vmatmul.mubr.bf16.vlgmr.msra.gmra.mrb[0].mxu1 %v11071_v11  ;;  %5032 = vmatpush1.bf16.msra.mxu0 %v9777_v10  ;;  %v9852_v10 = vld [vmem:[#allocation5 + $0x1448] ss:$24 sps:$4 sm:$0xff]  }
 0x1dd   :  { %5376 = vmatpush1.bf16.msra.mxu1 %v9780_v14  ;;  %5033 = vmatprep.subr.bf16.mxu0 %v9785_v15  ;;  %v9855_v14 = vld [vmem:[#allocation5 + $0x1470] ss:$24 sps:$4 sm:$0xff]  }
 0x1de   :  { %5377 = vmatprep.subr.bf16.mxu1 %v9788_v16  ;;  %5063 = vmatprep.mubr.bf16.mxu0 %v11073_v20  ;;  %v9858_v15 = vld [vmem:[#allocation5 + $0x1478] ss:$24 sps:$4 sm:$0xff]   ;;  %v9863_v16 = vld [vmem:[#allocation5 + $0x14a4] ss:$24 sps:$4 sm:$0xff]  }
 0x1df   :  { %5407 = vmatprep.mubr.bf16.mxu1 %v11073_v20 }
 0x1e0   :  { %5034 = vmatpush1.bf16.msra.mxu0 %v9783_v18  ;;  %v9866_v18 = vld [vmem:[#allocation5 + $0x14ac] ss:$24 sps:$4 sm:$0xff]  }
 0x1e1   :  { %5378 = vmatpush1.bf16.msra.mxu1 %v9786_v19  ;;  %5035 = vmatprep.subr.bf16.mxu0 %v9791_v21  ;;  %v9861_v19 = vld [vmem:[#allocation5 + $0x14a0] ss:$24 sps:$4 sm:$0xff]  }
 0x1e2   :  { %5379 = vmatprep.subr.bf16.mxu1 %v9794_v22  ;;  %v9864_v21 = vld [vmem:[#allocation5 + $0x14a8] ss:$24 sps:$4 sm:$0xff]   ;;  %v9869_v22 = vld [vmem:[#allocation5 + $0x14d4] ss:$24 sps:$4 sm:$0xff]  }
 0x1e4   :  { %5036 = vmatpush1.bf16.msra.mxu0 %v9789_v23  ;;  %v9872_v23 = vld [vmem:[#allocation5 + $0x14dc] ss:$24 sps:$4 sm:$0xff]  }
 0x1e5   :  { %5380 = vmatpush1.bf16.msra.mxu1 %v9792_v25  ;;  %5037 = vmatprep.subr.bf16.mxu0 %v9797_v26  ;;  %v9867_v25 = vld [vmem:[#allocation5 + $0x14d0] ss:$24 sps:$4 sm:$0xff]  }
 0x1e6   :  { %5381 = vmatprep.subr.bf16.mxu1 %v9800_v27  ;;  %v9870_v26 = vld [vmem:[#allocation5 + $0x14d8] ss:$24 sps:$4 sm:$0xff]   ;;  %v9875_v27 = vld [vmem:[#allocation5 + $0x1504] ss:$24 sps:$4 sm:$0xff]  }
 0x1e8   :  { %5038 = vmatpush1.bf16.msra.mxu0 %v9795_v29  ;;  %v9878_v29 = vld [vmem:[#allocation5 + $0x150c] ss:$24 sps:$4 sm:$0xff]  }
 0x1e9   :  { %5382 = vmatpush1.bf16.msra.mxu1 %v9798_v30  ;;  %5039 = vmatprep.subr.bf16.mxu0 %v9803_v31  ;;  %v97_v30 = vld [vmem:[#allocation2 + $0x60] sm:$0xff] }
 0x1ea   :  { %5383 = vmatprep.subr.bf16.mxu1 %v9806_v32  ;;  %v113_v31 = vld [vmem:[#allocation2 + $0xe0] sm:$0xff]  ;;  %v100_v32 = vld [vmem:[#allocation2 + $0x78] sm:$0xff] }
 0x1ec   :  { %5040 = vmatpush1.bf16.msra.mxu0 %v9801_v34  ;;  %v116_v34 = vld [vmem:[#allocation2 + $0xf8] sm:$0xff] }
 0x1ed   :  { %5384 = vmatpush1.bf16.msra.mxu1 %v9804_v35  ;;  %5041 = vmatprep.subr.bf16.mxu0 %v9809_v37  ;;  %v9873_v35 = vld [vmem:[#allocation5 + $0x1500] ss:$24 sps:$4 sm:$0xff]  }
 0x1ee   :  { %5385 = vmatprep.subr.bf16.mxu1 %v9812_v38  ;;  %v9876_v37 = vld [vmem:[#allocation5 + $0x1508] ss:$24 sps:$4 sm:$0xff]   ;;  %v11079_v38 = vpack.c.bf16 %v113_v31, %v97_v30  ;;  %v9942_v30 = vld [vmem:[#allocation5 + $0x1718] ss:$24 sps:$4 sm:$0xff]   ;;  %v9947_v31 = vld [vmem:[#allocation5 + $0x1744] ss:$24 sps:$4 sm:$0xff]  }
 0x1f0   :  { %5042 = vmatpush1.bf16.msra.mxu0 %v9807_v39  ;;  %v9881_v39 = vld [vmem:[#allocation5 + $0x1534] ss:$24 sps:$4 sm:$0xff]  }
 0x1f1   :  { %5386 = vmatpush1.bf16.msra.mxu1 %v9810_v40  ;;  %5043 = vmatprep.subr.bf16.mxu0 %v9815_v41  ;;  %v9884_v40 = vld [vmem:[#allocation5 + $0x153c] ss:$24 sps:$4 sm:$0xff]   ;;  %v9879_v41 = vld [vmem:[#allocation5 + $0x1530] ss:$24 sps:$4 sm:$0xff]  }
 0x1f2   :  { %5387 = vmatprep.subr.bf16.mxu1 %v9818_v43  ;;  %v9882_v43 = vld [vmem:[#allocation5 + $0x1538] ss:$24 sps:$4 sm:$0xff]  }
 0x1f4   :  { %5044 = vmatpush1.bf16.msra.mxu0 %v9813_v44  ;;  %v11081_v44 = vpack.c.bf16 %v116_v34, %v100_v32  ;;  %v9950_v32 = vld [vmem:[#allocation5 + $0x174c] ss:$24 sps:$4 sm:$0xff]   ;;  %v9945_v34 = vld [vmem:[#allocation5 + $0x1740] ss:$24 sps:$4 sm:$0xff]  }
 0x1f5   :  { %5388 = vmatpush1.bf16.msra.mxu1 %v9816_v45  ;;  %5045 = vmatprep.subr.bf16.mxu0 %v9821_v46  ;;  %v9887_v45 = vld [vmem:[#allocation5 + $0x1564] ss:$24 sps:$4 sm:$0xff]  }
 0x1f6   :  { %5389 = vmatprep.subr.bf16.mxu1 %v9824_v48  ;;  %v9890_v46 = vld [vmem:[#allocation5 + $0x156c] ss:$24 sps:$4 sm:$0xff]   ;;  %v9885_v48 = vld [vmem:[#allocation5 + $0x1560] ss:$24 sps:$4 sm:$0xff]  }
 0x1f8   :  { %5046 = vmatpush1.bf16.msra.mxu0 %v9819_v49  ;;  %v9888_v49 = vld [vmem:[#allocation5 + $0x1568] ss:$24 sps:$4 sm:$0xff]  }
 0x1f9   :  { %5390 = vmatpush1.bf16.msra.mxu1 %v9822_v51  ;;  %5047 = vmatprep.subr.bf16.mxu0 %v9827_v52  ;;  %v9893_v51 = vld [vmem:[#allocation5 + $0x1594] ss:$24 sps:$4 sm:$0xff]  }
 0x1fa   :  { %5391 = vmatprep.subr.bf16.mxu1 %v9830_v53  ;;  %v9896_v52 = vld [vmem:[#allocation5 + $0x159c] ss:$24 sps:$4 sm:$0xff]   ;;  %v9891_v53 = vld [vmem:[#allocation5 + $0x1590] ss:$24 sps:$4 sm:$0xff]  }
 0x1fc   :  { %5048 = vmatpush1.bf16.msra.mxu0 %v9825_v54  ;;  %v9894_v54 = vld [vmem:[#allocation5 + $0x1598] ss:$24 sps:$4 sm:$0xff]  }
 0x1fd   :  { %5392 = vmatpush1.bf16.msra.mxu1 %v9828_v55  ;;  %5049 = vmatprep.subr.bf16.mxu0 %v9833_v56  ;;  %v9899_v55 = vld [vmem:[#allocation5 + $0x15c4] ss:$24 sps:$4 sm:$0xff]  }
 0x1fe   :  { %5393 = vmatprep.subr.bf16.mxu1 %v9836_v57  ;;  %v9902_v56 = vld [vmem:[#allocation5 + $0x15cc] ss:$24 sps:$4 sm:$0xff]   ;;  %v9897_v57 = vld [vmem:[#allocation5 + $0x15c0] ss:$24 sps:$4 sm:$0xff]  }
 0x200   :  { %5050 = vmatpush1.bf16.msra.mxu0 %v9831_v59  ;;  %v9900_v59 = vld [vmem:[#allocation5 + $0x15c8] ss:$24 sps:$4 sm:$0xff]  }
 0x201   :  { %5394 = vmatpush1.bf16.msra.mxu1 %v9834_v60  ;;  %5051 = vmatprep.subr.bf16.mxu0 %v9839_v61  ;;  %v9905_v60 = vld [vmem:[#allocation5 + $0x15f4] ss:$24 sps:$4 sm:$0xff]  }
 0x202   :  { %5395 = vmatprep.subr.bf16.mxu1 %v9842_v62  ;;  %v9908_v61 = vld [vmem:[#allocation5 + $0x15fc] ss:$24 sps:$4 sm:$0xff]   ;;  %v9903_v62 = vld [vmem:[#allocation5 + $0x15f0] ss:$24 sps:$4 sm:$0xff]  }
 0x204   :  { %5052 = vmatpush1.bf16.msra.mxu0 %v9837_v0  ;;  %v9906_v0 = vld [vmem:[#allocation5 + $0x15f8] ss:$24 sps:$4 sm:$0xff]  }
 0x205   :  { %5396 = vmatpush1.bf16.msra.mxu1 %v9840_v1  ;;  %5053 = vmatprep.subr.bf16.mxu0 %v9845_v2  ;;  %v9911_v1 = vld [vmem:[#allocation5 + $0x1624] ss:$24 sps:$4 sm:$0xff]  }
 0x206   :  { %5397 = vmatprep.subr.bf16.mxu1 %v9848_v3  ;;  %v9914_v2 = vld [vmem:[#allocation5 + $0x162c] ss:$24 sps:$4 sm:$0xff]   ;;  %v9909_v3 = vld [vmem:[#allocation5 + $0x1620] ss:$24 sps:$4 sm:$0xff]  }
 0x208   :  { %5054 = vmatpush1.bf16.msra.mxu0 %v9843_v4  ;;  %v9912_v4 = vld [vmem:[#allocation5 + $0x1628] ss:$24 sps:$4 sm:$0xff]  }
 0x209   :  { %5398 = vmatpush1.bf16.msra.mxu1 %v9846_v5  ;;  %5055 = vmatprep.subr.bf16.mxu0 %v9851_v6  ;;  %v9917_v5 = vld [vmem:[#allocation5 + $0x1654] ss:$24 sps:$4 sm:$0xff]  }
 0x20a   :  { %5399 = vmatprep.subr.bf16.mxu1 %v9854_v7  ;;  %v9920_v6 = vld [vmem:[#allocation5 + $0x165c] ss:$24 sps:$4 sm:$0xff]   ;;  %v9915_v7 = vld [vmem:[#allocation5 + $0x1650] ss:$24 sps:$4 sm:$0xff]  }
 0x20c   :  { %5056 = vmatpush1.bf16.msra.mxu0 %v9849_v8  ;;  %v9918_v8 = vld [vmem:[#allocation5 + $0x1658] ss:$24 sps:$4 sm:$0xff]  }
 0x20d   :  { %5400 = vmatpush1.bf16.msra.mxu1 %v9852_v10  ;;  %5057 = vmatprep.subr.bf16.mxu0 %v9857_v12  ;;  %v9923_v10 = vld [vmem:[#allocation5 + $0x1684] ss:$24 sps:$4 sm:$0xff]  }
 0x20e   :  { %5401 = vmatprep.subr.bf16.mxu1 %v9860_v13  ;;  %v9926_v12 = vld [vmem:[#allocation5 + $0x168c] ss:$24 sps:$4 sm:$0xff]   ;;  %v9921_v13 = vld [vmem:[#allocation5 + $0x1680] ss:$24 sps:$4 sm:$0xff]  }
 0x210   :  { %5058 = vmatpush1.bf16.msra.mxu0 %v9855_v14  ;;  %v9924_v14 = vld [vmem:[#allocation5 + $0x1688] ss:$24 sps:$4 sm:$0xff]  }
 0x211   :  { %5402 = vmatpush1.bf16.msra.mxu1 %v9858_v15  ;;  %5059 = vmatprep.subr.bf16.mxu0 %v9863_v16  ;;  %v9929_v15 = vld [vmem:[#allocation5 + $0x16b4] ss:$24 sps:$4 sm:$0xff]  }
 0x212   :  { %5403 = vmatprep.subr.bf16.mxu1 %v9866_v18  ;;  %v9932_v16 = vld [vmem:[#allocation5 + $0x16bc] ss:$24 sps:$4 sm:$0xff]   ;;  %v9927_v18 = vld [vmem:[#allocation5 + $0x16b0] ss:$24 sps:$4 sm:$0xff]  }
 0x214   :  { %5060 = vmatpush1.bf16.msra.mxu0 %v9861_v19  ;;  %v9930_v19 = vld [vmem:[#allocation5 + $0x16b8] ss:$24 sps:$4 sm:$0xff]  }
 0x215   :  { %5404 = vmatpush1.bf16.msra.mxu1 %v9864_v21  ;;  %5061 = vmatprep.subr.bf16.mxu0 %v9869_v22  ;;  %v9935_v21 = vld [vmem:[#allocation5 + $0x16e4] ss:$24 sps:$4 sm:$0xff]  }
 0x216   :  { %5405 = vmatprep.subr.bf16.mxu1 %v9872_v23  ;;  %v9938_v22 = vld [vmem:[#allocation5 + $0x16ec] ss:$24 sps:$4 sm:$0xff]   ;;  %v9933_v23 = vld [vmem:[#allocation5 + $0x16e0] ss:$24 sps:$4 sm:$0xff]  }
 0x218   :  { %5062 = vmatpush1.bf16.msra.mxu0 %v9867_v25  ;;  %v9936_v25 = vld [vmem:[#allocation5 + $0x16e8] ss:$24 sps:$4 sm:$0xff]  }
 0x219   :  { %5406 = vmatpush1.bf16.msra.mxu1 %v9870_v26  ;;  %5074 = vmatprep.subr.bf16.mxu0 %v9875_v27  ;;  %v9941_v26 = vld [vmem:[#allocation5 + $0x1714] ss:$24 sps:$4 sm:$0xff]  }
 0x21a   :  { %5418 = vmatprep.subr.bf16.mxu1 %v9878_v29  ;;  %v9944_v27 = vld [vmem:[#allocation5 + $0x171c] ss:$24 sps:$4 sm:$0xff]   ;;  %v9939_v29 = vld [vmem:[#allocation5 + $0x1710] ss:$24 sps:$4 sm:$0xff]  }
 0x21b   :  { %5064 = vmatmul.mubr.bf16.vlgmr.msra.gmra.mrb[0].mxu0 %v11079_v38 }
 0x21c   :  { %5408 = vmatmul.mubr.bf16.vlgmr.msra.gmra.mrb[0].mxu1 %v11079_v38  ;;  %5075 = vmatpush1.bf16.msra.mxu0 %v9873_v35  ;;  %v9948_v35 = vld [vmem:[#allocation5 + $0x1748] ss:$24 sps:$4 sm:$0xff]  }
 0x21d   :  { %5419 = vmatpush1.bf16.msra.mxu1 %v9876_v37  ;;  %5076 = vmatprep.subr.bf16.mxu0 %v9881_v39  ;;  %v9953_v37 = vld [vmem:[#allocation5 + $0x1774] ss:$24 sps:$4 sm:$0xff]  }
 0x21e   :  { %5420 = vmatprep.subr.bf16.mxu1 %v9884_v40  ;;  %5106 = vmatprep.mubr.bf16.mxu0 %v11081_v44  ;;  %v9956_v39 = vld [vmem:[#allocation5 + $0x177c] ss:$24 sps:$4 sm:$0xff]   ;;  %v9951_v40 = vld [vmem:[#allocation5 + $0x1770] ss:$24 sps:$4 sm:$0xff]  }
 0x21f   :  { %5450 = vmatprep.mubr.bf16.mxu1 %v11081_v44 }
 0x220   :  { %5077 = vmatpush1.bf16.msra.mxu0 %v9879_v41  ;;  %v9954_v41 = vld [vmem:[#allocation5 + $0x1778] ss:$24 sps:$4 sm:$0xff]  }
 0x221   :  { %5421 = vmatpush1.bf16.msra.mxu1 %v9882_v43  ;;  %5078 = vmatprep.subr.bf16.mxu0 %v9887_v45  ;;  %v9959_v43 = vld [vmem:[#allocation5 + $0x17a4] ss:$24 sps:$4 sm:$0xff]  }
 0x222   :  { %5422 = vmatprep.subr.bf16.mxu1 %v9890_v46  ;;  %v9962_v45 = vld [vmem:[#allocation5 + $0x17ac] ss:$24 sps:$4 sm:$0xff]   ;;  %v9957_v46 = vld [vmem:[#allocation5 + $0x17a0] ss:$24 sps:$4 sm:$0xff]  }
 0x224   :  { %5079 = vmatpush1.bf16.msra.mxu0 %v9885_v48  ;;  %v9960_v48 = vld [vmem:[#allocation5 + $0x17a8] ss:$24 sps:$4 sm:$0xff]  }
 0x225   :  { %5423 = vmatpush1.bf16.msra.mxu1 %v9888_v49  ;;  %5080 = vmatprep.subr.bf16.mxu0 %v9893_v51  ;;  %v9965_v49 = vld [vmem:[#allocation5 + $0x17d4] ss:$24 sps:$4 sm:$0xff]  }
 0x226   :  { %5424 = vmatprep.subr.bf16.mxu1 %v9896_v52  ;;  %v9968_v51 = vld [vmem:[#allocation5 + $0x17dc] ss:$24 sps:$4 sm:$0xff]   ;;  %v9963_v52 = vld [vmem:[#allocation5 + $0x17d0] ss:$24 sps:$4 sm:$0xff]  }
 0x228   :  { %5081 = vmatpush1.bf16.msra.mxu0 %v9891_v53  ;;  %v9966_v53 = vld [vmem:[#allocation5 + $0x17d8] ss:$24 sps:$4 sm:$0xff]  }
 0x229   :  { %5425 = vmatpush1.bf16.msra.mxu1 %v9894_v54  ;;  %5082 = vmatprep.subr.bf16.mxu0 %v9899_v55  ;;  %v99_v54 = vld [vmem:[#allocation2 + $0x70] sm:$0xff] }
 0x22a   :  { %5426 = vmatprep.subr.bf16.mxu1 %v9902_v56  ;;  %v115_v55 = vld [vmem:[#allocation2 + $0xf0] sm:$0xff] }
 0x22b   :  { %v9971_v56 = vld [vmem:[#allocation5 + $0x14] ss:$24 sps:$4 sm:$0xff]  }
 0x22c   :  { %5083 = vmatpush1.bf16.msra.mxu0 %v9897_v57  ;;  %v11087_v57 = vpack.c.bf16 %v115_v55, %v99_v54  ;;  %v10014_v54 = vld [vmem:[#allocation5 + $0x2e0] ss:$24 sps:$4 sm:$0xff]   ;;  %v10019_v55 = vld [vmem:[#allocation5 + $0x314] ss:$24 sps:$4 sm:$0xff]  }
 0x22d   :  { %5427 = vmatpush1.bf16.msra.mxu1 %v9900_v59  ;;  %5084 = vmatprep.subr.bf16.mxu0 %v9905_v60  ;;  %v9969_v59 = vld [vmem:[#allocation5 + $0x10] ss:$24 sps:$4 sm:$0xff]   ;;  %v9974_v60 = vld [vmem:[#allocation5 + $0x44] ss:$24 sps:$4 sm:$0xff]  }
 0x22e   :  { %5428 = vmatprep.subr.bf16.mxu1 %v9908_v61  ;;  %v9972_v61 = vld [vmem:[#allocation5 + $0x40] ss:$24 sps:$4 sm:$0xff]  }
 0x230   :  { %5085 = vmatpush1.bf16.msra.mxu0 %v9903_v62  ;;  %v9977_v62 = vld [vmem:[#allocation5 + $0x74] ss:$24 sps:$4 sm:$0xff]  }
 0x231   :  { %5429 = vmatpush1.bf16.msra.mxu1 %v9906_v0  ;;  %5086 = vmatprep.subr.bf16.mxu0 %v9911_v1  ;;  %v9975_v0 = vld [vmem:[#allocation5 + $0x70] ss:$24 sps:$4 sm:$0xff]   ;;  %v9980_v1 = vld [vmem:[#allocation5 + $0xa4] ss:$24 sps:$4 sm:$0xff]  }
 0x232   :  { %5430 = vmatprep.subr.bf16.mxu1 %v9914_v2  ;;  %v9978_v2 = vld [vmem:[#allocation5 + $0xa0] ss:$24 sps:$4 sm:$0xff]  }
 0x234   :  { %5087 = vmatpush1.bf16.msra.mxu0 %v9909_v3  ;;  %v9983_v3 = vld [vmem:[#allocation5 + $0xd4] ss:$24 sps:$4 sm:$0xff]  }
 0x235   :  { %5431 = vmatpush1.bf16.msra.mxu1 %v9912_v4  ;;  %5088 = vmatprep.subr.bf16.mxu0 %v9917_v5  ;;  %v9981_v4 = vld [vmem:[#allocation5 + $0xd0] ss:$24 sps:$4 sm:$0xff]   ;;  %v9986_v5 = vld [vmem:[#allocation5 + $0x104] ss:$24 sps:$4 sm:$0xff]  }
 0x236   :  { %5432 = vmatprep.subr.bf16.mxu1 %v9920_v6  ;;  %v9984_v6 = vld [vmem:[#allocation5 + $0x100] ss:$24 sps:$4 sm:$0xff]  }
 0x238   :  { %5089 = vmatpush1.bf16.msra.mxu0 %v9915_v7  ;;  %v9989_v7 = vld [vmem:[#allocation5 + $0x134] ss:$24 sps:$4 sm:$0xff]  }
 0x239   :  { %5433 = vmatpush1.bf16.msra.mxu1 %v9918_v8  ;;  %5090 = vmatprep.subr.bf16.mxu0 %v9923_v10  ;;  %v9987_v8 = vld [vmem:[#allocation5 + $0x130] ss:$24 sps:$4 sm:$0xff]   ;;  %v9990_v10 = vld [vmem:[#allocation5 + $0x160] ss:$24 sps:$4 sm:$0xff]  }
 0x23a   :  { %5434 = vmatprep.subr.bf16.mxu1 %v9926_v12  ;;  %v9995_v12 = vld [vmem:[#allocation5 + $0x194] ss:$24 sps:$4 sm:$0xff]  }
 0x23c   :  { %5091 = vmatpush1.bf16.msra.mxu0 %v9921_v13  ;;  %v10091_v13 = vld [vmem:[#allocation8 + $0x4] ss:$24 sps:$4 sm:$0xff]  }
 0x23d   :  { %5435 = vmatpush1.bf16.msra.mxu1 %v9924_v14  ;;  %5092 = vmatprep.subr.bf16.mxu0 %v9929_v15  ;;  %v10089_v14 = vld [vmem:[#allocation8] ss:$24 sps:$4 sm:$0xff]  }
 0x23e   :  { %5436 = vmatprep.subr.bf16.mxu1 %v9932_v16  ;;  %v9993_v15 = vld [vmem:[#allocation5 + $0x190] ss:$24 sps:$4 sm:$0xff]   ;;  %v9998_v16 = vld [vmem:[#allocation5 + $0x1c4] ss:$24 sps:$4 sm:$0xff]  }
 0x240   :  { %5093 = vmatpush1.bf16.msra.mxu0 %v9927_v18  ;;  %v10097_v18 = vld [vmem:[#allocation8 + $0x34] ss:$24 sps:$4 sm:$0xff]  }
 0x241   :  { %5437 = vmatpush1.bf16.msra.mxu1 %v9930_v19  ;;  %5094 = vmatprep.subr.bf16.mxu0 %v9935_v21  ;;  %v10095_v19 = vld [vmem:[#allocation8 + $0x30] ss:$24 sps:$4 sm:$0xff]  }
 0x242   :  { %5438 = vmatprep.subr.bf16.mxu1 %v9938_v22  ;;  %v9996_v21 = vld [vmem:[#allocation5 + $0x1c0] ss:$24 sps:$4 sm:$0xff]   ;;  %v10001_v22 = vld [vmem:[#allocation5 + $0x1f4] ss:$24 sps:$4 sm:$0xff]  }
 0x244   :  { %5095 = vmatpush1.bf16.msra.mxu0 %v9933_v23  ;;  %v10103_v23 = vld [vmem:[#allocation8 + $0x64] ss:$24 sps:$4 sm:$0xff]  }
 0x245   :  { %5439 = vmatpush1.bf16.msra.mxu1 %v9936_v25  ;;  %5096 = vmatprep.subr.bf16.mxu0 %v9941_v26  ;;  %v10101_v25 = vld [vmem:[#allocation8 + $0x60] ss:$24 sps:$4 sm:$0xff]  }
 0x246   :  { %5440 = vmatprep.subr.bf16.mxu1 %v9944_v27  ;;  %v9999_v26 = vld [vmem:[#allocation5 + $0x1f0] ss:$24 sps:$4 sm:$0xff]   ;;  %v10004_v27 = vld [vmem:[#allocation5 + $0x224] ss:$24 sps:$4 sm:$0xff]  }
 0x248   :  { %5097 = vmatpush1.bf16.msra.mxu0 %v9939_v29  ;;  %v10109_v29 = vld [vmem:[#allocation8 + $0x94] ss:$24 sps:$4 sm:$0xff]  }
 0x249   :  { %5441 = vmatpush1.bf16.msra.mxu1 %v9942_v30  ;;  %5098 = vmatprep.subr.bf16.mxu0 %v9947_v31  ;;  %v10107_v30 = vld [vmem:[#allocation8 + $0x90] ss:$24 sps:$4 sm:$0xff]  }
 0x24a   :  { %5442 = vmatprep.subr.bf16.mxu1 %v9950_v32  ;;  %v10002_v31 = vld [vmem:[#allocation5 + $0x220] ss:$24 sps:$4 sm:$0xff]   ;;  %v10007_v32 = vld [vmem:[#allocation5 + $0x254] ss:$24 sps:$4 sm:$0xff]  }
 0x24c   :  { %5099 = vmatpush1.bf16.msra.mxu0 %v9945_v34  ;;  %v10115_v34 = vld [vmem:[#allocation8 + $0xc4] ss:$24 sps:$4 sm:$0xff]  }
 0x24d   :  { %5443 = vmatpush1.bf16.msra.mxu1 %v9948_v35  ;;  %5100 = vmatprep.subr.bf16.mxu0 %v9953_v37  ;;  %v10113_v35 = vld [vmem:[#allocation8 + $0xc0] ss:$24 sps:$4 sm:$0xff]  }
 0x24e   :  { %5444 = vmatprep.subr.bf16.mxu1 %v9956_v39  ;;  %v10005_v37 = vld [vmem:[#allocation5 + $0x250] ss:$24 sps:$4 sm:$0xff]   ;;  %v10010_v39 = vld [vmem:[#allocation5 + $0x284] ss:$24 sps:$4 sm:$0xff]  }
 0x250   :  { %5101 = vmatpush1.bf16.msra.mxu0 %v9951_v40  ;;  %v10121_v40 = vld [vmem:[#allocation8 + $0xf4] ss:$24 sps:$4 sm:$0xff]  }
 0x251   :  { %5445 = vmatpush1.bf16.msra.mxu1 %v9954_v41  ;;  %5102 = vmatprep.subr.bf16.mxu0 %v9959_v43  ;;  %v10119_v41 = vld [vmem:[#allocation8 + $0xf0] ss:$24 sps:$4 sm:$0xff]  }
 0x252   :  { %5446 = vmatprep.subr.bf16.mxu1 %v9962_v45  ;;  %v10008_v43 = vld [vmem:[#allocation5 + $0x280] ss:$24 sps:$4 sm:$0xff]   ;;  %v10013_v45 = vld [vmem:[#allocation5 + $0x2b4] ss:$24 sps:$4 sm:$0xff]  }
 0x254   :  { %5103 = vmatpush1.bf16.msra.mxu0 %v9957_v46  ;;  %v10127_v46 = vld [vmem:[#allocation8 + $0x124] ss:$24 sps:$4 sm:$0xff]  }
 0x255   :  { %5447 = vmatpush1.bf16.msra.mxu1 %v9960_v48  ;;  %5104 = vmatprep.subr.bf16.mxu0 %v9965_v49  ;;  %v10125_v48 = vld [vmem:[#allocation8 + $0x120] ss:$24 sps:$4 sm:$0xff]  }
 0x256   :  { %5448 = vmatprep.subr.bf16.mxu1 %v9968_v51  ;;  %v10011_v49 = vld [vmem:[#allocation5 + $0x2b0] ss:$24 sps:$4 sm:$0xff]   ;;  %v10016_v51 = vld [vmem:[#allocation5 + $0x2e4] ss:$24 sps:$4 sm:$0xff]  }
 0x258   :  { %5105 = vmatpush1.bf16.msra.mxu0 %v9963_v52  ;;  %v10133_v52 = vld [vmem:[#allocation8 + $0x154] ss:$24 sps:$4 sm:$0xff]  }
 0x259   :  { %5449 = vmatpush1.bf16.msra.mxu1 %v9966_v53  ;;  %5461 = vmatprep.subr.bf16.mxu0 %v9971_v56  ;;  %v10131_v53 = vld [vmem:[#allocation8 + $0x150] ss:$24 sps:$4 sm:$0xff]   ;;  %v10139_v56 = vld [vmem:[#allocation8 + $0x184] ss:$24 sps:$4 sm:$0xff]  }
 0x25a   :  { %7583 = vmatprep.subr.bf16.mxu1 %v10091_v13  ;;  %v10034_v13 = vld [vmem:[#allocation5 + $0x404] ss:$24 sps:$4 sm:$0xff]  }
 0x25b   :  { %5107 = vmatmul.mubr.bf16.vlgmr.msra.gmra.mrb[0].mxu0 %v11087_v57 }
 0x25c   :  { %5451 = vmatmul.mubr.bf16.vlgmr.msra.gmra.mrb[0].mxu1 %v11087_v57  ;;  %5462 = vmatpush1.bf16.msra.mxu0 %v9969_v59  ;;  %v10137_v59 = vld [vmem:[#allocation8 + $0x180] ss:$24 sps:$4 sm:$0xff]  }
 0x25d   :  { %5493 = vmatprep.mubr.bf16.mxu0 %v11027_v50  ;;  %5463 = vmatprep.subr.bf16.mxu0 %v9974_v60  ;;  %v9992_v50 = vld [vmem:[#allocation5 + $0x164] ss:$24 sps:$4 sm:$0xff]   ;;  %v10017_v60 = vld [vmem:[#allocation5 + $0x310] ss:$24 sps:$4 sm:$0xff]  }
 0x25e   :  { %7584 = vmatpush1.bf16.msra.mxu1 %v10089_v14  ;;  %v10169_v14 = vld [vmem:[#allocation8 + $0x274] ss:$24 sps:$4 sm:$0xff]  }
 0x25f   :  { %7585 = vmatprep.subr.bf16.mxu1 %v10097_v18  ;;  %v10037_v18 = vld [vmem:[#allocation5 + $0x434] ss:$24 sps:$4 sm:$0xff]  }
 0x260   :  { %5464 = vmatpush1.bf16.msra.mxu0 %v9972_v61  ;;  %v10022_v61 = vld [vmem:[#allocation5 + $0x344] ss:$24 sps:$4 sm:$0xff]  }
 0x261   :  { %5465 = vmatprep.subr.bf16.mxu0 %v9977_v62  ;;  %v10145_v62 = vld [vmem:[#allocation8 + $0x1b4] ss:$24 sps:$4 sm:$0xff]  }
 0x262   :  { %7586 = vmatpush1.bf16.msra.mxu1 %v10095_v19  ;;  %v10175_v19 = vld [vmem:[#allocation8 + $0x2a4] ss:$24 sps:$4 sm:$0xff]  }
 0x263   :  { %7587 = vmatprep.subr.bf16.mxu1 %v10103_v23  ;;  %v10040_v23 = vld [vmem:[#allocation5 + $0x464] ss:$24 sps:$4 sm:$0xff]  }
 0x264   :  { %5466 = vmatpush1.bf16.msra.mxu0 %v9975_v0  ;;  %v10143_v0 = vld [vmem:[#allocation8 + $0x1b0] ss:$24 sps:$4 sm:$0xff]  }
 0x265   :  { %5467 = vmatprep.subr.bf16.mxu0 %v9980_v1  ;;  %v10020_v1 = vld [vmem:[#allocation5 + $0x340] ss:$24 sps:$4 sm:$0xff]  }
 0x266   :  { %7588 = vmatpush1.bf16.msra.mxu1 %v10101_v25  ;;  %v10181_v25 = vld [vmem:[#allocation8 + $0x2d4] ss:$24 sps:$4 sm:$0xff]  }
 0x267   :  { %7589 = vmatprep.subr.bf16.mxu1 %v10109_v29  ;;  %v10043_v29 = vld [vmem:[#allocation5 + $0x494] ss:$24 sps:$4 sm:$0xff]  }
 0x268   :  { %5468 = vmatpush1.bf16.msra.mxu0 %v9978_v2  ;;  %v10025_v2 = vld [vmem:[#allocation5 + $0x374] ss:$24 sps:$4 sm:$0xff]  }
 0x269   :  { %5469 = vmatprep.subr.bf16.mxu0 %v9983_v3  ;;  %v10151_v3 = vld [vmem:[#allocation8 + $0x1e4] ss:$24 sps:$4 sm:$0xff]  }
 0x26a   :  { %7590 = vmatpush1.bf16.msra.mxu1 %v10107_v30  ;;  %v10187_v30 = vld [vmem:[#allocation8 + $0x304] ss:$24 sps:$4 sm:$0xff]  }
 0x26b   :  { %7591 = vmatprep.subr.bf16.mxu1 %v10115_v34  ;;  %v10044_v34 = vld [vmem:[#allocation5 + $0x4c0] ss:$24 sps:$4 sm:$0xff]  }
 0x26c   :  { %5470 = vmatpush1.bf16.msra.mxu0 %v9981_v4  ;;  %v10149_v4 = vld [vmem:[#allocation8 + $0x1e0] ss:$24 sps:$4 sm:$0xff]  }
 0x26d   :  { %5471 = vmatprep.subr.bf16.mxu0 %v9986_v5  ;;  %v10023_v5 = vld [vmem:[#allocation5 + $0x370] ss:$24 sps:$4 sm:$0xff]  }
 0x26e   :  { %7592 = vmatpush1.bf16.msra.mxu1 %v10113_v35  ;;  %v10049_v35 = vld [vmem:[#allocation5 + $0x4f4] ss:$24 sps:$4 sm:$0xff]  }
 0x26f   :  { %7593 = vmatprep.subr.bf16.mxu1 %v10121_v40  ;;  %v10050_v40 = vld [vmem:[#allocation5 + $0x520] ss:$24 sps:$4 sm:$0xff]  }
 0x270   :  { %5472 = vmatpush1.bf16.msra.mxu0 %v9984_v6  ;;  %v10028_v6 = vld [vmem:[#allocation5 + $0x3a4] ss:$24 sps:$4 sm:$0xff]  }
 0x271   :  { %5473 = vmatprep.subr.bf16.mxu0 %v9989_v7  ;;  %v10157_v7 = vld [vmem:[#allocation8 + $0x214] ss:$24 sps:$4 sm:$0xff]  }
 0x272   :  { %7594 = vmatpush1.bf16.msra.mxu1 %v10119_v41  ;;  %v10055_v41 = vld [vmem:[#allocation5 + $0x554] ss:$24 sps:$4 sm:$0xff]  }
 0x273   :  { %7595 = vmatprep.subr.bf16.mxu1 %v10127_v46  ;;  %v10056_v46 = vld [vmem:[#allocation5 + $0x580] ss:$24 sps:$4 sm:$0xff]  }
 0x274   :  { %5474 = vmatpush1.bf16.msra.mxu0 %v9987_v8  ;;  %v10155_v8 = vld [vmem:[#allocation8 + $0x210] ss:$24 sps:$4 sm:$0xff]  }
 0x275   :  { %5475 = vmatprep.subr.bf16.mxu0 %v9992_v50  ;;  %v10031_v50 = vld [vmem:[#allocation5 + $0x3d4] ss:$24 sps:$4 sm:$0xff]  }
 0x276   :  { %7596 = vmatpush1.bf16.msra.mxu1 %v10125_v48  ;;  %v10061_v48 = vld [vmem:[#allocation5 + $0x5b4] ss:$24 sps:$4 sm:$0xff]  }
 0x277   :  { %7597 = vmatprep.subr.bf16.mxu1 %v10133_v52  ;;  %v10062_v52 = vld [vmem:[#allocation5 + $0x5e0] ss:$24 sps:$4 sm:$0xff]  }
 0x278   :  { %5476 = vmatpush1.bf16.msra.mxu0 %v9990_v10  ;;  %v10161_v10 = vld [vmem:[#allocation8 + $0x240] ss:$24 sps:$4 sm:$0xff]  }
 0x279   :  { %5477 = vmatprep.subr.bf16.mxu0 %v9995_v12  ;;  %v10029_v12 = vld [vmem:[#allocation5 + $0x3d0] ss:$24 sps:$4 sm:$0xff]  }
 0x27a   :  { %7598 = vmatpush1.bf16.msra.mxu1 %v10131_v53  ;;  %v10067_v53 = vld [vmem:[#allocation5 + $0x614] ss:$24 sps:$4 sm:$0xff]  }
 0x27b   :  { %7599 = vmatprep.subr.bf16.mxu1 %v10139_v56  ;;  %v10068_v56 = vld [vmem:[#allocation5 + $0x640] ss:$24 sps:$4 sm:$0xff]  }
 0x27c   :  { %5478 = vmatpush1.bf16.msra.mxu0 %v9993_v15  ;;  %v10167_v15 = vld [vmem:[#allocation8 + $0x270] ss:$24 sps:$4 sm:$0xff]  }
 0x27d   :  { %5479 = vmatprep.subr.bf16.mxu0 %v9998_v16  ;;  %v10032_v16 = vld [vmem:[#allocation5 + $0x400] ss:$24 sps:$4 sm:$0xff]  }
 0x27e   :  { %7600 = vmatpush1.bf16.msra.mxu1 %v10137_v59  ;;  %v10073_v59 = vld [vmem:[#allocation5 + $0x674] ss:$24 sps:$4 sm:$0xff]  }
 0x27f   :  { %7601 = vmatprep.subr.bf16.mxu1 %v10145_v62  ;;  %v10074_v62 = vld [vmem:[#allocation5 + $0x6a0] ss:$24 sps:$4 sm:$0xff]  }
 0x280   :  { %5480 = vmatpush1.bf16.msra.mxu0 %v9996_v21  ;;  %v10173_v21 = vld [vmem:[#allocation8 + $0x2a0] ss:$24 sps:$4 sm:$0xff]  }
 0x281   :  { %5481 = vmatprep.subr.bf16.mxu0 %v10001_v22  ;;  %v10035_v22 = vld [vmem:[#allocation5 + $0x430] ss:$24 sps:$4 sm:$0xff]  }
 0x282   :  { %7602 = vmatpush1.bf16.msra.mxu1 %v10143_v0  ;;  %v10079_v0 = vld [vmem:[#allocation5 + $0x6d4] ss:$24 sps:$4 sm:$0xff]  }
 0x283   :  { %7603 = vmatprep.subr.bf16.mxu1 %v10151_v3  ;;  %v10085_v3 = vld [vmem:[#allocation5 + $0x734] ss:$24 sps:$4 sm:$0xff]  }
 0x284   :  { %5482 = vmatpush1.bf16.msra.mxu0 %v9999_v26  ;;  %v10179_v26 = vld [vmem:[#allocation8 + $0x2d0] ss:$24 sps:$4 sm:$0xff]  }
 0x285   :  { %5483 = vmatprep.subr.bf16.mxu0 %v10004_v27  ;;  %v10038_v27 = vld [vmem:[#allocation5 + $0x460] ss:$24 sps:$4 sm:$0xff]  }
 0x286   :  { %7604 = vmatpush1.bf16.msra.mxu1 %v10149_v4  ;;  %v10088_v4 = vld [vmem:[#allocation5 + $0x764] ss:$24 sps:$4 sm:$0xff]  }
 0x287   :  { %7605 = vmatprep.subr.bf16.mxu1 %v10157_v7  ;;  %v10092_v7 = vld [vmem:[#allocation5 + $0x790] ss:$24 sps:$4 sm:$0xff]  }
 0x288   :  { %5484 = vmatpush1.bf16.msra.mxu0 %v10002_v31  ;;  %v10041_v31 = vld [vmem:[#allocation5 + $0x490] ss:$24 sps:$4 sm:$0xff]  }
 0x289   :  { %5485 = vmatprep.subr.bf16.mxu0 %v10007_v32  ;;  %v10046_v32 = vld [vmem:[#allocation5 + $0x4c4] ss:$24 sps:$4 sm:$0xff]  }
 0x28a   :  { %7606 = vmatpush1.bf16.msra.mxu1 %v10155_v8  ;;  %v10100_v8 = vld [vmem:[#allocation5 + $0x7c4] ss:$24 sps:$4 sm:$0xff]  }
 0x28c   :  { %5486 = vmatpush1.bf16.msra.mxu0 %v10005_v37  ;;  %v10047_v37 = vld [vmem:[#allocation5 + $0x4f0] ss:$24 sps:$4 sm:$0xff]  }
 0x28d   :  { %5487 = vmatprep.subr.bf16.mxu0 %v10010_v39  ;;  %v10052_v39 = vld [vmem:[#allocation5 + $0x524] ss:$24 sps:$4 sm:$0xff]  }
 0x290   :  { %5488 = vmatpush1.bf16.msra.mxu0 %v10008_v43  ;;  %v10053_v43 = vld [vmem:[#allocation5 + $0x550] ss:$24 sps:$4 sm:$0xff]  }
 0x291   :  { %5489 = vmatprep.subr.bf16.mxu0 %v10013_v45  ;;  %v10058_v45 = vld [vmem:[#allocation5 + $0x584] ss:$24 sps:$4 sm:$0xff]  }
 0x294   :  { %5490 = vmatpush1.bf16.msra.mxu0 %v10011_v49  ;;  %v10059_v49 = vld [vmem:[#allocation5 + $0x5b0] ss:$24 sps:$4 sm:$0xff]  }
 0x295   :  { %5491 = vmatprep.subr.bf16.mxu0 %v10016_v51  ;;  %v10064_v51 = vld [vmem:[#allocation5 + $0x5e4] ss:$24 sps:$4 sm:$0xff]  }
 0x298   :  { %5492 = vmatpush1.bf16.msra.mxu0 %v10014_v54  ;;  %v10065_v54 = vld [vmem:[#allocation5 + $0x610] ss:$24 sps:$4 sm:$0xff]  }
 0x299   :  { %5504 = vmatprep.subr.bf16.mxu0 %v10019_v55  ;;  %v10070_v55 = vld [vmem:[#allocation5 + $0x644] ss:$24 sps:$4 sm:$0xff]  }
 0x29b   :  { %5494 = vmatmul.mubr.bf16.vlgmr.msra.gmra.mrb[4].mxu0 %v11031_v9  ;;  %v10026_v9 = vld [vmem:[#allocation5 + $0x3a0] ss:$24 sps:$4 sm:$0xff]  }
 0x29c   :  { %5505 = vmatpush1.bf16.msra.mxu0 %v10017_v60  ;;  %5536 = vmatprep.mubr.bf16.mxu0 %v11035_v36  ;;  %v10163_v36 = vld [vmem:[#allocation8 + $0x244] ss:$24 sps:$4 sm:$0xff]  }
 0x29d   :  { %5506 = vmatprep.subr.bf16.mxu0 %v10022_v61  ;;  %7607 = vmatprep.subr.bf16.mxu1 %v10163_v36  ;;  %v10071_v60 = vld [vmem:[#allocation5 + $0x670] ss:$24 sps:$4 sm:$0xff]   ;;  %v10076_v61 = vld [vmem:[#allocation5 + $0x6a4] ss:$24 sps:$4 sm:$0xff]  }
 0x29e   :  { %7608 = vmatpush1.bf16.msra.mxu1 %v10161_v10  ;;  %v10104_v36 = vld [vmem:[#allocation5 + $0x7f0] ss:$24 sps:$4 sm:$0xff]   ;;  %v10112_v10 = vld [vmem:[#allocation5 + $0x824] ss:$24 sps:$4 sm:$0xff]  }
 0x29f   :  { %7609 = vmatprep.subr.bf16.mxu1 %v10169_v14  ;;  %v10116_v14 = vld [vmem:[#allocation5 + $0x850] ss:$24 sps:$4 sm:$0xff]  }
 0x2a0   :  { %5507 = vmatpush1.bf16.msra.mxu0 %v10020_v1  ;;  %v10077_v1 = vld [vmem:[#allocation5 + $0x6d0] ss:$24 sps:$4 sm:$0xff]  }
 0x2a1   :  { %5508 = vmatprep.subr.bf16.mxu0 %v10025_v2  ;;  %v10082_v2 = vld [vmem:[#allocation5 + $0x704] ss:$24 sps:$4 sm:$0xff]  }
 0x2a2   :  { %7610 = vmatpush1.bf16.msra.mxu1 %v10167_v15  ;;  %v10124_v15 = vld [vmem:[#allocation5 + $0x884] ss:$24 sps:$4 sm:$0xff]  }
 0x2a3   :  { %7611 = vmatprep.subr.bf16.mxu1 %v10175_v19  ;;  %v10128_v19 = vld [vmem:[#allocation5 + $0x8b0] ss:$24 sps:$4 sm:$0xff]  }
 0x2a4   :  { %5509 = vmatpush1.bf16.msra.mxu0 %v10023_v5  ;;  %v10086_v5 = vld [vmem:[#allocation5 + $0x760] ss:$24 sps:$4 sm:$0xff]  }
 0x2a5   :  { %5510 = vmatprep.subr.bf16.mxu0 %v10028_v6  ;;  %v10094_v6 = vld [vmem:[#allocation5 + $0x794] ss:$24 sps:$4 sm:$0xff]  }
 0x2a6   :  { %7612 = vmatpush1.bf16.msra.mxu1 %v10173_v21  ;;  %v10136_v21 = vld [vmem:[#allocation5 + $0x8e4] ss:$24 sps:$4 sm:$0xff]  }
 0x2a7   :  { %7613 = vmatprep.subr.bf16.mxu1 %v10181_v25  ;;  %v10140_v25 = vld [vmem:[#allocation5 + $0x910] ss:$24 sps:$4 sm:$0xff]  }
 0x2a8   :  { %5511 = vmatpush1.bf16.msra.mxu0 %v10026_v9  ;;  %v10098_v9 = vld [vmem:[#allocation5 + $0x7c0] ss:$24 sps:$4 sm:$0xff]  }
 0x2a9   :  { %5512 = vmatprep.subr.bf16.mxu0 %v10031_v50  ;;  %v10106_v50 = vld [vmem:[#allocation5 + $0x7f4] ss:$24 sps:$4 sm:$0xff]  }
 0x2aa   :  { %7614 = vmatpush1.bf16.msra.mxu1 %v10179_v26  ;;  %v10148_v26 = vld [vmem:[#allocation5 + $0x944] ss:$24 sps:$4 sm:$0xff]  }
 0x2ab   :  { %7626 = vmatprep.subr.bf16.mxu1 %v10187_v30  ;;  %v903_v30 = vlaneseq }
 0x2ac   :  { %5513 = vmatpush1.bf16.msra.mxu0 %v10029_v12  ;;  %v10110_v12 = vld [vmem:[#allocation5 + $0x820] ss:$24 sps:$4 sm:$0xff]  }
 0x2ad   :  { %5514 = vmatprep.subr.bf16.mxu0 %v10034_v13  ;;  %v10118_v13 = vld [vmem:[#allocation5 + $0x854] ss:$24 sps:$4 sm:$0xff]  }
 0x2b0   :  { %5515 = vmatpush1.bf16.msra.mxu0 %v10032_v16  ;;  %v10122_v16 = vld [vmem:[#allocation5 + $0x880] ss:$24 sps:$4 sm:$0xff]  }
 0x2b1   :  { %5516 = vmatprep.subr.bf16.mxu0 %v10037_v18  ;;  %v10130_v18 = vld [vmem:[#allocation5 + $0x8b4] ss:$24 sps:$4 sm:$0xff]  }
 0x2b4   :  { %5517 = vmatpush1.bf16.msra.mxu0 %v10035_v22  ;;  %v10134_v22 = vld [vmem:[#allocation5 + $0x8e0] ss:$24 sps:$4 sm:$0xff]  }
 0x2b5   :  { %5518 = vmatprep.subr.bf16.mxu0 %v10040_v23  ;;  %v10142_v23 = vld [vmem:[#allocation5 + $0x914] ss:$24 sps:$4 sm:$0xff]  }
 0x2b8   :  { %5519 = vmatpush1.bf16.msra.mxu0 %v10038_v27  ;;  %v10146_v27 = vld [vmem:[#allocation5 + $0x940] ss:$24 sps:$4 sm:$0xff]  }
 0x2b9   :  { %5520 = vmatprep.subr.bf16.mxu0 %v10043_v29  ;;  %v10154_v29 = vld [vmem:[#allocation5 + $0x974] ss:$24 sps:$4 sm:$0xff]  }
 0x2bc   :  { %5521 = vmatpush1.bf16.msra.mxu0 %v10041_v31  ;;  %v10152_v31 = vld [vmem:[#allocation5 + $0x970] ss:$24 sps:$4 sm:$0xff]  }
 0x2bd   :  { %5522 = vmatprep.subr.bf16.mxu0 %v10046_v32  ;;  %v10160_v32 = vld [vmem:[#allocation5 + $0x9a4] ss:$24 sps:$4 sm:$0xff]  }
 0x2c0   :  { %5523 = vmatpush1.bf16.msra.mxu0 %v10044_v34  ;;  %v11098_v34 = vshrl.u32 %v903_v30, 7  ;;  %v10191_v30 = vld [vmem:[#allocation8 + $0x330] ss:$24 sps:$4 sm:$0xff]  }
 0x2c1   :  { %5524 = vmatprep.subr.bf16.mxu0 %v10049_v35  ;;  %v10158_v35 = vld [vmem:[#allocation5 + $0x9a0] ss:$24 sps:$4 sm:$0xff]  }
 0x2c4   :  { %5525 = vmatpush1.bf16.msra.mxu0 %v10047_v37  ;;  %v10166_v37 = vld [vmem:[#allocation5 + $0x9d4] ss:$24 sps:$4 sm:$0xff]  }
 0x2c5   :  { %5526 = vmatprep.subr.bf16.mxu0 %v10052_v39  ;;  %v905_v39 = vsub.s32 0, %v11098_v34 }
 0x2c8   :  { %5527 = vmatpush1.bf16.msra.mxu0 %v10050_v40  ;;  %v10164_v40 = vld [vmem:[#allocation5 + $0x9d0] ss:$24 sps:$4 sm:$0xff]  }
 0x2c9   :  { %5528 = vmatprep.subr.bf16.mxu0 %v10055_v41  ;;  %v909_v41 = vsub.s32 1, %v11098_v34 }
 0x2cc   :  { %5529 = vmatpush1.bf16.msra.mxu0 %v10053_v43  ;;  %v917_v43 = vsub.s32 3, %v11098_v34 }
 0x2cd   :  { %5530 = vmatprep.subr.bf16.mxu0 %v10058_v45  ;;  %v10172_v45 = vld [vmem:[#allocation5 + $0xa04] ss:$24 sps:$4 sm:$0xff]  }
 0x2d0   :  { %5531 = vmatpush1.bf16.msra.mxu0 %v10056_v46 }
 0x2d1   :  { %5532 = vmatprep.subr.bf16.mxu0 %v10061_v48 }
 0x2d4   :  { %5533 = vmatpush1.bf16.msra.mxu0 %v10059_v49 }
 0x2d5   :  { %5534 = vmatprep.subr.bf16.mxu0 %v10064_v51 }
 0x2d8   :  { %5535 = vmatpush1.bf16.msra.mxu0 %v10062_v52  ;;  %v10170_v52 = vld [vmem:[#allocation5 + $0xa00] ss:$24 sps:$4 sm:$0xff]  }
 0x2d9   :  { %5547 = vmatprep.subr.bf16.mxu0 %v10067_v53  ;;  %v10178_v53 = vld [vmem:[#allocation5 + $0xa34] ss:$24 sps:$4 sm:$0xff]  }
 0x2db   :  { %5537 = vmatmul.mubr.bf16.vlgmr.msra.gmra.mrb[4].mxu0 %v11039_v17  ;;  %v10080_v17 = vld [vmem:[#allocation5 + $0x700] ss:$24 sps:$4 sm:$0xff]  }
 0x2dc   :  { %5548 = vmatpush1.bf16.msra.mxu0 %v10065_v54  ;;  %5579 = vmatprep.mubr.bf16.mxu0 %v11043_v24  ;;  %v10083_v24 = vld [vmem:[#allocation5 + $0x730] ss:$24 sps:$4 sm:$0xff]  }
 0x2dd   :  { %5549 = vmatprep.subr.bf16.mxu0 %v10070_v55 }
 0x2e0   :  { %5550 = vmatpush1.bf16.msra.mxu0 %v10068_v56 }
 0x2e1   :  { %5551 = vmatprep.subr.bf16.mxu0 %v10073_v59 }
 0x2e4   :  { %5552 = vmatpush1.bf16.msra.mxu0 %v10071_v60 }
 0x2e5   :  { %5553 = vmatprep.subr.bf16.mxu0 %v10076_v61 }
 0x2e8   :  { %5554 = vmatpush1.bf16.msra.mxu0 %v10074_v62 }
 0x2e9   :  { %5555 = vmatprep.subr.bf16.mxu0 %v10079_v0 }
 0x2ec   :  { %5556 = vmatpush1.bf16.msra.mxu0 %v10077_v1 }
 0x2ed   :  { %5557 = vmatprep.subr.bf16.mxu0 %v10082_v2 }
 0x2f0   :  { %5558 = vmatpush1.bf16.msra.mxu0 %v10080_v17  ;;  %v10176_v17 = vld [vmem:[#allocation5 + $0xa30] ss:$24 sps:$4 sm:$0xff]  }
 0x2f1   :  { %5559 = vmatprep.subr.bf16.mxu0 %v10085_v3 }
 0x2f4   :  { %5560 = vmatpush1.bf16.msra.mxu0 %v10083_v24 }
 0x2f5   :  { %5561 = vmatprep.subr.bf16.mxu0 %v10088_v4 }
 0x2f8   :  { %5562 = vmatpush1.bf16.msra.mxu0 %v10086_v5 }
 0x2f9   :  { %5563 = vmatprep.subr.bf16.mxu0 %v10094_v6 }
 0x2fc   :  { %5564 = vmatpush1.bf16.msra.mxu0 %v10092_v7  ;;  %v10184_v7 = vld [vmem:[#allocation5 + $0xa64] ss:$24 sps:$4 sm:$0xff]  }
 0x2fd   :  { %5565 = vmatprep.subr.bf16.mxu0 %v10100_v8 }
 0x300   :  { %5566 = vmatpush1.bf16.msra.mxu0 %v10098_v9 }
 0x301   :  { %5567 = vmatprep.subr.bf16.mxu0 %v10106_v50 }
 0x304   :  { %5568 = vmatpush1.bf16.msra.mxu0 %v10104_v36 }
 0x305   :  { %5569 = vmatprep.subr.bf16.mxu0 %v10112_v10 }
 0x308   :  { %5570 = vmatpush1.bf16.msra.mxu0 %v10110_v12 }
 0x309   :  { %5571 = vmatprep.subr.bf16.mxu0 %v10118_v13 }
 0x30c   :  { %5572 = vmatpush1.bf16.msra.mxu0 %v10116_v14 }
 0x30d   :  { %5573 = vmatprep.subr.bf16.mxu0 %v10124_v15 }
 0x310   :  { %5574 = vmatpush1.bf16.msra.mxu0 %v10122_v16  ;;  %v10182_v16 = vld [vmem:[#allocation5 + $0xa60] ss:$24 sps:$4 sm:$0xff]  }
 0x311   :  { %5575 = vmatprep.subr.bf16.mxu0 %v10130_v18 }
 0x314   :  { %5576 = vmatpush1.bf16.msra.mxu0 %v10128_v19 }
 0x315   :  { %5577 = vmatprep.subr.bf16.mxu0 %v10136_v21  ;;  %v10190_v21 = vld [vmem:[#allocation5 + $0xa94] ss:$24 sps:$4 sm:$0xff]  }
 0x318   :  { %5578 = vmatpush1.bf16.msra.mxu0 %v10134_v22 }
 0x319   :  { %5590 = vmatprep.subr.bf16.mxu0 %v10142_v23 }
 0x31b   :  { %5580 = vmatmul.mubr.bf16.vlgmr.msra.gmra.mrb[4].mxu0 %v11047_v28  ;;  %v913_v28 = vsub.s32 2, %v11098_v34 }
 0x31c   :  { %5591 = vmatpush1.bf16.msra.mxu0 %v10140_v25  ;;  %5622 = vmatprep.mubr.bf16.mxu0 %v11049_v33  ;;  %v11102_v33 = vld [vmem:[#allocation7] sm:$0x3f] }
 0x31d   :  { %5592 = vmatprep.subr.bf16.mxu0 %v10148_v26  ;;  %v906_v46 = vrot.slane %v11102_v33, %v905_v39  ;;  %v914_v48 = vrot.slane %v11102_v33, %v913_v28  ;;  %v910_v49 = vrot.slane %v11102_v33, %v909_v41  ;;  %v918_v51 = vrot.slane %v11102_v33, %v917_v43  ;;  %v10185_v25 = vld [vmem:[#allocation8 + $0x300] ss:$24 sps:$4 sm:$0xff]   ;;  %v10193_v26 = vld [vmem:[#allocation8 + $0x334] ss:$24 sps:$4 sm:$0xff]  }
 0x320   :  { %5593 = vmatpush1.bf16.msra.mxu0 %v10146_v27  ;;  %v10188_v27 = vld [vmem:[#allocation5 + $0xa90] ss:$24 sps:$4 sm:$0xff]  }
 0x321   :  { %5594 = vmatprep.subr.bf16.mxu0 %v10154_v29  ;;  %v10196_v29 = vld [vmem:[#allocation5 + $0xac4] ss:$24 sps:$4 sm:$0xff]  }
 0x324   :  { %5595 = vmatpush1.bf16.msra.mxu0 %v10152_v31  ;;  %v10199_v31 = vld [vmem:[#allocation8 + $0x364] ss:$24 sps:$4 sm:$0xff]  }
 0x325   :  { %5596 = vmatprep.subr.bf16.mxu0 %v10160_v32  ;;  %v10194_v32 = vld [vmem:[#allocation5 + $0xac0] ss:$24 sps:$4 sm:$0xff]  }
 0x328   :  { %5597 = vmatpush1.bf16.msra.mxu0 %v10158_v35  ;;  %v10202_v35 = vld [vmem:[#allocation5 + $0xaf4] ss:$24 sps:$4 sm:$0xff]  }
 0x329   :  { %5598 = vmatprep.subr.bf16.mxu0 %v10166_v37  ;;  %v10197_v37 = vld [vmem:[#allocation8 + $0x360] ss:$24 sps:$4 sm:$0xff]  }
 0x32c   :  { %5599 = vmatpush1.bf16.msra.mxu0 %v10164_v40  ;;  %v10205_v40 = vld [vmem:[#allocation8 + $0x394] ss:$24 sps:$4 sm:$0xff]  }
 0x32d   :  { %5600 = vmatprep.subr.bf16.mxu0 %v10172_v45  ;;  %v10200_v45 = vld [vmem:[#allocation5 + $0xaf0] ss:$24 sps:$4 sm:$0xff]  }
 0x32e   :  { %v5108_v54 = vpop.f32.mrb[0].mxu0 }
 0x32f   :  { %v5452_v55 = vpop.f32.mrb[0].mxu1  ;;  %v9057_v56 = vadd.f32 %v5108_v54, %v906_v46  ;;  %v5110_v60 = vpop.f32.mrb[1].mxu0  ;;  %v10217_v54 = vld [vmem:[#allocation8 + $0x3f4] ss:$24 sps:$4 sm:$0xff]  }
 0x330   :  { %v9061_v59 = vadd.f32 %v5452_v55, %v914_v48  ;;  %v5454_v61 = vpop.f32.mrb[1].mxu1  ;;  %v9058_v62 = vadd.f32 %v5110_v60, %v910_v49  ;;  %v5112_v1 = vpop.f32.mrb[2].mxu0  ;;  %5601 = vmatpush1.bf16.msra.mxu0 %v10170_v52  ;;  %v10214_v52 = vld [vmem:[#allocation5 + $0xb54] ss:$24 sps:$4 sm:$0xff]   ;;  %v10212_v55 = vld [vmem:[#allocation5 + $0xb50] ss:$24 sps:$4 sm:$0xff]  }
 0x331   :  { %v9062_v0 = vadd.f32 %v5454_v61, %v918_v51  ;;  %v5456_v2 = vpop.f32.mrb[2].mxu1  ;;  %v9059_v24 = vadd.f32 %v5112_v1, %v906_v46  ;;  %v5114_v5 = vpop.f32.mrb[3].mxu0  ;;  %5602 = vmatprep.subr.bf16.mxu0 %v10178_v53  ;;  %v5805_v50 = vmax.f32 %v9057_v56, 0.0  ;;  %v10208_v46 = vld [vmem:[#allocation5 + $0xb24] ss:$24 sps:$4 sm:$0xff]  }
 0x332   :  { %v5807_v3 = vmax.f32 %v9061_v59, 0.0  ;;  %v9063_v4 = vadd.f32 %v5456_v2, %v914_v48  ;;  %v5458_v6 = vpop.f32.mrb[3].mxu1  ;;  %v9060_v8 = vadd.f32 %v5114_v5, %v910_v49  ;;  %v5806_v12 = vmax.f32 %v9058_v62, 0.0  ;;  %v10203_v48 = vld [vmem:[#allocation8 + $0x390] ss:$24 sps:$4 sm:$0xff]  }
 0x333   :  { %v9064_v9 = vadd.f32 %v5458_v6, %v918_v51  ;;  %v5811_v36 = vmax.f32 %v9059_v24, 0.0  ;;  %v5808_v13 = vmax.f32 %v9062_v0, 0.0  ;;  %v10211_v49 = vld [vmem:[#allocation8 + $0x3c4] ss:$24 sps:$4 sm:$0xff]   ;;  %v10209_v53 = vld [vmem:[#allocation8 + $0x3c0] ss:$24 sps:$4 sm:$0xff]  }
 0x334   :  { %v5813_v10 = vmax.f32 %v9063_v4, 0.0  ;;  %v5812_v14 = vmax.f32 %v9060_v8, 0.0  ;;  %5603 = vmatpush1.bf16.msra.mxu0 %v10176_v17  ;;  %v10206_v51 = vld [vmem:[#allocation5 + $0xb20] ss:$24 sps:$4 sm:$0xff]   ;;  %v10220_v56 = vld [vmem:[#allocation5 + $0xb84] ss:$24 sps:$4 sm:$0xff]  }
 0x335   :  { %v5814_v15 = vmax.f32 %v9064_v9, 0.0  ;;  %v11118_v18 = vpack.c.bf16 %v5811_v36, %v5805_v50  ;;  %5604 = vmatprep.subr.bf16.mxu0 %v10184_v7  ;;  %v10215_v59 = vld [vmem:[#allocation8 + $0x3f0] ss:$24 sps:$4 sm:$0xff]   ;;  %v10223_v60 = vld [vmem:[#allocation8 + $0x424] ss:$24 sps:$4 sm:$0xff]  }
 0x336   :  { %v11120_v19 = vpack.c.bf16 %v5813_v10, %v5807_v3  ;;  %v11122_v22 = vpack.c.bf16 %v5812_v14, %v5806_v12  ;;  %v10218_v61 = vld [vmem:[#allocation5 + $0xb80] ss:$24 sps:$4 sm:$0xff]   ;;  %v10226_v62 = vld [vmem:[#allocation5 + $0xbb4] ss:$24 sps:$4 sm:$0xff]   ;;  %v10224_v2 = vld [vmem:[#allocation5 + $0xbb0] ss:$24 sps:$4 sm:$0xff]  }
 0x337   :  { %v11124_v23 = vpack.c.bf16 %v5814_v15, %v5808_v13  ;;  %v10221_v0 = vld [vmem:[#allocation8 + $0x420] ss:$24 sps:$4 sm:$0xff]   ;;  %v10229_v1 = vld [vmem:[#allocation8 + $0x454] ss:$24 sps:$4 sm:$0xff]   ;;  %v10227_v3 = vld [vmem:[#allocation8 + $0x450] ss:$24 sps:$4 sm:$0xff]  }
 0x338   :  { %5605 = vmatpush1.bf16.msra.mxu0 %v10182_v16  ;;  %7615 = vmatprep.mubr.bf16.mxu1 %v11122_v22  ;;  %v10232_v17 = vld [vmem:[#allocation5 + $0xbe4] ss:$24 sps:$4 sm:$0xff]   ;;  %v10230_v4 = vld [vmem:[#allocation5 + $0xbe0] ss:$24 sps:$4 sm:$0xff]   ;;  %v10238_v5 = vld [vmem:[#allocation5 + $0xc14] ss:$24 sps:$4 sm:$0xff]  }
 0x339   :  { %7616 = vmatmul.mubr.bf16.vlgmr.msra.gmra.mrb[4].mxu1 %v11118_v18  ;;  %5606 = vmatprep.subr.bf16.mxu0 %v10190_v21  ;;  %v10235_v24 = vld [vmem:[#allocation8 + $0x484] ss:$24 sps:$4 sm:$0xff]   ;;  %v10233_v6 = vld [vmem:[#allocation8 + $0x480] ss:$24 sps:$4 sm:$0xff]   ;;  %v10241_v7 = vld [vmem:[#allocation8 + $0x4b4] ss:$24 sps:$4 sm:$0xff]  }
 0x33a   :  { %7627 = vmatpush1.bf16.msra.mxu1 %v10185_v25  ;;  %7658 = vmatprep.mubr.bf16.mxu1 %v11124_v23  ;;  %v10236_v8 = vld [vmem:[#allocation5 + $0xc10] ss:$24 sps:$4 sm:$0xff]   ;;  %v10244_v9 = vld [vmem:[#allocation5 + $0xc44] ss:$24 sps:$4 sm:$0xff]   ;;  %v10242_v10 = vld [vmem:[#allocation5 + $0xc40] ss:$24 sps:$4 sm:$0xff]  }
 0x33b   :  { %7628 = vmatprep.subr.bf16.mxu1 %v10193_v26  ;;  %v10239_v50 = vld [vmem:[#allocation8 + $0x4b0] ss:$24 sps:$4 sm:$0xff]   ;;  %v10247_v36 = vld [vmem:[#allocation8 + $0x4e4] ss:$24 sps:$4 sm:$0xff]   ;;  %v10245_v13 = vld [vmem:[#allocation8 + $0x4e0] ss:$24 sps:$4 sm:$0xff]  }
 0x33c   :  { %5607 = vmatpush1.bf16.msra.mxu0 %v10188_v27  ;;  %v10250_v12 = vld [vmem:[#allocation5 + $0xc74] ss:$24 sps:$4 sm:$0xff]   ;;  %v10248_v15 = vld [vmem:[#allocation5 + $0xc70] ss:$24 sps:$4 sm:$0xff]   ;;  %v10256_v16 = vld [vmem:[#allocation5 + $0xca4] ss:$24 sps:$4 sm:$0xff]  }
 0x33d   :  { %5608 = vmatprep.subr.bf16.mxu0 %v10196_v29  ;;  %v10253_v14 = vld [vmem:[#allocation8 + $0x514] ss:$24 sps:$4 sm:$0xff]   ;;  %v10251_v21 = vld [vmem:[#allocation8 + $0x510] ss:$24 sps:$4 sm:$0xff]  }
 0x33e   :  { %7629 = vmatpush1.bf16.msra.mxu1 %v10191_v30  ;;  %v10254_v25 = vld [vmem:[#allocation5 + $0xca0] ss:$24 sps:$4 sm:$0xff]   ;;  %v10262_v26 = vld [vmem:[#allocation5 + $0xcd4] ss:$24 sps:$4 sm:$0xff]   ;;  %v10260_v29 = vld [vmem:[#allocation5 + $0xcd0] ss:$24 sps:$4 sm:$0xff]  }
 0x33f   :  { %7630 = vmatprep.subr.bf16.mxu1 %v10199_v31  ;;  %v10265_v27 = vld [vmem:[#allocation8 + $0x574] ss:$24 sps:$4 sm:$0xff]   ;;  %v10263_v31 = vld [vmem:[#allocation8 + $0x570] ss:$24 sps:$4 sm:$0xff]  }
 0x340   :  { %5609 = vmatpush1.bf16.msra.mxu0 %v10194_v32  ;;  %v10268_v30 = vld [vmem:[#allocation5 + $0xd04] ss:$24 sps:$4 sm:$0xff]  }
 0x341   :  { %5610 = vmatprep.subr.bf16.mxu0 %v10202_v35  ;;  %v10271_v32 = vld [vmem:[#allocation8 + $0x5a4] ss:$24 sps:$4 sm:$0xff]  }
 0x342   :  { %7631 = vmatpush1.bf16.msra.mxu1 %v10197_v37  ;;  %v10266_v35 = vld [vmem:[#allocation5 + $0xd00] ss:$24 sps:$4 sm:$0xff]   ;;  %v10274_v37 = vld [vmem:[#allocation5 + $0xd34] ss:$24 sps:$4 sm:$0xff]  }
 0x343   :  { %7632 = vmatprep.subr.bf16.mxu1 %v10205_v40  ;;  %v10269_v40 = vld [vmem:[#allocation8 + $0x5a0] ss:$24 sps:$4 sm:$0xff]  }
 0x344   :  { %5611 = vmatpush1.bf16.msra.mxu0 %v10200_v45  ;;  %v10277_v45 = vld [vmem:[#allocation8 + $0x5d4] ss:$24 sps:$4 sm:$0xff]  }
 0x345   :  { %5612 = vmatprep.subr.bf16.mxu0 %v10208_v46  ;;  %v10272_v46 = vld [vmem:[#allocation5 + $0xd30] ss:$24 sps:$4 sm:$0xff]  }
 0x346   :  { %7633 = vmatpush1.bf16.msra.mxu1 %v10203_v48  ;;  %v10280_v48 = vld [vmem:[#allocation5 + $0xd64] ss:$24 sps:$4 sm:$0xff]  }
 0x347   :  { %7634 = vmatprep.subr.bf16.mxu1 %v10211_v49  ;;  %v10275_v49 = vld [vmem:[#allocation8 + $0x5d0] ss:$24 sps:$4 sm:$0xff]  }
 0x348   :  { %5613 = vmatpush1.bf16.msra.mxu0 %v10206_v51  ;;  %v10278_v51 = vld [vmem:[#allocation5 + $0xd60] ss:$24 sps:$4 sm:$0xff]  }
 0x349   :  { %5614 = vmatprep.subr.bf16.mxu0 %v10214_v52  ;;  %v10283_v52 = vld [vmem:[#allocation5 + $0xd94] ss:$24 sps:$4 sm:$0xff]  }
 0x34a   :  { %7635 = vmatpush1.bf16.msra.mxu1 %v10209_v53  ;;  %v10281_v53 = vld [vmem:[#allocation5 + $0xd90] ss:$24 sps:$4 sm:$0xff]  }
 0x34b   :  { %7636 = vmatprep.subr.bf16.mxu1 %v10217_v54  ;;  %v10286_v54 = vld [vmem:[#allocation5 + $0xdc4] ss:$24 sps:$4 sm:$0xff]  }
 0x34c   :  { %5615 = vmatpush1.bf16.msra.mxu0 %v10212_v55  ;;  %v10284_v55 = vld [vmem:[#allocation5 + $0xdc0] ss:$24 sps:$4 sm:$0xff]  }
 0x34d   :  { %5616 = vmatprep.subr.bf16.mxu0 %v10220_v56  ;;  %v10289_v56 = vld [vmem:[#allocation5 + $0xdf4] ss:$24 sps:$4 sm:$0xff]  }
 0x34e   :  { %7637 = vmatpush1.bf16.msra.mxu1 %v10215_v59  ;;  %v10287_v59 = vld [vmem:[#allocation5 + $0xdf0] ss:$24 sps:$4 sm:$0xff]  }
 0x34f   :  { %7638 = vmatprep.subr.bf16.mxu1 %v10223_v60  ;;  %v10292_v60 = vld [vmem:[#allocation5 + $0xe24] ss:$24 sps:$4 sm:$0xff]  }
 0x350   :  { %5617 = vmatpush1.bf16.msra.mxu0 %v10218_v61  ;;  %v10290_v61 = vld [vmem:[#allocation5 + $0xe20] ss:$24 sps:$4 sm:$0xff]  }
 0x351   :  { %5618 = vmatprep.subr.bf16.mxu0 %v10226_v62  ;;  %v10295_v62 = vld [vmem:[#allocation5 + $0xe54] ss:$24 sps:$4 sm:$0xff]  }
 0x352   :  { %7639 = vmatpush1.bf16.msra.mxu1 %v10221_v0  ;;  %v10293_v0 = vld [vmem:[#allocation5 + $0xe50] ss:$24 sps:$4 sm:$0xff]  }
 0x353   :  { %7640 = vmatprep.subr.bf16.mxu1 %v10229_v1  ;;  %v10298_v1 = vld [vmem:[#allocation5 + $0xe84] ss:$24 sps:$4 sm:$0xff]  }
 0x354   :  { %5619 = vmatpush1.bf16.msra.mxu0 %v10224_v2  ;;  %v10296_v2 = vld [vmem:[#allocation5 + $0xe80] ss:$24 sps:$4 sm:$0xff]  }
 0x355   :  { %5620 = vmatprep.subr.bf16.mxu0 %v10232_v17  ;;  %v10301_v17 = vld [vmem:[#allocation5 + $0xeb4] ss:$24 sps:$4 sm:$0xff]  }
 0x356   :  { %7641 = vmatpush1.bf16.msra.mxu1 %v10227_v3  ;;  %v10299_v3 = vld [vmem:[#allocation5 + $0xeb0] ss:$24 sps:$4 sm:$0xff]  }
 0x357   :  { %7642 = vmatprep.subr.bf16.mxu1 %v10235_v24  ;;  %v10304_v24 = vld [vmem:[#allocation5 + $0xee4] ss:$24 sps:$4 sm:$0xff]  }
 0x358   :  { %5621 = vmatpush1.bf16.msra.mxu0 %v10230_v4  ;;  %v10302_v4 = vld [vmem:[#allocation5 + $0xee0] ss:$24 sps:$4 sm:$0xff]  }
 0x359   :  { %5633 = vmatprep.subr.bf16.mxu0 %v10238_v5  ;;  %v10307_v5 = vld [vmem:[#allocation5 + $0xf14] ss:$24 sps:$4 sm:$0xff]  }
 0x35a   :  { %7643 = vmatpush1.bf16.msra.mxu1 %v10233_v6  ;;  %v10305_v6 = vld [vmem:[#allocation5 + $0xf10] ss:$24 sps:$4 sm:$0xff]  }
 0x35b   :  { %5623 = vmatmul.mubr.bf16.vlgmr.msra.gmra.mrb[4].mxu0 %v11055_v42  ;;  %7644 = vmatprep.subr.bf16.mxu1 %v10241_v7  ;;  %v10259_v42 = vld [vmem:[#allocation8 + $0x544] ss:$24 sps:$4 sm:$0xff]  }
 0x35c   :  { %5634 = vmatpush1.bf16.msra.mxu0 %v10236_v8  ;;  %5665 = vmatprep.mubr.bf16.mxu0 %v11057_v47  ;;  %v10257_v47 = vld [vmem:[#allocation8 + $0x540] ss:$24 sps:$4 sm:$0xff]  }
 0x35d   :  { %5635 = vmatprep.subr.bf16.mxu0 %v10244_v9  ;;  %v10310_v7 = vld [vmem:[#allocation5 + $0xf44] ss:$24 sps:$4 sm:$0xff]   ;;  %v10308_v8 = vld [vmem:[#allocation5 + $0xf40] ss:$24 sps:$4 sm:$0xff]   ;;  %v10313_v9 = vld [vmem:[#allocation5 + $0xf74] ss:$24 sps:$4 sm:$0xff]  }
 0x35e   :  { %7645 = vmatpush1.bf16.msra.mxu1 %v10239_v50  ;;  %v10311_v50 = vld [vmem:[#allocation5 + $0xf70] ss:$24 sps:$4 sm:$0xff]  }
 0x35f   :  { %7646 = vmatprep.subr.bf16.mxu1 %v10247_v36  ;;  %v10316_v36 = vld [vmem:[#allocation5 + $0xfa4] ss:$24 sps:$4 sm:$0xff]  }
 0x360   :  { %5636 = vmatpush1.bf16.msra.mxu0 %v10242_v10  ;;  %v10314_v10 = vld [vmem:[#allocation5 + $0xfa0] ss:$24 sps:$4 sm:$0xff]  }
 0x361   :  { %5637 = vmatprep.subr.bf16.mxu0 %v10250_v12  ;;  %v10319_v12 = vld [vmem:[#allocation5 + $0xfd4] ss:$24 sps:$4 sm:$0xff]  }
 0x362   :  { %7647 = vmatpush1.bf16.msra.mxu1 %v10245_v13  ;;  %v10317_v13 = vld [vmem:[#allocation5 + $0xfd0] ss:$24 sps:$4 sm:$0xff]  }
 0x363   :  { %7648 = vmatprep.subr.bf16.mxu1 %v10253_v14  ;;  %v10322_v14 = vld [vmem:[#allocation5 + $0x1004] ss:$24 sps:$4 sm:$0xff]  }
 0x364   :  { %5638 = vmatpush1.bf16.msra.mxu0 %v10248_v15  ;;  %v10325_v15 = vld [vmem:[#allocation5 + $0x1034] ss:$24 sps:$4 sm:$0xff]  }
 0x365   :  { %5639 = vmatprep.subr.bf16.mxu0 %v10256_v16  ;;  %v10328_v16 = vld [vmem:[#allocation5 + $0x1064] ss:$24 sps:$4 sm:$0xff]  }
 0x366   :  { %7649 = vmatpush1.bf16.msra.mxu1 %v10251_v21  ;;  %v10326_v21 = vld [vmem:[#allocation5 + $0x1060] ss:$24 sps:$4 sm:$0xff]  }
 0x367   :  { %7650 = vmatprep.subr.bf16.mxu1 %v10259_v42  ;;  %v10331_v42 = vld [vmem:[#allocation5 + $0x1094] ss:$24 sps:$4 sm:$0xff]  }
 0x368   :  { %5640 = vmatpush1.bf16.msra.mxu0 %v10254_v25  ;;  %v10329_v25 = vld [vmem:[#allocation5 + $0x1090] ss:$24 sps:$4 sm:$0xff]  }
 0x369   :  { %5641 = vmatprep.subr.bf16.mxu0 %v10262_v26  ;;  %v10334_v26 = vld [vmem:[#allocation5 + $0x10c4] ss:$24 sps:$4 sm:$0xff]  }
 0x36a   :  { %7651 = vmatpush1.bf16.msra.mxu1 %v10257_v47  ;;  %v10332_v47 = vld [vmem:[#allocation5 + $0x10c0] ss:$24 sps:$4 sm:$0xff]  }
 0x36b   :  { %7652 = vmatprep.subr.bf16.mxu1 %v10265_v27  ;;  %v10337_v27 = vld [vmem:[#allocation5 + $0x10f4] ss:$24 sps:$4 sm:$0xff]  }
 0x36c   :  { %5642 = vmatpush1.bf16.msra.mxu0 %v10260_v29  ;;  %v10335_v29 = vld [vmem:[#allocation5 + $0x10f0] ss:$24 sps:$4 sm:$0xff]  }
 0x36d   :  { %5643 = vmatprep.subr.bf16.mxu0 %v10268_v30  ;;  %v10340_v30 = vld [vmem:[#allocation5 + $0x1124] ss:$24 sps:$4 sm:$0xff]  }
 0x36e   :  { %7653 = vmatpush1.bf16.msra.mxu1 %v10263_v31  ;;  %v10338_v31 = vld [vmem:[#allocation5 + $0x1120] ss:$24 sps:$4 sm:$0xff]  }
 0x36f   :  { %7654 = vmatprep.subr.bf16.mxu1 %v10271_v32  ;;  %v10343_v32 = vld [vmem:[#allocation5 + $0x1154] ss:$24 sps:$4 sm:$0xff]  }
 0x370   :  { %5644 = vmatpush1.bf16.msra.mxu0 %v10266_v35  ;;  %v10341_v35 = vld [vmem:[#allocation5 + $0x1150] ss:$24 sps:$4 sm:$0xff]  }
 0x371   :  { %5645 = vmatprep.subr.bf16.mxu0 %v10274_v37  ;;  %v10346_v37 = vld [vmem:[#allocation5 + $0x1184] ss:$24 sps:$4 sm:$0xff]  }
 0x372   :  { %7655 = vmatpush1.bf16.msra.mxu1 %v10269_v40  ;;  %v10344_v40 = vld [vmem:[#allocation5 + $0x1180] ss:$24 sps:$4 sm:$0xff]  }
 0x373   :  { %7656 = vmatprep.subr.bf16.mxu1 %v10277_v45  ;;  %v10349_v45 = vld [vmem:[#allocation5 + $0x11b4] ss:$24 sps:$4 sm:$0xff]  }
 0x374   :  { %5646 = vmatpush1.bf16.msra.mxu0 %v10272_v46  ;;  %v10347_v46 = vld [vmem:[#allocation5 + $0x11b0] ss:$24 sps:$4 sm:$0xff]  }
 0x375   :  { %5647 = vmatprep.subr.bf16.mxu0 %v10280_v48  ;;  %v10352_v48 = vld [vmem:[#allocation5 + $0x11e4] ss:$24 sps:$4 sm:$0xff]  }
 0x376   :  { %7657 = vmatpush1.bf16.msra.mxu1 %v10275_v49  ;;  %v10350_v49 = vld [vmem:[#allocation5 + $0x11e0] ss:$24 sps:$4 sm:$0xff]  }
 0x378   :  { %5648 = vmatpush1.bf16.msra.mxu0 %v10278_v51  ;;  %v10355_v51 = vld [vmem:[#allocation5 + $0x1214] ss:$24 sps:$4 sm:$0xff]  }
 0x379   :  { %7659 = vmatmul.mubr.bf16.vlgmr.msra.gmra.mrb[4].mxu1 %v11120_v19  ;;  %5649 = vmatprep.subr.bf16.mxu0 %v10283_v52  ;;  %v10353_v52 = vld [vmem:[#allocation5 + $0x1210] ss:$24 sps:$4 sm:$0xff]  }
 0x37c   :  { %5650 = vmatpush1.bf16.msra.mxu0 %v10281_v53  ;;  %v10358_v53 = vld [vmem:[#allocation5 + $0x1244] ss:$24 sps:$4 sm:$0xff]  }
 0x37d   :  { %5651 = vmatprep.subr.bf16.mxu0 %v10286_v54  ;;  %v10449_v54 = vld [vmem:[#allocation8 + $0x600] ss:$24 sps:$4 sm:$0xff]  }
 0x380   :  { %5652 = vmatpush1.bf16.msra.mxu0 %v10284_v55  ;;  %v10451_v55 = vld [vmem:[#allocation8 + $0x604] ss:$24 sps:$4 sm:$0xff]  }
 0x381   :  { %5653 = vmatprep.subr.bf16.mxu0 %v10289_v56  ;;  %v10356_v56 = vld [vmem:[#allocation5 + $0x1240] ss:$24 sps:$4 sm:$0xff]   ;;  %7669 = vmatprep.subr.bf16.mxu1 %v10451_v55  ;;  %v10397_v55 = vld [vmem:[#allocation5 + $0x14b4] ss:$24 sps:$4 sm:$0xff]  }
 0x382   :  { %7670 = vmatpush1.bf16.msra.mxu1 %v10449_v54  ;;  %v10392_v54 = vld [vmem:[#allocation5 + $0x1480] ss:$24 sps:$4 sm:$0xff]  }
 0x384   :  { %5654 = vmatpush1.bf16.msra.mxu0 %v10287_v59  ;;  %v10454_v59 = vld [vmem:[#allocation8 + $0x634] ss:$24 sps:$4 sm:$0xff]  }
 0x385   :  { %5655 = vmatprep.subr.bf16.mxu0 %v10292_v60  ;;  %v10361_v60 = vld [vmem:[#allocation5 + $0x1274] ss:$24 sps:$4 sm:$0xff]   ;;  %7671 = vmatprep.subr.bf16.mxu1 %v10454_v59  ;;  %v10395_v59 = vld [vmem:[#allocation5 + $0x14b0] ss:$24 sps:$4 sm:$0xff]  }
 0x388   :  { %5656 = vmatpush1.bf16.msra.mxu0 %v10290_v61  ;;  %v10452_v61 = vld [vmem:[#allocation8 + $0x630] ss:$24 sps:$4 sm:$0xff]  }
 0x389   :  { %5657 = vmatprep.subr.bf16.mxu0 %v10295_v62  ;;  %v10457_v62 = vld [vmem:[#allocation8 + $0x664] ss:$24 sps:$4 sm:$0xff]   ;;  %7672 = vmatpush1.bf16.msra.mxu1 %v10452_v61 }
 0x38a   :  { %7673 = vmatprep.subr.bf16.mxu1 %v10457_v62  ;;  %v10398_v61 = vld [vmem:[#allocation5 + $0x14e0] ss:$24 sps:$4 sm:$0xff]   ;;  %v10403_v62 = vld [vmem:[#allocation5 + $0x1514] ss:$24 sps:$4 sm:$0xff]  }
 0x38c   :  { %5658 = vmatpush1.bf16.msra.mxu0 %v10293_v0  ;;  %v10359_v0 = vld [vmem:[#allocation5 + $0x1270] ss:$24 sps:$4 sm:$0xff]  }
 0x38d   :  { %5659 = vmatprep.subr.bf16.mxu0 %v10298_v1  ;;  %v10364_v1 = vld [vmem:[#allocation5 + $0x12a4] ss:$24 sps:$4 sm:$0xff]  }
 0x390   :  { %5660 = vmatpush1.bf16.msra.mxu0 %v10296_v2  ;;  %v10460_v2 = vld [vmem:[#allocation8 + $0x694] ss:$24 sps:$4 sm:$0xff]  }
 0x391   :  { %5661 = vmatprep.subr.bf16.mxu0 %v10301_v17  ;;  %v10362_v17 = vld [vmem:[#allocation5 + $0x12a0] ss:$24 sps:$4 sm:$0xff]  }
 0x394   :  { %5662 = vmatpush1.bf16.msra.mxu0 %v10299_v3  ;;  %v10458_v3 = vld [vmem:[#allocation8 + $0x690] ss:$24 sps:$4 sm:$0xff]  }
 0x395   :  { %5663 = vmatprep.subr.bf16.mxu0 %v10304_v24  ;;  %v10463_v24 = vld [vmem:[#allocation8 + $0x6c4] ss:$24 sps:$4 sm:$0xff]  }
 0x398   :  { %5664 = vmatpush1.bf16.msra.mxu0 %v10302_v4  ;;  %v10365_v4 = vld [vmem:[#allocation5 + $0x12d0] ss:$24 sps:$4 sm:$0xff]  }
 0x399   :  { %5676 = vmatprep.subr.bf16.mxu0 %v10307_v5  ;;  %v10370_v5 = vld [vmem:[#allocation5 + $0x1304] ss:$24 sps:$4 sm:$0xff]  }
 0x39b   :  { %5666 = vmatmul.mubr.bf16.vlgmr.msra.gmra.mrb[4].mxu0 %v11063_v58  ;;  %v10320_v58 = vld [vmem:[#allocation5 + $0x1000] ss:$24 sps:$4 sm:$0xff]  }
 0x39c   :  { %5677 = vmatpush1.bf16.msra.mxu0 %v10305_v6  ;;  %5708 = vmatprep.mubr.bf16.mxu0 %v11065_v63  ;;  %v10323_v63 = vld [vmem:[#allocation5 + $0x1030] ss:$24 sps:$4 sm:$0xff]  }
 0x39d   :  { %5678 = vmatprep.subr.bf16.mxu0 %v10310_v7  ;;  %v10461_v6 = vld [vmem:[#allocation8 + $0x6c0] ss:$24 sps:$4 sm:$0xff]   ;;  %v10466_v7 = vld [vmem:[#allocation8 + $0x6f4] ss:$24 sps:$4 sm:$0xff]  }
 0x3a0   :  { %5679 = vmatpush1.bf16.msra.mxu0 %v10308_v8  ;;  %v10368_v8 = vld [vmem:[#allocation5 + $0x1300] ss:$24 sps:$4 sm:$0xff]  }
 0x3a1   :  { %5680 = vmatprep.subr.bf16.mxu0 %v10313_v9  ;;  %v10373_v9 = vld [vmem:[#allocation5 + $0x1334] ss:$24 sps:$4 sm:$0xff]  }
 0x3a4   :  { %5681 = vmatpush1.bf16.msra.mxu0 %v10311_v50  ;;  %v10464_v50 = vld [vmem:[#allocation8 + $0x6f0] ss:$24 sps:$4 sm:$0xff]  }
 0x3a5   :  { %5682 = vmatprep.subr.bf16.mxu0 %v10316_v36  ;;  %v10469_v36 = vld [vmem:[#allocation8 + $0x724] ss:$24 sps:$4 sm:$0xff]  }
 0x3a8   :  { %5683 = vmatpush1.bf16.msra.mxu0 %v10314_v10  ;;  %v10371_v10 = vld [vmem:[#allocation5 + $0x1330] ss:$24 sps:$4 sm:$0xff]  }
 0x3a9   :  { %5684 = vmatprep.subr.bf16.mxu0 %v10319_v12  ;;  %v10376_v12 = vld [vmem:[#allocation5 + $0x1364] ss:$24 sps:$4 sm:$0xff]  }
 0x3ac   :  { %5685 = vmatpush1.bf16.msra.mxu0 %v10317_v13  ;;  %v10467_v13 = vld [vmem:[#allocation8 + $0x720] ss:$24 sps:$4 sm:$0xff]  }
 0x3ad   :  { %5686 = vmatprep.subr.bf16.mxu0 %v10322_v14  ;;  %v10472_v14 = vld [vmem:[#allocation8 + $0x754] ss:$24 sps:$4 sm:$0xff]  }
 0x3b0   :  { %5687 = vmatpush1.bf16.msra.mxu0 %v10320_v58  ;;  %v10374_v58 = vld [vmem:[#allocation5 + $0x1360] ss:$24 sps:$4 sm:$0xff]  }
 0x3b1   :  { %5688 = vmatprep.subr.bf16.mxu0 %v10325_v15  ;;  %v10379_v15 = vld [vmem:[#allocation5 + $0x1394] ss:$24 sps:$4 sm:$0xff]  }
 0x3b4   :  { %5689 = vmatpush1.bf16.msra.mxu0 %v10323_v63  ;;  %v10470_v63 = vld [vmem:[#allocation8 + $0x750] ss:$24 sps:$4 sm:$0xff]  }
 0x3b5   :  { %5690 = vmatprep.subr.bf16.mxu0 %v10328_v16  ;;  %v10475_v16 = vld [vmem:[#allocation8 + $0x784] ss:$24 sps:$4 sm:$0xff]  }
 0x3b8   :  { %5691 = vmatpush1.bf16.msra.mxu0 %v10326_v21  ;;  %v10377_v21 = vld [vmem:[#allocation5 + $0x1390] ss:$24 sps:$4 sm:$0xff]  }
 0x3b9   :  { %5692 = vmatprep.subr.bf16.mxu0 %v10331_v42  ;;  %v10382_v42 = vld [vmem:[#allocation5 + $0x13c4] ss:$24 sps:$4 sm:$0xff]  }
 0x3bc   :  { %5693 = vmatpush1.bf16.msra.mxu0 %v10329_v25  ;;  %v10473_v25 = vld [vmem:[#allocation8 + $0x780] ss:$24 sps:$4 sm:$0xff]  }
 0x3bd   :  { %5694 = vmatprep.subr.bf16.mxu0 %v10334_v26  ;;  %v10478_v26 = vld [vmem:[#allocation8 + $0x7b4] ss:$24 sps:$4 sm:$0xff]  }
 0x3c0   :  { %5695 = vmatpush1.bf16.msra.mxu0 %v10332_v47  ;;  %v10380_v47 = vld [vmem:[#allocation5 + $0x13c0] ss:$24 sps:$4 sm:$0xff]  }
 0x3c1   :  { %5696 = vmatprep.subr.bf16.mxu0 %v10337_v27  ;;  %v10385_v27 = vld [vmem:[#allocation5 + $0x13f4] ss:$24 sps:$4 sm:$0xff]  }
 0x3c4   :  { %5697 = vmatpush1.bf16.msra.mxu0 %v10335_v29  ;;  %v10476_v29 = vld [vmem:[#allocation8 + $0x7b0] ss:$24 sps:$4 sm:$0xff]  }
 0x3c5   :  { %5698 = vmatprep.subr.bf16.mxu0 %v10340_v30  ;;  %v10481_v30 = vld [vmem:[#allocation8 + $0x7e4] ss:$24 sps:$4 sm:$0xff]  }
 0x3c8   :  { %5699 = vmatpush1.bf16.msra.mxu0 %v10338_v31  ;;  %v10383_v31 = vld [vmem:[#allocation5 + $0x13f0] ss:$24 sps:$4 sm:$0xff]  }
 0x3c9   :  { %5700 = vmatprep.subr.bf16.mxu0 %v10343_v32  ;;  %v10388_v32 = vld [vmem:[#allocation5 + $0x1424] ss:$24 sps:$4 sm:$0xff]  }
 0x3cc   :  { %5701 = vmatpush1.bf16.msra.mxu0 %v10341_v35  ;;  %v10479_v35 = vld [vmem:[#allocation8 + $0x7e0] ss:$24 sps:$4 sm:$0xff]  }
 0x3cd   :  { %5702 = vmatprep.subr.bf16.mxu0 %v10346_v37  ;;  %v10484_v37 = vld [vmem:[#allocation8 + $0x814] ss:$24 sps:$4 sm:$0xff]  }
 0x3d0   :  { %5703 = vmatpush1.bf16.msra.mxu0 %v10344_v40  ;;  %v10386_v40 = vld [vmem:[#allocation5 + $0x1420] ss:$24 sps:$4 sm:$0xff]  }
 0x3d1   :  { %5704 = vmatprep.subr.bf16.mxu0 %v10349_v45  ;;  %v10391_v45 = vld [vmem:[#allocation5 + $0x1454] ss:$24 sps:$4 sm:$0xff]  }
 0x3d4   :  { %5705 = vmatpush1.bf16.msra.mxu0 %v10347_v46  ;;  %v10482_v46 = vld [vmem:[#allocation8 + $0x810] ss:$24 sps:$4 sm:$0xff]  }
 0x3d5   :  { %5706 = vmatprep.subr.bf16.mxu0 %v10352_v48  ;;  %v10487_v48 = vld [vmem:[#allocation8 + $0x844] ss:$24 sps:$4 sm:$0xff]  }
 0x3d8   :  { %5707 = vmatpush1.bf16.msra.mxu0 %v10350_v49  ;;  %v10389_v49 = vld [vmem:[#allocation5 + $0x1450] ss:$24 sps:$4 sm:$0xff]  }
 0x3d9   :  { %5719 = vmatprep.subr.bf16.mxu0 %v10355_v51  ;;  %v10394_v51 = vld [vmem:[#allocation5 + $0x1484] ss:$24 sps:$4 sm:$0xff]  }
 0x3db   :  { %5709 = vmatmul.mubr.bf16.vlgmr.msra.gmra.mrb[4].mxu0 %v11071_v11  ;;  %v10455_v11 = vld [vmem:[#allocation8 + $0x660] ss:$24 sps:$4 sm:$0xff]  }
 0x3dc   :  { %5720 = vmatpush1.bf16.msra.mxu0 %v10353_v52  ;;  %5751 = vmatprep.mubr.bf16.mxu0 %v11073_v20  ;;  %v10367_v20 = vld [vmem:[#allocation5 + $0x12d4] ss:$24 sps:$4 sm:$0xff]   ;;  %v10485_v52 = vld [vmem:[#allocation8 + $0x840] ss:$24 sps:$4 sm:$0xff]  }
 0x3dd   :  { %5721 = vmatprep.subr.bf16.mxu0 %v10358_v53  ;;  %7674 = vmatpush1.bf16.msra.mxu1 %v10455_v11  ;;  %v10490_v53 = vld [vmem:[#allocation8 + $0x874] ss:$24 sps:$4 sm:$0xff]  }
 0x3de   :  { %7675 = vmatprep.subr.bf16.mxu1 %v10460_v2  ;;  %v10404_v11 = vld [vmem:[#allocation5 + $0x1540] ss:$24 sps:$4 sm:$0xff]   ;;  %v10409_v2 = vld [vmem:[#allocation5 + $0x1574] ss:$24 sps:$4 sm:$0xff]  }
 0x3e0   :  { %5722 = vmatpush1.bf16.msra.mxu0 %v10356_v56  ;;  %v10488_v56 = vld [vmem:[#allocation8 + $0x870] ss:$24 sps:$4 sm:$0xff]  }
 0x3e1   :  { %5723 = vmatprep.subr.bf16.mxu0 %v10361_v60  ;;  %7676 = vmatpush1.bf16.msra.mxu1 %v10458_v3  ;;  %v10400_v60 = vld [vmem:[#allocation5 + $0x14e4] ss:$24 sps:$4 sm:$0xff]   ;;  %v10410_v3 = vld [vmem:[#allocation5 + $0x15a0] ss:$24 sps:$4 sm:$0xff]  }
 0x3e2   :  { %7677 = vmatprep.subr.bf16.mxu1 %v10463_v24  ;;  %v10415_v24 = vld [vmem:[#allocation5 + $0x15d4] ss:$24 sps:$4 sm:$0xff]  }
 0x3e4   :  { %5724 = vmatpush1.bf16.msra.mxu0 %v10359_v0  ;;  %v10401_v0 = vld [vmem:[#allocation5 + $0x1510] ss:$24 sps:$4 sm:$0xff]  }
 0x3e5   :  { %5725 = vmatprep.subr.bf16.mxu0 %v10364_v1  ;;  %7678 = vmatpush1.bf16.msra.mxu1 %v10461_v6  ;;  %v10406_v1 = vld [vmem:[#allocation5 + $0x1544] ss:$24 sps:$4 sm:$0xff]   ;;  %v10421_v6 = vld [vmem:[#allocation5 + $0x1634] ss:$24 sps:$4 sm:$0xff]  }
 0x3e6   :  { %7679 = vmatprep.subr.bf16.mxu1 %v10466_v7  ;;  %v10424_v7 = vld [vmem:[#allocation5 + $0x1664] ss:$24 sps:$4 sm:$0xff]  }
 0x3e8   :  { %5726 = vmatpush1.bf16.msra.mxu0 %v10362_v17  ;;  %v10407_v17 = vld [vmem:[#allocation5 + $0x1570] ss:$24 sps:$4 sm:$0xff]  }
 0x3e9   :  { %5727 = vmatprep.subr.bf16.mxu0 %v10367_v20  ;;  %7680 = vmatpush1.bf16.msra.mxu1 %v10464_v50  ;;  %v10412_v20 = vld [vmem:[#allocation5 + $0x15a4] ss:$24 sps:$4 sm:$0xff]   ;;  %v10425_v50 = vld [vmem:[#allocation5 + $0x1690] ss:$24 sps:$4 sm:$0xff]  }
 0x3ea   :  { %7681 = vmatprep.subr.bf16.mxu1 %v10469_v36  ;;  %v10430_v36 = vld [vmem:[#allocation5 + $0x16c4] ss:$24 sps:$4 sm:$0xff]  }
 0x3ec   :  { %5728 = vmatpush1.bf16.msra.mxu0 %v10365_v4  ;;  %v10413_v4 = vld [vmem:[#allocation5 + $0x15d0] ss:$24 sps:$4 sm:$0xff]  }
 0x3ed   :  { %5729 = vmatprep.subr.bf16.mxu0 %v10370_v5  ;;  %7682 = vmatpush1.bf16.msra.mxu1 %v10467_v13  ;;  %v10418_v5 = vld [vmem:[#allocation5 + $0x1604] ss:$24 sps:$4 sm:$0xff]   ;;  %v10431_v13 = vld [vmem:[#allocation5 + $0x16f0] ss:$24 sps:$4 sm:$0xff]  }
 0x3ee   :  { %7683 = vmatprep.subr.bf16.mxu1 %v10472_v14  ;;  %v10436_v14 = vld [vmem:[#allocation5 + $0x1724] ss:$24 sps:$4 sm:$0xff]  }
 0x3f0   :  { %5730 = vmatpush1.bf16.msra.mxu0 %v10368_v8  ;;  %v10422_v8 = vld [vmem:[#allocation5 + $0x1660] ss:$24 sps:$4 sm:$0xff]  }
 0x3f1   :  { %5731 = vmatprep.subr.bf16.mxu0 %v10373_v9  ;;  %7684 = vmatpush1.bf16.msra.mxu1 %v10470_v63  ;;  %v10427_v9 = vld [vmem:[#allocation5 + $0x1694] ss:$24 sps:$4 sm:$0xff]   ;;  %v10437_v63 = vld [vmem:[#allocation5 + $0x1750] ss:$24 sps:$4 sm:$0xff]  }
 0x3f2   :  { %7685 = vmatprep.subr.bf16.mxu1 %v10475_v16  ;;  %v10442_v16 = vld [vmem:[#allocation5 + $0x1784] ss:$24 sps:$4 sm:$0xff]  }
 0x3f4   :  { %5732 = vmatpush1.bf16.msra.mxu0 %v10371_v10  ;;  %v10428_v10 = vld [vmem:[#allocation5 + $0x16c0] ss:$24 sps:$4 sm:$0xff]  }
 0x3f5   :  { %5733 = vmatprep.subr.bf16.mxu0 %v10376_v12  ;;  %7686 = vmatpush1.bf16.msra.mxu1 %v10473_v25  ;;  %v10433_v12 = vld [vmem:[#allocation5 + $0x16f4] ss:$24 sps:$4 sm:$0xff]   ;;  %v10443_v25 = vld [vmem:[#allocation5 + $0x17b0] ss:$24 sps:$4 sm:$0xff]  }
 0x3f6   :  { %7687 = vmatprep.subr.bf16.mxu1 %v10478_v26  ;;  %v10448_v26 = vld [vmem:[#allocation5 + $0x17e4] ss:$24 sps:$4 sm:$0xff]  }
 0x3f8   :  { %5734 = vmatpush1.bf16.msra.mxu0 %v10374_v58  ;;  %v10434_v58 = vld [vmem:[#allocation5 + $0x1720] ss:$24 sps:$4 sm:$0xff]  }
 0x3f9   :  { %5735 = vmatprep.subr.bf16.mxu0 %v10379_v15  ;;  %7688 = vmatpush1.bf16.msra.mxu1 %v10476_v29  ;;  %v10439_v15 = vld [vmem:[#allocation5 + $0x1754] ss:$24 sps:$4 sm:$0xff]   ;;  %v10491_v29 = vld [vmem:[#allocation8 + $0x8a0] ss:$24 sps:$4 sm:$0xff]  }
 0x3fa   :  { %7689 = vmatprep.subr.bf16.mxu1 %v10481_v30  ;;  %v10496_v30 = vld [vmem:[#allocation8 + $0x8d4] ss:$24 sps:$4 sm:$0xff]  }
 0x3fc   :  { %5736 = vmatpush1.bf16.msra.mxu0 %v10377_v21  ;;  %v10440_v21 = vld [vmem:[#allocation5 + $0x1780] ss:$24 sps:$4 sm:$0xff]  }
 0x3fd   :  { %5737 = vmatprep.subr.bf16.mxu0 %v10382_v42  ;;  %7690 = vmatpush1.bf16.msra.mxu1 %v10479_v35  ;;  %v10445_v42 = vld [vmem:[#allocation5 + $0x17b4] ss:$24 sps:$4 sm:$0xff]   ;;  %v921_v35 = vsub.s32 4, %v11098_v34 }
 0x3fe   :  { %7691 = vmatprep.subr.bf16.mxu1 %v10484_v37  ;;  %v925_v37 = vsub.s32 5, %v11098_v34 }
 0x400   :  { %5738 = vmatpush1.bf16.msra.mxu0 %v10380_v47  ;;  %v10446_v47 = vld [vmem:[#allocation5 + $0x17e0] ss:$24 sps:$4 sm:$0xff]  }
 0x401   :  { %5739 = vmatprep.subr.bf16.mxu0 %v10385_v27  ;;  %7692 = vmatpush1.bf16.msra.mxu1 %v10482_v46  ;;  %v10493_v27 = vld [vmem:[#allocation8 + $0x8a4] ss:$24 sps:$4 sm:$0xff]  }
 0x402   :  { %7693 = vmatprep.subr.bf16.mxu1 %v10487_v48 }
 0x404   :  { %5740 = vmatpush1.bf16.msra.mxu0 %v10383_v31  ;;  %v10494_v31 = vld [vmem:[#allocation8 + $0x8d0] ss:$24 sps:$4 sm:$0xff]  }
 0x405   :  { %5741 = vmatprep.subr.bf16.mxu0 %v10388_v32  ;;  %7694 = vmatpush1.bf16.msra.mxu1 %v10485_v52  ;;  %v10499_v32 = vld [vmem:[#allocation8 + $0xc] ss:$24 sps:$4 sm:$0xff]  }
 0x406   :  { %7695 = vmatprep.subr.bf16.mxu1 %v10490_v53 }
 0x408   :  { %5742 = vmatpush1.bf16.msra.mxu0 %v10386_v40  ;;  %v922_v40 = vrot.slane %v11102_v33, %v921_v35 }
 0x409   :  { %5743 = vmatprep.subr.bf16.mxu0 %v10391_v45  ;;  %7696 = vmatpush1.bf16.msra.mxu1 %v10488_v56 }
 0x40a   :  { %7697 = vmatprep.subr.bf16.mxu1 %v10493_v27  ;;  %v10545_v27 = vld [vmem:[#allocation8 + $0x308] ss:$24 sps:$4 sm:$0xff]  }
 0x40c   :  { %5744 = vmatpush1.bf16.msra.mxu0 %v10389_v49 }
 0x40d   :  { %5745 = vmatprep.subr.bf16.mxu0 %v10394_v51  ;;  %7698 = vmatpush1.bf16.msra.mxu1 %v10491_v29  ;;  %v10550_v29 = vld [vmem:[#allocation8 + $0x33c] ss:$24 sps:$4 sm:$0xff]  }
 0x40e   :  { %7699 = vmatprep.subr.bf16.mxu1 %v10496_v30  ;;  %v10548_v30 = vld [vmem:[#allocation8 + $0x338] ss:$24 sps:$4 sm:$0xff]  }
 0x410   :  { %5746 = vmatpush1.bf16.msra.mxu0 %v10392_v54 }
 0x411   :  { %5747 = vmatprep.subr.bf16.mxu0 %v10397_v55  ;;  %7700 = vmatpush1.bf16.msra.mxu1 %v10494_v31  ;;  %v10553_v31 = vld [vmem:[#allocation8 + $0x36c] ss:$24 sps:$4 sm:$0xff]  }
 0x412   :  { %7712 = vmatprep.subr.bf16.mxu1 %v10499_v32  ;;  %v10551_v32 = vld [vmem:[#allocation8 + $0x368] ss:$24 sps:$4 sm:$0xff]  }
 0x414   :  { %5748 = vmatpush1.bf16.msra.mxu0 %v10395_v59 }
 0x415   :  { %5749 = vmatprep.subr.bf16.mxu0 %v10400_v60 }
 0x418   :  { %5750 = vmatpush1.bf16.msra.mxu0 %v10398_v61 }
 0x419   :  { %5762 = vmatprep.subr.bf16.mxu0 %v10403_v62 }
 0x41b   :  { %5752 = vmatmul.mubr.bf16.vlgmr.msra.gmra.mrb[4].mxu0 %v11079_v38  ;;  %v10416_v38 = vld [vmem:[#allocation5 + $0x1600] ss:$24 sps:$4 sm:$0xff]  }
 0x41c   :  { %5763 = vmatpush1.bf16.msra.mxu0 %v10401_v0  ;;  %5794 = vmatprep.mubr.bf16.mxu0 %v11081_v44  ;;  %v10419_v44 = vld [vmem:[#allocation5 + $0x1630] ss:$24 sps:$4 sm:$0xff]  }
 0x41d   :  { %5764 = vmatprep.subr.bf16.mxu0 %v10406_v1  ;;  %v10497_v0 = vld [vmem:[#allocation8 + $0x8] ss:$24 sps:$4 sm:$0xff]   ;;  %v10502_v1 = vld [vmem:[#allocation8 + $0x3c] ss:$24 sps:$4 sm:$0xff]  }
 0x420   :  { %5765 = vmatpush1.bf16.msra.mxu0 %v10404_v11  ;;  %v10505_v11 = vld [vmem:[#allocation8 + $0x6c] ss:$24 sps:$4 sm:$0xff]  }
 0x421   :  { %5766 = vmatprep.subr.bf16.mxu0 %v10409_v2  ;;  %v10503_v2 = vld [vmem:[#allocation8 + $0x68] ss:$24 sps:$4 sm:$0xff]  }
 0x424   :  { %5767 = vmatpush1.bf16.msra.mxu0 %v10407_v17  ;;  %v10508_v17 = vld [vmem:[#allocation8 + $0x9c] ss:$24 sps:$4 sm:$0xff]  }
 0x425   :  { %5768 = vmatprep.subr.bf16.mxu0 %v10412_v20  ;;  %v10506_v20 = vld [vmem:[#allocation8 + $0x98] ss:$24 sps:$4 sm:$0xff]  }
 0x428   :  { %5769 = vmatpush1.bf16.msra.mxu0 %v10410_v3  ;;  %v10511_v3 = vld [vmem:[#allocation8 + $0xcc] ss:$24 sps:$4 sm:$0xff]  }
 0x429   :  { %5770 = vmatprep.subr.bf16.mxu0 %v10415_v24  ;;  %v10509_v24 = vld [vmem:[#allocation8 + $0xc8] ss:$24 sps:$4 sm:$0xff]  }
 0x42c   :  { %5771 = vmatpush1.bf16.msra.mxu0 %v10413_v4  ;;  %v10514_v4 = vld [vmem:[#allocation8 + $0xfc] ss:$24 sps:$4 sm:$0xff]  }
 0x42d   :  { %5772 = vmatprep.subr.bf16.mxu0 %v10418_v5  ;;  %v10512_v5 = vld [vmem:[#allocation8 + $0xf8] ss:$24 sps:$4 sm:$0xff]  }
 0x430   :  { %5773 = vmatpush1.bf16.msra.mxu0 %v10416_v38  ;;  %v10517_v38 = vld [vmem:[#allocation8 + $0x12c] ss:$24 sps:$4 sm:$0xff]  }
 0x431   :  { %5774 = vmatprep.subr.bf16.mxu0 %v10421_v6  ;;  %v10515_v6 = vld [vmem:[#allocation8 + $0x128] ss:$24 sps:$4 sm:$0xff]  }
 0x434   :  { %5775 = vmatpush1.bf16.msra.mxu0 %v10419_v44  ;;  %v10520_v44 = vld [vmem:[#allocation8 + $0x15c] ss:$24 sps:$4 sm:$0xff]  }
 0x435   :  { %5776 = vmatprep.subr.bf16.mxu0 %v10424_v7  ;;  %v10518_v7 = vld [vmem:[#allocation8 + $0x158] ss:$24 sps:$4 sm:$0xff]  }
 0x438   :  { %5777 = vmatpush1.bf16.msra.mxu0 %v10422_v8  ;;  %v10523_v8 = vld [vmem:[#allocation8 + $0x18c] ss:$24 sps:$4 sm:$0xff]  }
 0x439   :  { %5778 = vmatprep.subr.bf16.mxu0 %v10427_v9  ;;  %v10521_v9 = vld [vmem:[#allocation8 + $0x188] ss:$24 sps:$4 sm:$0xff]  }
 0x43c   :  { %5779 = vmatpush1.bf16.msra.mxu0 %v10425_v50  ;;  %v10526_v50 = vld [vmem:[#allocation8 + $0x1bc] ss:$24 sps:$4 sm:$0xff]  }
 0x43d   :  { %5780 = vmatprep.subr.bf16.mxu0 %v10430_v36  ;;  %v10524_v36 = vld [vmem:[#allocation8 + $0x1b8] ss:$24 sps:$4 sm:$0xff]  }
 0x440   :  { %5781 = vmatpush1.bf16.msra.mxu0 %v10428_v10  ;;  %v10529_v10 = vld [vmem:[#allocation8 + $0x1ec] ss:$24 sps:$4 sm:$0xff]  }
 0x441   :  { %5782 = vmatprep.subr.bf16.mxu0 %v10433_v12  ;;  %v10527_v12 = vld [vmem:[#allocation8 + $0x1e8] ss:$24 sps:$4 sm:$0xff]  }
 0x444   :  { %5783 = vmatpush1.bf16.msra.mxu0 %v10431_v13  ;;  %v10532_v13 = vld [vmem:[#allocation8 + $0x21c] ss:$24 sps:$4 sm:$0xff]  }
 0x445   :  { %5784 = vmatprep.subr.bf16.mxu0 %v10436_v14  ;;  %v10530_v14 = vld [vmem:[#allocation8 + $0x218] ss:$24 sps:$4 sm:$0xff]  }
 0x448   :  { %5785 = vmatpush1.bf16.msra.mxu0 %v10434_v58  ;;  %v10535_v58 = vld [vmem:[#allocation8 + $0x24c] ss:$24 sps:$4 sm:$0xff]  }
 0x449   :  { %5786 = vmatprep.subr.bf16.mxu0 %v10439_v15  ;;  %v10533_v15 = vld [vmem:[#allocation8 + $0x248] ss:$24 sps:$4 sm:$0xff]  }
 0x44c   :  { %5787 = vmatpush1.bf16.msra.mxu0 %v10437_v63  ;;  %v10538_v63 = vld [vmem:[#allocation8 + $0x27c] ss:$24 sps:$4 sm:$0xff]  }
 0x44d   :  { %5788 = vmatprep.subr.bf16.mxu0 %v10442_v16  ;;  %v10536_v16 = vld [vmem:[#allocation8 + $0x278] ss:$24 sps:$4 sm:$0xff]  }
 0x450   :  { %5789 = vmatpush1.bf16.msra.mxu0 %v10440_v21  ;;  %v10541_v21 = vld [vmem:[#allocation8 + $0x2ac] ss:$24 sps:$4 sm:$0xff]  }
 0x451   :  { %5790 = vmatprep.subr.bf16.mxu0 %v10445_v42  ;;  %v10539_v42 = vld [vmem:[#allocation8 + $0x2a8] ss:$24 sps:$4 sm:$0xff]  }
 0x454   :  { %5791 = vmatpush1.bf16.msra.mxu0 %v10443_v25  ;;  %v10544_v25 = vld [vmem:[#allocation8 + $0x2dc] ss:$24 sps:$4 sm:$0xff]  }
 0x455   :  { %5792 = vmatprep.subr.bf16.mxu0 %v10448_v26  ;;  %v10542_v26 = vld [vmem:[#allocation8 + $0x2d8] ss:$24 sps:$4 sm:$0xff]  }
 0x458   :  { %5793 = vmatpush1.bf16.msra.mxu0 %v10446_v47  ;;  %v10547_v47 = vld [vmem:[#allocation8 + $0x30c] ss:$24 sps:$4 sm:$0xff]  }
 0x45b   :  { %5795 = vmatmul.mubr.bf16.vlgmr.msra.gmra.mrb[4].mxu0 %v11087_v57  ;;  %v926_v57 = vrot.slane %v11102_v33, %v925_v37  ;;  %v10500_v33 = vld [vmem:[#allocation8 + $0x38] ss:$24 sps:$4 sm:$0xff]  }
 0x52e   :  { %v5796_v45 = vpop.f32.mrb[4].mxu0 }
 0x52f   :  { %v9065_v46 = vadd.f32 %v5796_v45, %v922_v40  ;;  %v5798_v48 = vpop.f32.mrb[5].mxu0  ;;  %v10559_v45 = vld [vmem:[#allocation8 + $0x3cc] ss:$24 sps:$4 sm:$0xff]  }
 0x530   :  { %v9066_v49 = vadd.f32 %v5798_v48, %v926_v57  ;;  %v5800_v51 = vpop.f32.mrb[6].mxu0  ;;  %v10562_v48 = vld [vmem:[#allocation8 + $0x3fc] ss:$24 sps:$4 sm:$0xff]  }
 0x531   :  { %v9067_v52 = vadd.f32 %v5800_v51, %v922_v40  ;;  %v5802_v53 = vpop.f32.mrb[7].mxu0  ;;  %v5809_v55 = vmax.f32 %v9065_v46, 0.0  ;;  %v10556_v40 = vld [vmem:[#allocation8 + $0x39c] ss:$24 sps:$4 sm:$0xff]   ;;  %v10557_v46 = vld [vmem:[#allocation8 + $0x3c8] ss:$24 sps:$4 sm:$0xff]  }
 0x532   :  { %v9068_v54 = vadd.f32 %v5802_v53, %v926_v57  ;;  %v5810_v59 = vmax.f32 %v9066_v49, 0.0  ;;  %v10554_v57 = vld [vmem:[#allocation8 + $0x398] ss:$24 sps:$4 sm:$0xff]   ;;  %v10565_v51 = vld [vmem:[#allocation8 + $0x42c] ss:$24 sps:$4 sm:$0xff]  }
 0x533   :  { %v5815_v56 = vmax.f32 %v9067_v52, 0.0  ;;  %v10560_v49 = vld [vmem:[#allocation8 + $0x3f8] ss:$24 sps:$4 sm:$0xff]   ;;  %v10563_v52 = vld [vmem:[#allocation8 + $0x428] ss:$24 sps:$4 sm:$0xff]  }
 0x534   :  { %v5816_v60 = vmax.f32 %v9068_v54, 0.0  ;;  %v10568_v53 = vld [vmem:[#allocation8 + $0x45c] ss:$24 sps:$4 sm:$0xff]   ;;  %v10566_v54 = vld [vmem:[#allocation8 + $0x458] ss:$24 sps:$4 sm:$0xff]  }
 0x535   :  { %v11147_v61 = vpack.c.bf16 %v5815_v56, %v5809_v55  ;;  %v10571_v55 = vld [vmem:[#allocation8 + $0x48c] ss:$24 sps:$4 sm:$0xff]   ;;  %v10569_v56 = vld [vmem:[#allocation8 + $0x488] ss:$24 sps:$4 sm:$0xff]  }
 0x536   :  { %v11149_v62 = vpack.c.bf16 %v5816_v60, %v5810_v59  ;;  %v10574_v59 = vld [vmem:[#allocation8 + $0x4bc] ss:$24 sps:$4 sm:$0xff]   ;;  %v10572_v60 = vld [vmem:[#allocation8 + $0x4b8] ss:$24 sps:$4 sm:$0xff]  }
 0x538   :  { %7701 = vmatprep.mubr.bf16.mxu1 %v11149_v62 }
 0x539   :  { %7702 = vmatmul.mubr.bf16.vlgmr.msra.gmra.mrb[4].mxu1 %v11147_v61 }
 0x53a   :  { %7713 = vmatpush1.bf16.msra.mxu1 %v10497_v0  ;;  %7744 = vmatprep.mubr.bf16.mxu1 %v11122_v22  ;;  %v10577_v0 = vld [vmem:[#allocation8 + $0x4ec] ss:$24 sps:$4 sm:$0xff]  }
 0x53b   :  { %7714 = vmatprep.subr.bf16.mxu1 %v10502_v1  ;;  %v10575_v1 = vld [vmem:[#allocation8 + $0x4e8] ss:$24 sps:$4 sm:$0xff]  }
 0x53e   :  { %7715 = vmatpush1.bf16.msra.mxu1 %v10500_v33  ;;  %v10580_v33 = vld [vmem:[#allocation8 + $0x51c] ss:$24 sps:$4 sm:$0xff]  }
 0x53f   :  { %7716 = vmatprep.subr.bf16.mxu1 %v10505_v11  ;;  %v10578_v11 = vld [vmem:[#allocation8 + $0x518] ss:$24 sps:$4 sm:$0xff]  }
 0x542   :  { %7717 = vmatpush1.bf16.msra.mxu1 %v10503_v2  ;;  %v10583_v2 = vld [vmem:[#allocation8 + $0x54c] ss:$24 sps:$4 sm:$0xff]  }
 0x543   :  { %7718 = vmatprep.subr.bf16.mxu1 %v10508_v17  ;;  %v10581_v17 = vld [vmem:[#allocation8 + $0x548] ss:$24 sps:$4 sm:$0xff]  }
 0x546   :  { %7719 = vmatpush1.bf16.msra.mxu1 %v10506_v20  ;;  %v10586_v20 = vld [vmem:[#allocation8 + $0x57c] ss:$24 sps:$4 sm:$0xff]  }
 0x547   :  { %7720 = vmatprep.subr.bf16.mxu1 %v10511_v3  ;;  %v10584_v3 = vld [vmem:[#allocation8 + $0x578] ss:$24 sps:$4 sm:$0xff]  }
 0x54a   :  { %7721 = vmatpush1.bf16.msra.mxu1 %v10509_v24  ;;  %v10589_v24 = vld [vmem:[#allocation8 + $0x5ac] ss:$24 sps:$4 sm:$0xff]  }
 0x54b   :  { %7722 = vmatprep.subr.bf16.mxu1 %v10514_v4  ;;  %v10587_v4 = vld [vmem:[#allocation8 + $0x5a8] ss:$24 sps:$4 sm:$0xff]  }
 0x54e   :  { %7723 = vmatpush1.bf16.msra.mxu1 %v10512_v5  ;;  %v10592_v5 = vld [vmem:[#allocation8 + $0x5dc] ss:$24 sps:$4 sm:$0xff]  }
 0x54f   :  { %7724 = vmatprep.subr.bf16.mxu1 %v10517_v38  ;;  %v10590_v38 = vld [vmem:[#allocation8 + $0x5d8] ss:$24 sps:$4 sm:$0xff]  }
 0x552   :  { %7725 = vmatpush1.bf16.msra.mxu1 %v10515_v6  ;;  %v10595_v6 = vld [vmem:[#allocation8 + $0x60c] ss:$24 sps:$4 sm:$0xff]  }
 0x553   :  { %7726 = vmatprep.subr.bf16.mxu1 %v10520_v44  ;;  %v10593_v44 = vld [vmem:[#allocation8 + $0x608] ss:$24 sps:$4 sm:$0xff]  }
 0x556   :  { %7727 = vmatpush1.bf16.msra.mxu1 %v10518_v7  ;;  %v10598_v7 = vld [vmem:[#allocation8 + $0x63c] ss:$24 sps:$4 sm:$0xff]  }
 0x557   :  { %7728 = vmatprep.subr.bf16.mxu1 %v10523_v8  ;;  %v10596_v8 = vld [vmem:[#allocation8 + $0x638] ss:$24 sps:$4 sm:$0xff]  }
 0x55a   :  { %7729 = vmatpush1.bf16.msra.mxu1 %v10521_v9  ;;  %v10601_v9 = vld [vmem:[#allocation8 + $0x66c] ss:$24 sps:$4 sm:$0xff]  }
 0x55b   :  { %7730 = vmatprep.subr.bf16.mxu1 %v10526_v50  ;;  %v10599_v50 = vld [vmem:[#allocation8 + $0x668] ss:$24 sps:$4 sm:$0xff]  }
 0x55e   :  { %7731 = vmatpush1.bf16.msra.mxu1 %v10524_v36  ;;  %v10604_v36 = vld [vmem:[#allocation8 + $0x69c] ss:$24 sps:$4 sm:$0xff]  }
 0x55f   :  { %7732 = vmatprep.subr.bf16.mxu1 %v10529_v10  ;;  %v10602_v10 = vld [vmem:[#allocation8 + $0x698] ss:$24 sps:$4 sm:$0xff]  }
 0x562   :  { %7733 = vmatpush1.bf16.msra.mxu1 %v10527_v12  ;;  %v10607_v12 = vld [vmem:[#allocation8 + $0x6cc] ss:$24 sps:$4 sm:$0xff]  }
 0x563   :  { %7734 = vmatprep.subr.bf16.mxu1 %v10532_v13  ;;  %v10605_v13 = vld [vmem:[#allocation8 + $0x6c8] ss:$24 sps:$4 sm:$0xff]  }
 0x566   :  { %7735 = vmatpush1.bf16.msra.mxu1 %v10530_v14  ;;  %v10610_v14 = vld [vmem:[#allocation8 + $0x6fc] ss:$24 sps:$4 sm:$0xff]  }
 0x567   :  { %7736 = vmatprep.subr.bf16.mxu1 %v10535_v58  ;;  %v10608_v58 = vld [vmem:[#allocation8 + $0x6f8] ss:$24 sps:$4 sm:$0xff]  }
 0x56a   :  { %7737 = vmatpush1.bf16.msra.mxu1 %v10533_v15  ;;  %v10613_v15 = vld [vmem:[#allocation8 + $0x72c] ss:$24 sps:$4 sm:$0xff]  }
 0x56b   :  { %7738 = vmatprep.subr.bf16.mxu1 %v10538_v63  ;;  %v10611_v63 = vld [vmem:[#allocation8 + $0x728] ss:$24 sps:$4 sm:$0xff]  }
 0x56e   :  { %7739 = vmatpush1.bf16.msra.mxu1 %v10536_v16  ;;  %v10616_v16 = vld [vmem:[#allocation8 + $0x75c] ss:$24 sps:$4 sm:$0xff]  }
 0x56f   :  { %7740 = vmatprep.subr.bf16.mxu1 %v10541_v21  ;;  %v10614_v21 = vld [vmem:[#allocation8 + $0x758] ss:$24 sps:$4 sm:$0xff]  }
 0x572   :  { %7741 = vmatpush1.bf16.msra.mxu1 %v10539_v42  ;;  %v10619_v42 = vld [vmem:[#allocation8 + $0x78c] ss:$24 sps:$4 sm:$0xff]  }
 0x573   :  { %7742 = vmatprep.subr.bf16.mxu1 %v10544_v25  ;;  %v10617_v25 = vld [vmem:[#allocation8 + $0x788] ss:$24 sps:$4 sm:$0xff]  }
 0x576   :  { %7743 = vmatpush1.bf16.msra.mxu1 %v10542_v26  ;;  %v10622_v26 = vld [vmem:[#allocation8 + $0x7bc] ss:$24 sps:$4 sm:$0xff]  }
 0x577   :  { %7755 = vmatprep.subr.bf16.mxu1 %v10547_v47  ;;  %v10620_v47 = vld [vmem:[#allocation8 + $0x7b8] ss:$24 sps:$4 sm:$0xff]  }
 0x579   :  { %7745 = vmatmul.mubr.bf16.vlgmr.msra.gmra.mrb[8].mxu1 %v11118_v18 }
 0x57a   :  { %7756 = vmatpush1.bf16.msra.mxu1 %v10545_v27  ;;  %7787 = vmatprep.mubr.bf16.mxu1 %v11124_v23  ;;  %v10625_v27 = vld [vmem:[#allocation8 + $0x7ec] ss:$24 sps:$4 sm:$0xff]  }
 0x57b   :  { %7757 = vmatprep.subr.bf16.mxu1 %v10550_v29  ;;  %v10623_v29 = vld [vmem:[#allocation8 + $0x7e8] ss:$24 sps:$4 sm:$0xff]  }
 0x57e   :  { %7758 = vmatpush1.bf16.msra.mxu1 %v10548_v30  ;;  %v10628_v30 = vld [vmem:[#allocation8 + $0x81c] ss:$24 sps:$4 sm:$0xff]  }
 0x57f   :  { %7759 = vmatprep.subr.bf16.mxu1 %v10553_v31  ;;  %v10626_v31 = vld [vmem:[#allocation8 + $0x818] ss:$24 sps:$4 sm:$0xff]  }
 0x582   :  { %7760 = vmatpush1.bf16.msra.mxu1 %v10551_v32  ;;  %v10631_v32 = vld [vmem:[#allocation8 + $0x84c] ss:$24 sps:$4 sm:$0xff]  }
 0x583   :  { %7761 = vmatprep.subr.bf16.mxu1 %v10556_v40  ;;  %v10629_v40 = vld [vmem:[#allocation8 + $0x848] ss:$24 sps:$4 sm:$0xff]  }
 0x586   :  { %7762 = vmatpush1.bf16.msra.mxu1 %v10554_v57  ;;  %v10634_v57 = vld [vmem:[#allocation8 + $0x87c] ss:$24 sps:$4 sm:$0xff]  }
 0x587   :  { %7763 = vmatprep.subr.bf16.mxu1 %v10559_v45  ;;  %v10632_v45 = vld [vmem:[#allocation8 + $0x878] ss:$24 sps:$4 sm:$0xff]  }
 0x58a   :  { %7764 = vmatpush1.bf16.msra.mxu1 %v10557_v46  ;;  %v10637_v46 = vld [vmem:[#allocation8 + $0x8ac] ss:$24 sps:$4 sm:$0xff]  }
 0x58b   :  { %7765 = vmatprep.subr.bf16.mxu1 %v10562_v48  ;;  %v10635_v48 = vld [vmem:[#allocation8 + $0x8a8] ss:$24 sps:$4 sm:$0xff]  }
 0x58e   :  { %7766 = vmatpush1.bf16.msra.mxu1 %v10560_v49  ;;  %v10640_v49 = vld [vmem:[#allocation8 + $0x8dc] ss:$24 sps:$4 sm:$0xff]  }
 0x58f   :  { %7767 = vmatprep.subr.bf16.mxu1 %v10565_v51  ;;  %v10638_v51 = vld [vmem:[#allocation8 + $0x8d8] ss:$24 sps:$4 sm:$0xff]  }
 0x592   :  { %7768 = vmatpush1.bf16.msra.mxu1 %v10563_v52  ;;  %v10643_v52 = vld [vmem:[#allocation8 + $0x14] ss:$24 sps:$4 sm:$0xff]  }
 0x593   :  { %7769 = vmatprep.subr.bf16.mxu1 %v10568_v53  ;;  %v10641_v53 = vld [vmem:[#allocation8 + $0x10] ss:$24 sps:$4 sm:$0xff]  }
 0x596   :  { %7770 = vmatpush1.bf16.msra.mxu1 %v10566_v54  ;;  %v10646_v54 = vld [vmem:[#allocation8 + $0x44] ss:$24 sps:$4 sm:$0xff]  }
 0x597   :  { %7771 = vmatprep.subr.bf16.mxu1 %v10571_v55  ;;  %v10644_v55 = vld [vmem:[#allocation8 + $0x40] ss:$24 sps:$4 sm:$0xff]  }
 0x59a   :  { %7772 = vmatpush1.bf16.msra.mxu1 %v10569_v56  ;;  %v10649_v56 = vld [vmem:[#allocation8 + $0x74] ss:$24 sps:$4 sm:$0xff]  }
 0x59b   :  { %7773 = vmatprep.subr.bf16.mxu1 %v10574_v59  ;;  %v10647_v59 = vld [vmem:[#allocation8 + $0x70] ss:$24 sps:$4 sm:$0xff]  }
 0x59e   :  { %7774 = vmatpush1.bf16.msra.mxu1 %v10572_v60  ;;  %v10652_v60 = vld [vmem:[#allocation8 + $0xa4] ss:$24 sps:$4 sm:$0xff]  }
 0x59f   :  { %7775 = vmatprep.subr.bf16.mxu1 %v10577_v0  ;;  %v10650_v0 = vld [vmem:[#allocation8 + $0xa0] ss:$24 sps:$4 sm:$0xff]  }
 0x5a2   :  { %7776 = vmatpush1.bf16.msra.mxu1 %v10575_v1  ;;  %v10655_v1 = vld [vmem:[#allocation8 + $0xd4] ss:$24 sps:$4 sm:$0xff]  }
 0x5a3   :  { %7777 = vmatprep.subr.bf16.mxu1 %v10580_v33  ;;  %v10653_v33 = vld [vmem:[#allocation8 + $0xd0] ss:$24 sps:$4 sm:$0xff]  }
 0x5a6   :  { %7778 = vmatpush1.bf16.msra.mxu1 %v10578_v11  ;;  %v11160_v11 = vld [vmem:[#allocation10] sm:$0x3f] }
 0x5a7   :  { %7779 = vmatprep.subr.bf16.mxu1 %v10583_v2  ;;  %v10658_v2 = vld [vmem:[#allocation8 + $0x104] ss:$24 sps:$4 sm:$0xff]  }
 0x5aa   :  { %7780 = vmatpush1.bf16.msra.mxu1 %v10581_v17  ;;  %v10656_v17 = vld [vmem:[#allocation8 + $0x100] ss:$24 sps:$4 sm:$0xff]  }
 0x5ab   :  { %7781 = vmatprep.subr.bf16.mxu1 %v10586_v20  ;;  %v6120_v20 = vrot.slane %v11160_v11, %v909_v41  ;;  %v10662_v41 = vld [vmem:[#allocation8 + $0x160] ss:$24 sps:$4 sm:$0xff]  }
 0x5ae   :  { %7782 = vmatpush1.bf16.msra.mxu1 %v10584_v3  ;;  %v10661_v3 = vld [vmem:[#allocation8 + $0x134] ss:$24 sps:$4 sm:$0xff]  }
 0x5af   :  { %7783 = vmatprep.subr.bf16.mxu1 %v10589_v24 }
 0x5b2   :  { %7784 = vmatpush1.bf16.msra.mxu1 %v10587_v4 }
 0x5b3   :  { %7785 = vmatprep.subr.bf16.mxu1 %v10592_v5 }
 0x5b6   :  { %7786 = vmatpush1.bf16.msra.mxu1 %v10590_v38 }
 0x5b7   :  { %7798 = vmatprep.subr.bf16.mxu1 %v10595_v6 }
 0x5b9   :  { %7788 = vmatmul.mubr.bf16.vlgmr.msra.gmra.mrb[8].mxu1 %v11120_v19 }
 0x5ba   :  { %7799 = vmatpush1.bf16.msra.mxu1 %v10593_v44  ;;  %7830 = vmatprep.mubr.bf16.mxu1 %v11149_v62  ;;  %v10659_v44 = vld [vmem:[#allocation8 + $0x130] ss:$24 sps:$4 sm:$0xff]  }
 0x5bb   :  { %7800 = vmatprep.subr.bf16.mxu1 %v10598_v7 }
 0x5be   :  { %7801 = vmatpush1.bf16.msra.mxu1 %v10596_v8 }
 0x5bf   :  { %7802 = vmatprep.subr.bf16.mxu1 %v10601_v9 }
 0x5c2   :  { %7803 = vmatpush1.bf16.msra.mxu1 %v10599_v50  ;;  %v10667_v50 = vld [vmem:[#allocation8 + $0x194] ss:$24 sps:$4 sm:$0xff]  }
 0x5c3   :  { %7804 = vmatprep.subr.bf16.mxu1 %v10604_v36  ;;  %v10665_v36 = vld [vmem:[#allocation8 + $0x190] ss:$24 sps:$4 sm:$0xff]  }
 0x5c6   :  { %7805 = vmatpush1.bf16.msra.mxu1 %v10602_v10  ;;  %v10670_v10 = vld [vmem:[#allocation8 + $0x1c4] ss:$24 sps:$4 sm:$0xff]  }
 0x5c7   :  { %7806 = vmatprep.subr.bf16.mxu1 %v10607_v12  ;;  %v10668_v12 = vld [vmem:[#allocation8 + $0x1c0] ss:$24 sps:$4 sm:$0xff]  }
 0x5ca   :  { %7807 = vmatpush1.bf16.msra.mxu1 %v10605_v13  ;;  %v10673_v13 = vld [vmem:[#allocation8 + $0x1f4] ss:$24 sps:$4 sm:$0xff]  }
 0x5cb   :  { %7808 = vmatprep.subr.bf16.mxu1 %v10610_v14  ;;  %v10671_v14 = vld [vmem:[#allocation8 + $0x1f0] ss:$24 sps:$4 sm:$0xff]  }
 0x5ce   :  { %7809 = vmatpush1.bf16.msra.mxu1 %v10608_v58  ;;  %v10676_v58 = vld [vmem:[#allocation8 + $0x224] ss:$24 sps:$4 sm:$0xff]  }
 0x5cf   :  { %7810 = vmatprep.subr.bf16.mxu1 %v10613_v15  ;;  %v10674_v15 = vld [vmem:[#allocation8 + $0x220] ss:$24 sps:$4 sm:$0xff]  }
 0x5d2   :  { %7811 = vmatpush1.bf16.msra.mxu1 %v10611_v63  ;;  %v10679_v63 = vld [vmem:[#allocation8 + $0x254] ss:$24 sps:$4 sm:$0xff]  }
 0x5d3   :  { %7812 = vmatprep.subr.bf16.mxu1 %v10616_v16  ;;  %v10677_v16 = vld [vmem:[#allocation8 + $0x250] ss:$24 sps:$4 sm:$0xff]  }
 0x5d6   :  { %7813 = vmatpush1.bf16.msra.mxu1 %v10614_v21  ;;  %v10682_v21 = vld [vmem:[#allocation8 + $0x284] ss:$24 sps:$4 sm:$0xff]  }
 0x5d7   :  { %7814 = vmatprep.subr.bf16.mxu1 %v10619_v42  ;;  %v10680_v42 = vld [vmem:[#allocation8 + $0x280] ss:$24 sps:$4 sm:$0xff]  }
 0x5da   :  { %7815 = vmatpush1.bf16.msra.mxu1 %v10617_v25  ;;  %v10685_v25 = vld [vmem:[#allocation8 + $0x2b4] ss:$24 sps:$4 sm:$0xff]  }
 0x5db   :  { %7816 = vmatprep.subr.bf16.mxu1 %v10622_v26  ;;  %v10683_v26 = vld [vmem:[#allocation8 + $0x2b0] ss:$24 sps:$4 sm:$0xff]  }
 0x5de   :  { %7817 = vmatpush1.bf16.msra.mxu1 %v10620_v47  ;;  %v10688_v47 = vld [vmem:[#allocation8 + $0x2e4] ss:$24 sps:$4 sm:$0xff]  }
 0x5df   :  { %7818 = vmatprep.subr.bf16.mxu1 %v10625_v27  ;;  %v10686_v27 = vld [vmem:[#allocation8 + $0x2e0] ss:$24 sps:$4 sm:$0xff]  }
 0x5e2   :  { %7819 = vmatpush1.bf16.msra.mxu1 %v10623_v29  ;;  %v10691_v29 = vld [vmem:[#allocation8 + $0x314] ss:$24 sps:$4 sm:$0xff]  }
 0x5e3   :  { %7820 = vmatprep.subr.bf16.mxu1 %v10628_v30  ;;  %v10689_v30 = vld [vmem:[#allocation8 + $0x310] ss:$24 sps:$4 sm:$0xff]  }
 0x5e6   :  { %7821 = vmatpush1.bf16.msra.mxu1 %v10626_v31  ;;  %v10694_v31 = vld [vmem:[#allocation8 + $0x344] ss:$24 sps:$4 sm:$0xff]  }
 0x5e7   :  { %7822 = vmatprep.subr.bf16.mxu1 %v10631_v32  ;;  %v10692_v32 = vld [vmem:[#allocation8 + $0x340] ss:$24 sps:$4 sm:$0xff]  }
 0x5ea   :  { %7823 = vmatpush1.bf16.msra.mxu1 %v10629_v40  ;;  %v10697_v40 = vld [vmem:[#allocation8 + $0x374] ss:$24 sps:$4 sm:$0xff]  }
 0x5eb   :  { %7824 = vmatprep.subr.bf16.mxu1 %v10634_v57  ;;  %v10695_v57 = vld [vmem:[#allocation8 + $0x370] ss:$24 sps:$4 sm:$0xff]  }
 0x5ee   :  { %7825 = vmatpush1.bf16.msra.mxu1 %v10632_v45  ;;  %v10700_v45 = vld [vmem:[#allocation8 + $0x3a4] ss:$24 sps:$4 sm:$0xff]  }
 0x5ef   :  { %7826 = vmatprep.subr.bf16.mxu1 %v10637_v46  ;;  %v10698_v46 = vld [vmem:[#allocation8 + $0x3a0] ss:$24 sps:$4 sm:$0xff]  }
 0x5f2   :  { %7827 = vmatpush1.bf16.msra.mxu1 %v10635_v48  ;;  %v10703_v48 = vld [vmem:[#allocation8 + $0x3d4] ss:$24 sps:$4 sm:$0xff]  }
 0x5f3   :  { %7828 = vmatprep.subr.bf16.mxu1 %v10640_v49  ;;  %v10701_v49 = vld [vmem:[#allocation8 + $0x3d0] ss:$24 sps:$4 sm:$0xff]  }
 0x5f6   :  { %7829 = vmatpush1.bf16.msra.mxu1 %v10638_v51  ;;  %v10706_v51 = vld [vmem:[#allocation8 + $0x404] ss:$24 sps:$4 sm:$0xff]  }
 0x5f7   :  { %7841 = vmatprep.subr.bf16.mxu1 %v10643_v52  ;;  %v10709_v52 = vld [vmem:[#allocation8 + $0x434] ss:$24 sps:$4 sm:$0xff]  }
 0x5f9   :  { %7831 = vmatmul.mubr.bf16.vlgmr.msra.gmra.mrb[8].mxu1 %v11147_v61 }
 0x5fa   :  { %7842 = vmatpush1.bf16.msra.mxu1 %v10641_v53  ;;  %7873 = vmatprep.mubr.bf16.mxu1 %v11122_v22  ;;  %v6116_v22 = vrot.slane %v11160_v11, %v905_v39  ;;  %v10664_v39 = vld [vmem:[#allocation8 + $0x164] ss:$24 sps:$4 sm:$0xff]  }
 0x5fb   :  { %7843 = vmatprep.subr.bf16.mxu1 %v10646_v54  ;;  %v10712_v53 = vld [vmem:[#allocation8 + $0x464] ss:$24 sps:$4 sm:$0xff]   ;;  %v10710_v54 = vld [vmem:[#allocation8 + $0x460] ss:$24 sps:$4 sm:$0xff]  }
 0x5fe   :  { %7844 = vmatpush1.bf16.msra.mxu1 %v10644_v55  ;;  %v10715_v55 = vld [vmem:[#allocation8 + $0x494] ss:$24 sps:$4 sm:$0xff]  }
 0x5ff   :  { %7845 = vmatprep.subr.bf16.mxu1 %v10649_v56  ;;  %v10713_v56 = vld [vmem:[#allocation8 + $0x490] ss:$24 sps:$4 sm:$0xff]  }
 0x602   :  { %7846 = vmatpush1.bf16.msra.mxu1 %v10647_v59  ;;  %v10718_v59 = vld [vmem:[#allocation8 + $0x4c4] ss:$24 sps:$4 sm:$0xff]  }
 0x603   :  { %7847 = vmatprep.subr.bf16.mxu1 %v10652_v60  ;;  %v10716_v60 = vld [vmem:[#allocation8 + $0x4c0] ss:$24 sps:$4 sm:$0xff]  }
 0x606   :  { %7848 = vmatpush1.bf16.msra.mxu1 %v10650_v0  ;;  %v10721_v0 = vld [vmem:[#allocation8 + $0x4f4] ss:$24 sps:$4 sm:$0xff]  }
 0x607   :  { %7849 = vmatprep.subr.bf16.mxu1 %v10655_v1  ;;  %v10719_v1 = vld [vmem:[#allocation8 + $0x4f0] ss:$24 sps:$4 sm:$0xff]  }
 0x60a   :  { %7850 = vmatpush1.bf16.msra.mxu1 %v10653_v33  ;;  %v10724_v33 = vld [vmem:[#allocation8 + $0x524] ss:$24 sps:$4 sm:$0xff]  }
 0x60b   :  { %7851 = vmatprep.subr.bf16.mxu1 %v10658_v2  ;;  %v10722_v2 = vld [vmem:[#allocation8 + $0x520] ss:$24 sps:$4 sm:$0xff]  }
 0x60c   :  { %v7703_v24 = vpop.f32.mrb[4].mxu1 }
 0x60d   :  { %v9069_v4 = vadd.f32 %v7703_v24, %v6116_v22  ;;  %v7705_v5 = vpop.f32.mrb[5].mxu1  ;;  %v10733_v24 = vld [vmem:[#allocation8 + $0x5b4] ss:$24 sps:$4 sm:$0xff]  }
 0x60e   :  { %v9070_v38 = vadd.f32 %v7705_v5, %v6120_v20  ;;  %7852 = vmatpush1.bf16.msra.mxu1 %v10656_v17  ;;  %v7707_v6 = vpop.f32.mrb[6].mxu1  ;;  %v10725_v17 = vld [vmem:[#allocation8 + $0x550] ss:$24 sps:$4 sm:$0xff]   ;;  %v10736_v5 = vld [vmem:[#allocation8 + $0x5e4] ss:$24 sps:$4 sm:$0xff]  }
 0x60f   :  { %7970 = vst [vmem:[#allocation11] sm:$0xff] %v9069_v4  ;;  %v9071_v7 = vadd.f32 %v7707_v6, %v6116_v22  ;;  %v7709_v8 = vpop.f32.mrb[7].mxu1  ;;  %7853 = vmatprep.subr.bf16.mxu1 %v10661_v3  ;;  %v10727_v22 = vld [vmem:[#allocation8 + $0x554] ss:$24 sps:$4 sm:$0xff]   ;;  %v10728_v3 = vld [vmem:[#allocation8 + $0x580] ss:$24 sps:$4 sm:$0xff]  }
 0x610   :  { %7971 = vst [vmem:[#allocation11 + $0x8] sm:$0xff] %v9070_v38  ;;  %v9072_v9 = vadd.f32 %v7709_v8, %v6120_v20  ;;  %v10730_v20 = vld [vmem:[#allocation8 + $0x584] ss:$24 sps:$4 sm:$0xff]   ;;  %v10731_v4 = vld [vmem:[#allocation8 + $0x5b0] ss:$24 sps:$4 sm:$0xff]  }
 0x611   :  { %7976 = vst [vmem:[#allocation11 + $0x30] sm:$0xff] %v9071_v7  ;;  %v10734_v38 = vld [vmem:[#allocation8 + $0x5e0] ss:$24 sps:$4 sm:$0xff]   ;;  %v10739_v6 = vld [vmem:[#allocation8 + $0x614] ss:$24 sps:$4 sm:$0xff]  }
 0x612   :  { %7977 = vst [vmem:[#allocation11 + $0x38] sm:$0xff] %v9072_v9  ;;  %7854 = vmatpush1.bf16.msra.mxu1 %v10659_v44  ;;  %v10737_v44 = vld [vmem:[#allocation8 + $0x610] ss:$24 sps:$4 sm:$0xff]   ;;  %v10742_v7 = vld [vmem:[#allocation8 + $0x644] ss:$24 sps:$4 sm:$0xff]  }
 0x613   :  { %7855 = vmatprep.subr.bf16.mxu1 %v10664_v39  ;;  %v10740_v8 = vld [vmem:[#allocation8 + $0x640] ss:$24 sps:$4 sm:$0xff]   ;;  %v10745_v39 = vld [vmem:[#allocation8 + $0x674] ss:$24 sps:$4 sm:$0xff]   ;;  %v10743_v9 = vld [vmem:[#allocation8 + $0x670] ss:$24 sps:$4 sm:$0xff]  }
 0x616   :  { %7856 = vmatpush1.bf16.msra.mxu1 %v10662_v41  ;;  %v10748_v41 = vld [vmem:[#allocation8 + $0x6a4] ss:$24 sps:$4 sm:$0xff]  }
 0x617   :  { %7857 = vmatprep.subr.bf16.mxu1 %v10667_v50  ;;  %v10746_v50 = vld [vmem:[#allocation8 + $0x6a0] ss:$24 sps:$4 sm:$0xff]  }
 0x61a   :  { %7858 = vmatpush1.bf16.msra.mxu1 %v10665_v36  ;;  %v10751_v36 = vld [vmem:[#allocation8 + $0x6d4] ss:$24 sps:$4 sm:$0xff]  }
 0x61b   :  { %7859 = vmatprep.subr.bf16.mxu1 %v10670_v10  ;;  %v10749_v10 = vld [vmem:[#allocation8 + $0x6d0] ss:$24 sps:$4 sm:$0xff]  }
 0x61e   :  { %7860 = vmatpush1.bf16.msra.mxu1 %v10668_v12  ;;  %v10754_v12 = vld [vmem:[#allocation8 + $0x704] ss:$24 sps:$4 sm:$0xff]  }
 0x61f   :  { %7861 = vmatprep.subr.bf16.mxu1 %v10673_v13  ;;  %v10757_v13 = vld [vmem:[#allocation8 + $0x734] ss:$24 sps:$4 sm:$0xff]  }
 0x622   :  { %7862 = vmatpush1.bf16.msra.mxu1 %v10671_v14  ;;  %v10760_v14 = vld [vmem:[#allocation8 + $0x764] ss:$24 sps:$4 sm:$0xff]  }
 0x623   :  { %7863 = vmatprep.subr.bf16.mxu1 %v10676_v58  ;;  %v10758_v58 = vld [vmem:[#allocation8 + $0x760] ss:$24 sps:$4 sm:$0xff]  }
 0x626   :  { %7864 = vmatpush1.bf16.msra.mxu1 %v10674_v15  ;;  %v10763_v15 = vld [vmem:[#allocation8 + $0x794] ss:$24 sps:$4 sm:$0xff]  }
 0x627   :  { %7865 = vmatprep.subr.bf16.mxu1 %v10679_v63  ;;  %v10761_v63 = vld [vmem:[#allocation8 + $0x790] ss:$24 sps:$4 sm:$0xff]  }
 0x62a   :  { %7866 = vmatpush1.bf16.msra.mxu1 %v10677_v16  ;;  %v10766_v16 = vld [vmem:[#allocation8 + $0x7c4] ss:$24 sps:$4 sm:$0xff]  }
 0x62b   :  { %7867 = vmatprep.subr.bf16.mxu1 %v10682_v21  ;;  %v10764_v21 = vld [vmem:[#allocation8 + $0x7c0] ss:$24 sps:$4 sm:$0xff]  }
 0x62e   :  { %7868 = vmatpush1.bf16.msra.mxu1 %v10680_v42  ;;  %v10769_v42 = vld [vmem:[#allocation8 + $0x7f4] ss:$24 sps:$4 sm:$0xff]  }
 0x62f   :  { %7869 = vmatprep.subr.bf16.mxu1 %v10685_v25  ;;  %v10767_v25 = vld [vmem:[#allocation8 + $0x7f0] ss:$24 sps:$4 sm:$0xff]  }
 0x632   :  { %7870 = vmatpush1.bf16.msra.mxu1 %v10683_v26  ;;  %v10772_v26 = vld [vmem:[#allocation8 + $0x824] ss:$24 sps:$4 sm:$0xff]  }
 0x633   :  { %7871 = vmatprep.subr.bf16.mxu1 %v10688_v47  ;;  %v10770_v47 = vld [vmem:[#allocation8 + $0x820] ss:$24 sps:$4 sm:$0xff]  }
 0x636   :  { %7872 = vmatpush1.bf16.msra.mxu1 %v10686_v27  ;;  %v10775_v27 = vld [vmem:[#allocation8 + $0x854] ss:$24 sps:$4 sm:$0xff]  }
 0x637   :  { %7884 = vmatprep.subr.bf16.mxu1 %v10691_v29  ;;  %v10773_v29 = vld [vmem:[#allocation8 + $0x850] ss:$24 sps:$4 sm:$0xff]  }
 0x639   :  { %7874 = vmatmul.mubr.bf16.vlgmr.msra.gmra.mrb[12].mxu1 %v11118_v18  ;;  %v10704_v18 = vld [vmem:[#allocation8 + $0x400] ss:$24 sps:$4 sm:$0xff]  }
 0x63a   :  { %7885 = vmatpush1.bf16.msra.mxu1 %v10689_v30  ;;  %7916 = vmatprep.mubr.bf16.mxu1 %v11124_v23  ;;  %v10707_v23 = vld [vmem:[#allocation8 + $0x430] ss:$24 sps:$4 sm:$0xff]   ;;  %v10778_v30 = vld [vmem:[#allocation8 + $0x884] ss:$24 sps:$4 sm:$0xff]  }
 0x63b   :  { %7886 = vmatprep.subr.bf16.mxu1 %v10694_v31  ;;  %v10776_v31 = vld [vmem:[#allocation8 + $0x880] ss:$24 sps:$4 sm:$0xff]  }
 0x63e   :  { %7887 = vmatpush1.bf16.msra.mxu1 %v10692_v32  ;;  %v10781_v32 = vld [vmem:[#allocation8 + $0x8b4] ss:$24 sps:$4 sm:$0xff]  }
 0x63f   :  { %7888 = vmatprep.subr.bf16.mxu1 %v10697_v40  ;;  %v10779_v40 = vld [vmem:[#allocation8 + $0x8b0] ss:$24 sps:$4 sm:$0xff]  }
 0x642   :  { %7889 = vmatpush1.bf16.msra.mxu1 %v10695_v57  ;;  %v10784_v57 = vld [vmem:[#allocation8 + $0x8e4] ss:$24 sps:$4 sm:$0xff]  }
 0x643   :  { %7890 = vmatprep.subr.bf16.mxu1 %v10700_v45  ;;  %v10782_v45 = vld [vmem:[#allocation8 + $0x8e0] ss:$24 sps:$4 sm:$0xff]  }
 0x646   :  { %7891 = vmatpush1.bf16.msra.mxu1 %v10698_v46  ;;  %v6124_v46 = vrot.slane %v11160_v11, %v913_v28  ;;  %v6132_v28 = vrot.slane %v11160_v11, %v921_v35 }
 0x647   :  { %7892 = vmatprep.subr.bf16.mxu1 %v10703_v48  ;;  %v6128_v48 = vrot.slane %v11160_v11, %v917_v43  ;;  %v6136_v43 = vrot.slane %v11160_v11, %v925_v37 }
 0x64a   :  { %7893 = vmatpush1.bf16.msra.mxu1 %v10701_v49 }
 0x64b   :  { %7894 = vmatprep.subr.bf16.mxu1 %v10706_v51 }
 0x64e   :  { %7895 = vmatpush1.bf16.msra.mxu1 %v10704_v18 }
 0x64f   :  { %7896 = vmatprep.subr.bf16.mxu1 %v10709_v52 }
 0x652   :  { %7897 = vmatpush1.bf16.msra.mxu1 %v10707_v23 }
 0x653   :  { %7898 = vmatprep.subr.bf16.mxu1 %v10712_v53 }
 0x656   :  { %7899 = vmatpush1.bf16.msra.mxu1 %v10710_v54 }
 0x657   :  { %7900 = vmatprep.subr.bf16.mxu1 %v10715_v55 }
 0x65a   :  { %7901 = vmatpush1.bf16.msra.mxu1 %v10713_v56 }
 0x65b   :  { %7902 = vmatprep.subr.bf16.mxu1 %v10718_v59 }
 0x65e   :  { %7903 = vmatpush1.bf16.msra.mxu1 %v10716_v60 }
 0x65f   :  { %7904 = vmatprep.subr.bf16.mxu1 %v10721_v0 }
 0x662   :  { %7905 = vmatpush1.bf16.msra.mxu1 %v10719_v1 }
 0x663   :  { %7906 = vmatprep.subr.bf16.mxu1 %v10724_v33 }
 0x666   :  { %7907 = vmatpush1.bf16.msra.mxu1 %v10722_v2 }
 0x667   :  { %7908 = vmatprep.subr.bf16.mxu1 %v10727_v22 }
 0x66a   :  { %7909 = vmatpush1.bf16.msra.mxu1 %v10725_v17 }
 0x66b   :  { %7910 = vmatprep.subr.bf16.mxu1 %v10730_v20 }
 0x66e   :  { %7911 = vmatpush1.bf16.msra.mxu1 %v10728_v3 }
 0x66f   :  { %7912 = vmatprep.subr.bf16.mxu1 %v10733_v24 }
 0x672   :  { %7913 = vmatpush1.bf16.msra.mxu1 %v10731_v4 }
 0x673   :  { %7914 = vmatprep.subr.bf16.mxu1 %v10736_v5 }
 0x676   :  { %7915 = vmatpush1.bf16.msra.mxu1 %v10734_v38 }
 0x677   :  { %7927 = vmatprep.subr.bf16.mxu1 %v10739_v6 }
 0x679   :  { %7917 = vmatmul.mubr.bf16.vlgmr.msra.gmra.mrb[12].mxu1 %v11120_v19  ;;  %v10752_v19 = vld [vmem:[#allocation8 + $0x700] ss:$24 sps:$4 sm:$0xff]  }
 0x67a   :  { %7928 = vmatpush1.bf16.msra.mxu1 %v10737_v44  ;;  %7959 = vmatprep.mubr.bf16.mxu1 %v11149_v62  ;;  %v10755_v62 = vld [vmem:[#allocation8 + $0x730] ss:$24 sps:$4 sm:$0xff]  }
 0x67b   :  { %7929 = vmatprep.subr.bf16.mxu1 %v10742_v7 }
 0x67e   :  { %7930 = vmatpush1.bf16.msra.mxu1 %v10740_v8 }
 0x67f   :  { %7931 = vmatprep.subr.bf16.mxu1 %v10745_v39 }
 0x682   :  { %7932 = vmatpush1.bf16.msra.mxu1 %v10743_v9 }
 0x683   :  { %7933 = vmatprep.subr.bf16.mxu1 %v10748_v41 }
 0x686   :  { %7934 = vmatpush1.bf16.msra.mxu1 %v10746_v50 }
 0x687   :  { %7935 = vmatprep.subr.bf16.mxu1 %v10751_v36 }
 0x68a   :  { %7936 = vmatpush1.bf16.msra.mxu1 %v10749_v10 }
 0x68b   :  { %7937 = vmatprep.subr.bf16.mxu1 %v10754_v12 }
 0x68e   :  { %7938 = vmatpush1.bf16.msra.mxu1 %v10752_v19 }
 0x68f   :  { %7939 = vmatprep.subr.bf16.mxu1 %v10757_v13 }
 0x692   :  { %7940 = vmatpush1.bf16.msra.mxu1 %v10755_v62 }
 0x693   :  { %7941 = vmatprep.subr.bf16.mxu1 %v10760_v14 }
 0x696   :  { %7942 = vmatpush1.bf16.msra.mxu1 %v10758_v58 }
 0x697   :  { %7943 = vmatprep.subr.bf16.mxu1 %v10763_v15 }
 0x69a   :  { %7944 = vmatpush1.bf16.msra.mxu1 %v10761_v63 }
 0x69b   :  { %7945 = vmatprep.subr.bf16.mxu1 %v10766_v16 }
 0x69e   :  { %7946 = vmatpush1.bf16.msra.mxu1 %v10764_v21 }
 0x69f   :  { %7947 = vmatprep.subr.bf16.mxu1 %v10769_v42 }
 0x6a2   :  { %7948 = vmatpush1.bf16.msra.mxu1 %v10767_v25 }
 0x6a3   :  { %7949 = vmatprep.subr.bf16.mxu1 %v10772_v26 }
 0x6a6   :  { %7950 = vmatpush1.bf16.msra.mxu1 %v10770_v47 }
 0x6a7   :  { %7951 = vmatprep.subr.bf16.mxu1 %v10775_v27 }
 0x6aa   :  { %7952 = vmatpush1.bf16.msra.mxu1 %v10773_v29 }
 0x6ab   :  { %7953 = vmatprep.subr.bf16.mxu1 %v10778_v30 }
 0x6ae   :  { %7954 = vmatpush1.bf16.msra.mxu1 %v10776_v31 }
 0x6af   :  { %7955 = vmatprep.subr.bf16.mxu1 %v10781_v32 }
 0x6b2   :  { %7956 = vmatpush1.bf16.msra.mxu1 %v10779_v40 }
 0x6b3   :  { %7957 = vmatprep.subr.bf16.mxu1 %v10784_v57 }
 0x6b6   :  { %7958 = vmatpush1.bf16.msra.mxu1 %v10782_v45 }
 0x6b9   :  { %7960 = vmatmul.mubr.bf16.vlgmr.msra.gmra.mrb[12].mxu1 %v11147_v61 }
 0x6cc   :  { %v7832_v49 = vpop.f32.mrb[8].mxu1 }
 0x6cd   :  { %v9073_v51 = vadd.f32 %v7832_v49, %v6124_v46  ;;  %v7834_v18 = vpop.f32.mrb[9].mxu1 }
 0x6ce   :  { %v9074_v52 = vadd.f32 %v7834_v18, %v6128_v48  ;;  %v7836_v23 = vpop.f32.mrb[10].mxu1 }
 0x6cf   :  { %7972 = vst [vmem:[#allocation11 + $0x10] sm:$0xff] %v9073_v51  ;;  %v9075_v53 = vadd.f32 %v7836_v23, %v6124_v46  ;;  %v7838_v54 = vpop.f32.mrb[11].mxu1 }
 0x6d0   :  { %7973 = vst [vmem:[#allocation11 + $0x18] sm:$0xff] %v9074_v52  ;;  %v9076_v55 = vadd.f32 %v7838_v54, %v6128_v48 }
 0x6d1   :  { %7978 = vst [vmem:[#allocation11 + $0x40] sm:$0xff] %v9075_v53 }
 0x6d2   :  { %7979 = vst [vmem:[#allocation11 + $0x48] sm:$0xff] %v9076_v55 }
 0x78c   :  { %v7961_v61 = vpop.f32.mrb[12].mxu1 }
 0x78d   :  { %v9077_v56 = vadd.f32 %v7961_v61, %v6132_v28  ;;  %v7963_v59 = vpop.f32.mrb[13].mxu1 }
 0x78e   :  { %v9078_v60 = vadd.f32 %v7963_v59, %v6136_v43  ;;  %v7965_v0 = vpop.f32.mrb[14].mxu1 }
 0x78f   :  { %7974 = vst [vmem:[#allocation11 + $0x20] sm:$0xff] %v9077_v56  ;;  %v9079_v1 = vadd.f32 %v7965_v0, %v6132_v28  ;;  %v7967_v33 = vpop.f32.mrb[15].mxu1 }
 0x790   :  { %7975 = vst [vmem:[#allocation11 + $0x28] sm:$0xff] %v9078_v60  ;;  %v9080_v2 = vadd.f32 %v7967_v33, %v6136_v43 }
 0x791   :  { %7980 = vst [vmem:[#allocation11 + $0x50] sm:$0xff] %v9079_v1 }
 0x792   :  { %7981 = vst [vmem:[#allocation11 + $0x58] sm:$0xff] %v9080_v2 }
 0x793   :  { %10906 = shalt.err (!%p10903_p2)
}
 0x794   :  { %s10907_s30 = scalar_lea.hbm %s11202_s5, 1536 }
 0x795   :  { %p10908_p3 = scmp.ne.s32.totalorder %s11202_s5, %s10907_s30  ;;  %p10911_p4 = scmp.lt.u32.totalorder %s10907_s30, %s11202_s5 }
 0x797   :  { %p10913_p5 = pnand %p10911_p4, %p10908_p3 }
 0x799   :  { %10916 = shalt.err (!%p10913_p5)
}
 0x79a   :  { %s10935_s11 = smov 768   ;;  %s10936_s12 = smov 48  }
 0x79b   :  { %7993 = dma.vmem_to_hbm [thread:$0]  %s7988_s27, 1536, %s11202_s5, [#allocation4], %s10935_s11, %s10935_s11, %s10936_s12  }
 0x79c   :  { %10923 = dma.done.wait [#allocation4], 1536  }
 0x79d   :  { %10924 = vsyncadd [#allocation4], 4294965760 }
 0x79e   :  { %7997 = vsyncpa [#allocation3], 1 }
 0x79f   :  { %7998 = vsyncpa [#allocation6], 1 }
 0x7a0   :  { %7999 = vsyncpa [#allocation9], 1 }
 0x7a1   :  { %8000 = vsyncpa [#allocation4], 1 }

</bundles_post_ra>
